<compile_context>
chip_gen: v5e
topology: v5e:2x2
jax: 0.10.0
libtpu: 0.0.40
codegen_flags: <defaults>
</compile_context>

<pallas_src>
import functools
import numpy as np
import jax
import jax.numpy as jnp
from jax import lax
from jax.experimental import pallas as pl
from jax.experimental.pallas import tpu as pltpu


# ----------------------------- Pallas kernel -------------------------------

def cond_rnn_kernel(pe_ref, samp_ref, tok_ref, wg_ref, vec_ref, w1_ref, w2_ref,
                    out_ref, *, D, R, E, C):
    """One row-group of R independent sequences.

    pe_ref  : [R, D*E] f32  positional encodings, step-major along lanes
    samp_ref: [R, D]   i32  teacher-forced tokens
    tok_ref : [C, E]   f32  token embedding table
    wg_ref  : [E, 8E]  f32  [w_ih | w_hh] packed along lanes
    vec_ref : [8, 128] f32  row0 = b_ih+b_hh (4E==128), row1 = b1, row2 = b2
    w1_ref  : [E, 2E]  f32, w2_ref: [2E, C] f32
    out_ref : [R, 128] f32  summed log-prob broadcast over lanes (col 0)
    """
    f32 = jnp.float32

    # ---------- batched precompute (off the serial critical path) ----------
    pe = pe_ref[...]                                       # [R, D*E]
    samp = samp_ref[...]                                   # [R, D]
    tok = tok_ref[...]                                     # [C, E]
    wg = wg_ref[...]
    w_ih = wg[:, :4 * E]
    w_hh = wg[:, 4 * E:]
    bias = vec_ref[0:1, :]                                 # [1, 4E] (4E == 128)

    def embed(col):                                        # exact VPU gather
        acc = jnp.zeros((R, E), f32)
        for cc in range(C):
            acc = acc + tok[cc:cc + 1, :] * (col == cc).astype(f32)
        return acc

    # x_d = token_embed[s_d] + pos_emb_d for d = 0..D-2; step D-1's update is
    # computed-and-discarded by the torch loop, so its projection is skipped.
    x_list = [embed(samp[:, d:d + 1]) + pe[:, d * E:(d + 1) * E]
              for d in range(D - 1)]
    if D > 1:
        x_all = jnp.concatenate(x_list, axis=0)            # [(D-1)*R, E]
        gates_in = jnp.dot(x_all, w_ih, preferred_element_type=f32) + bias

    # ---------- initial state: lstm(pos_emb[0], (0, 0)) --------------------
    g0 = jnp.dot(pe[:, 0:E], w_ih, preferred_element_type=f32) + bias
    sg0 = jax.nn.sigmoid(g0)
    tg0 = jnp.tanh(g0)
    c = sg0[:, 0 * E:1 * E] * tg0[:, 2 * E:3 * E]          # f*0 + i*g
    h = sg0[:, 3 * E:4 * E] * jnp.tanh(c)

    # ---------- serial recurrence: only h @ w_hh + gates on the chain ------
    h_list = [h]
    for i in range(D - 1):                  # fully unrolled (D static, small)
        pre = gates_in[i * R:(i + 1) * R, :]
        # dot + add kept adjacent so v7x can use MRB in-place accumulation
        gates = jnp.dot(h, w_hh, preferred_element_type=f32) + pre
        sg = jax.nn.sigmoid(gates)          # one sigmoid over the full 4E vreg
        tg = jnp.tanh(gates)                # one tanh over the full 4E vreg
        c = sg[:, 1 * E:2 * E] * c + sg[:, 0 * E:1 * E] * tg[:, 2 * E:3 * E]
        h = sg[:, 3 * E:4 * E] * jnp.tanh(c)
        h_list.append(h)

    # ---------- batched MLP + log-softmax + gather over all D*R rows --------
    H = jnp.concatenate(h_list, axis=0)                    # [D*R, E], no scratch
    w1 = w1_ref[...]
    w2 = w2_ref[...]
    b1 = vec_ref[1:2, 0:2 * E]
    b2 = vec_ref[2:3, 0:C]
    hid = jnp.maximum(jnp.dot(H, w1, preferred_element_type=f32) + b1, 0.0)
    logits = jnp.dot(hid, w2, preferred_element_type=f32) + b2     # [D*R, C]
    m = jnp.max(logits, axis=-1, keepdims=True)
    lse = jnp.log(jnp.sum(jnp.exp(logits - m), axis=-1, keepdims=True))

    # rebuild the one-hot only now (single VPU compare), gather the logits
    samp2 = samp_ref[...]
    iota_c = lax.broadcasted_iota(jnp.int32, (R, C), 1)
    oh = jnp.concatenate(
        [(samp2[:, d:d + 1] == iota_c).astype(f32) for d in range(D)], axis=0)
    gathered = jnp.sum(logits * oh, axis=-1, keepdims=True)        # [D*R, 1]
    lp = gathered - m - lse

    total = lp[0:R, :]
    for d in range(1, D):
        total = total + lp[d * R:(d + 1) * R, :]                   # [R, 1]

    out_ref[...] = jnp.broadcast_to(total, (R, 128))   # lane-dense store


# ------------------------------- wrapper ------------------------------------

def pos_encoding(pos_list, embed_dim, base=10000.0):
    # aloe PosEncoding: feature i -> sin(pos * base**(-(i - i%2)/dim) + shift),
    # shift = pi/2 for odd i (i.e. cos), 0 for even i.
    i = np.arange(embed_dim)
    scale = jnp.asarray(base ** (-(i - (i % 2)) / embed_dim), jnp.float32)
    shift = jnp.asarray(np.where(i % 2 == 1, np.pi / 2.0, 0.0), jnp.float32)
    pos = pos_list.astype(jnp.float32)[..., None]                 # [B, D, 1]
    return jnp.sin(pos * scale[None, None, :] + shift[None, None, :])


def pack_params(params):
    """One-time packing of the model weights into lane-dense kernel operands."""
    C, E = params["token_embed"].shape
    assert 4 * E == 128, "kernel assumes 4*embed_dim == 128 (one gate vreg)"
    w_gate = jnp.concatenate([params["w_ih"], params["w_hh"]], axis=1)  # [E, 8E]
    vec = jnp.zeros((8, 128), jnp.float32)
    vec = vec.at[0, :4 * E].set((params["b_ih"] + params["b_hh"])[0])
    vec = vec.at[1, :2 * E].set(params["b1"][0])
    vec = vec.at[2, :C].set(params["b2"][0])
    return {"token_embed": params["token_embed"], "w_gate": w_gate,
            "vec_pack": vec, "w1": params["w1"], "w2": params["w2"]}


def cond_rnn_log_prob(pos_list, input_samples, packed, *, rows_per_block=128):
    """pos_list, input_samples: [B, D] -> log_probs [B, 1] (teacher-forced)."""
    B, D = pos_list.shape
    C, E = packed["token_embed"].shape
    assert input_samples.shape == (B, D)
    assert 4 * E == 128 and C <= 128

    rb = max(8, (rows_per_block // 8) * 8)
    R = ((B + 7) // 8) * 8 if B <= rb else rb       # rows per grid step
    n_pad = ((B + R - 1) // R) * R
    grid = (n_pad // R,)

    # Remaining per-call glue: pad + positional encoding (batch-major layout,
    # no transposes / dynamic-update-slices).
    # TODO(synk): move the sin() positional encoding into the kernel (EUP);
    #   kept host-side here for lowering portability.
    pe = pos_encoding(pos_list, E).reshape(B, D * E)
    pe = jnp.pad(pe, ((0, n_pad - B), (0, 0)))
    samp = jnp.pad(input_samples.astype(jnp.int32), ((0, n_pad - B), (0, 0)))

    out = pl.pallas_call(
        functools.partial(cond_rnn_kernel, D=D, R=R, E=E, C=C),
        out_shape=jax.ShapeDtypeStruct((n_pad, 128), jnp.float32),
        grid_spec=pltpu.PrefetchScalarGridSpec(
            num_scalar_prefetch=0,
            grid=grid,
            in_specs=[
                pl.BlockSpec((R, D * E), lambda g: (g, 0)),   # pos encodings
                pl.BlockSpec((R, D), lambda g: (g, 0)),        # samples
                pl.BlockSpec((C, E), lambda g: (0, 0)),        # token_embed
                pl.BlockSpec((E, 8 * E), lambda g: (0, 0)),    # [w_ih | w_hh]
                pl.BlockSpec((8, 128), lambda g: (0, 0)),      # packed biases
                pl.BlockSpec((E, 2 * E), lambda g: (0, 0)),    # w1
                pl.BlockSpec((2 * E, C), lambda g: (0, 0)),    # w2
            ],
            out_specs=pl.BlockSpec((R, 128), lambda g: (g, 0)),
        ),
        compiler_params=pltpu.CompilerParams(
            dimension_semantics=("parallel",)),    # v7x: row-groups across TCs
    )(pe, samp, packed["token_embed"], packed["w_gate"], packed["vec_pack"],
      packed["w1"], packed["w2"])
    return out[:B, 0:1]


# ------------------------------- JAX glue -----------------------------------

def make_params(key, n_choices, embed_dim):
    E, C = embed_dim, n_choices

    def glorot(k, shape):
        fan_in, fan_out = shape
        lim = np.sqrt(6.0 / (fan_in + fan_out))
        return jax.random.uniform(k, shape, jnp.float32, -lim, lim)

    ks = jax.random.split(key, 9)
    lstm_lim = 1.0 / np.sqrt(E)
    return {
        "token_embed": glorot(ks[0], (C, E)),
        # LSTMCell(E, E): stored transposed relative to torch ([in, 4E])
        "w_ih": glorot(ks[1], (E, 4 * E)),
        "w_hh": glorot(ks[2], (E, 4 * E)),
        "b_ih": jax.random.uniform(ks[3], (1, 4 * E), jnp.float32,
                                   -lstm_lim, lstm_lim),
        "b_hh": jax.random.uniform(ks[4], (1, 4 * E), jnp.float32,
                                   -lstm_lim, lstm_lim),
        # MLP(E, [2E, C]); biases zeroed (as in aloe glorot_uniform init)
        "w1": glorot(ks[5], (E, 2 * E)),
        "b1": jnp.zeros((1, 2 * E), jnp.float32),
        "w2": glorot(ks[6], (2 * E, C)),
        "b2": jnp.zeros((1, C), jnp.float32),
    }


def reference(pos_list, samples, params):
    """Pure-JAX mirror of the teacher-forced forward, for validation."""
    B, D = pos_list.shape
    E = params["token_embed"].shape[1]
    pe = pos_encoding(pos_list, E)                  # [B, D, E]

    def lstm(x, h, c):
        gates = (x @ params["w_ih"] + params["b_ih"]
                 + h @ params["w_hh"] + params["b_hh"])
        i_g = jax.nn.sigmoid(gates[:, 0 * E:1 * E])
        f_g = jax.nn.sigmoid(gates[:, 1 * E:2 * E])
        g_g = jnp.tanh(gates[:, 2 * E:3 * E])
        o_g = jax.nn.sigmoid(gates[:, 3 * E:4 * E])
        c_new = f_g * c + i_g * g_g
        return o_g * jnp.tanh(c_new), c_new

    zeros = jnp.zeros((B, E), jnp.float32)
    h, c = lstm(pe[:, 0, :], zeros, zeros)
    lp = jnp.zeros((B, 1), jnp.float32)
    for i in range(D):
        hid = jnp.maximum(h @ params["w1"] + params["b1"], 0.0)
        logits = hid @ params["w2"] + params["b2"]
        log_sm = jax.nn.log_softmax(logits, axis=-1)
        s = samples[:, i:i + 1].astype(jnp.int32)
        lp = lp + jnp.take_along_axis(log_sm, s, axis=-1)
        x = params["token_embed"][samples[:, i]] + pe[:, i, :]
        h, c = lstm(x, h, c)
    return lp


# --------------------------------- main --------------------------------------

if __name__ == "__main__":
    B, D, E, C = 4, 8, 32, 16   # batch, discrete_dim, embed_dim, n_choices

    key = jax.random.PRNGKey(0)
    k_pos, k_samp, k_par, k_pos2, k_samp2 = jax.random.split(key, 5)

    params = make_params(k_par, C, E)
    packed = pack_params(params)

    # -- small case (matches the original module's tiny demo shapes) --------
    pos_list = jax.random.randint(k_pos, (B, D), 0, 64)            # [B, D]
    input_samples = jax.random.randint(k_samp, (B, D), 0, C)       # [B, D]

    out = jax.block_until_ready(cond_rnn_log_prob(pos_list, input_samples,
                                                  packed))
    ref = jax.block_until_ready(reference(pos_list, input_samples, params))
    assert out.shape == (B, 1), out.shape
    np.testing.assert_allclose(np.asarray(out), np.asarray(ref),
                               rtol=5e-2, atol=5e-2)

    # -- batched case: many independent problems fused in one pallas_call ---
    # (exercises row-group tiling, padding, grid > 1 and "parallel" semantics)
    B2 = 100
    pos2 = jax.random.randint(k_pos2, (B2, D), 0, 64)
    samp2 = jax.random.randint(k_samp2, (B2, D), 0, C)
    out2 = jax.block_until_ready(
        cond_rnn_log_prob(pos2, samp2, packed, rows_per_block=64))
    ref2 = jax.block_until_ready(reference(pos2, samp2, params))
    assert out2.shape == (B2, 1), out2.shape
    np.testing.assert_allclose(np.asarray(out2), np.asarray(ref2),
                               rtol=5e-2, atol=5e-2)

    print("KERNEL_OK")
</pallas_src>

<mosaic_0001>
module attributes {stable_mosaic.version = 11 : i64} {
  func.func @cond_rnn_kernel(%arg0: i32, %arg1: memref<8x256xf32, #tpu.memory_space<vmem>>, %arg2: memref<8x8xi32, #tpu.memory_space<vmem>>, %arg3: memref<16x32xf32, #tpu.memory_space<vmem>>, %arg4: memref<32x256xf32, #tpu.memory_space<vmem>>, %arg5: memref<8x128xf32, #tpu.memory_space<vmem>>, %arg6: memref<32x64xf32, #tpu.memory_space<vmem>>, %arg7: memref<64x16xf32, #tpu.memory_space<vmem>>, %arg8: memref<8x128xf32, #tpu.memory_space<vmem>>) attributes {dimension_semantics = [#tpu.dimension_semantics<parallel>], iteration_bounds = array<i64: 1>, scalar_prefetch = 0 : i64, scratch_operands = 0 : i64, tpu.core_type = #tpu.core_type<tc>, window_params = [{transform_indices = @transform_0, window_bounds = array<i64: 8, 256>}, {transform_indices = @transform_1, window_bounds = array<i64: 8, 8>}, {pipeline_mode = #tpu.pipeline_mode<synchronous>, transform_indices = @transform_2, window_bounds = array<i64: 16, 32>}, {pipeline_mode = #tpu.pipeline_mode<synchronous>, transform_indices = @transform_3, window_bounds = array<i64: 32, 256>}, {pipeline_mode = #tpu.pipeline_mode<synchronous>, transform_indices = @transform_4, window_bounds = array<i64: 8, 128>}, {pipeline_mode = #tpu.pipeline_mode<synchronous>, transform_indices = @transform_5, window_bounds = array<i64: 32, 64>}, {pipeline_mode = #tpu.pipeline_mode<synchronous>, transform_indices = @transform_6, window_bounds = array<i64: 64, 16>}, {transform_indices = @transform_7, window_bounds = array<i64: 8, 128>}]} {
    %c0 = arith.constant 0 : index
    %c0_0 = arith.constant 0 : index
    %0 = vector.load %arg1[%c0, %c0_0] : memref<8x256xf32, #tpu.memory_space<vmem>>, vector<8x256xf32>
    %c0_1 = arith.constant 0 : index
    %c0_2 = arith.constant 0 : index
    %1 = vector.load %arg2[%c0_1, %c0_2] : memref<8x8xi32, #tpu.memory_space<vmem>>, vector<8x8xi32>
    %c0_3 = arith.constant 0 : index
    %c0_4 = arith.constant 0 : index
    %2 = vector.load %arg3[%c0_3, %c0_4] : memref<16x32xf32, #tpu.memory_space<vmem>>, vector<16x32xf32>
    %c0_5 = arith.constant 0 : index
    %c0_6 = arith.constant 0 : index
    %3 = vector.load %arg4[%c0_5, %c0_6] : memref<32x256xf32, #tpu.memory_space<vmem>>, vector<32x256xf32>
    %4 = vector.extract_strided_slice %3 {offsets = [0, 0], sizes = [32, 128], strides = [1, 1]} : vector<32x256xf32> to vector<32x128xf32>
    %5 = vector.extract_strided_slice %3 {offsets = [0, 128], sizes = [32, 128], strides = [1, 1]} : vector<32x256xf32> to vector<32x128xf32>
    %c0_7 = arith.constant 0 : index
    %c0_8 = arith.constant 0 : index
    %6 = vector.load %arg5[%c0_7, %c0_8] : memref<8x128xf32, #tpu.memory_space<vmem>>, vector<1x128xf32>
    %7 = vector.extract_strided_slice %1 {offsets = [0, 0], sizes = [8, 1], strides = [1, 1]} : vector<8x8xi32> to vector<8x1xi32>
    %cst = arith.constant 0.000000e+00 : f32
    %8 = vector.broadcast %cst : f32 to vector<8x32xf32>
    %9 = vector.extract_strided_slice %2 {offsets = [0, 0], sizes = [1, 32], strides = [1, 1]} : vector<16x32xf32> to vector<1x32xf32>
    %c0_i32 = arith.constant 0 : i32
    %10 = vector.broadcast %c0_i32 : i32 to vector<8x1xi32>
    %11 = arith.cmpi eq, %7, %10 : vector<8x1xi32>
    %12 = arith.extui %11 : vector<8x1xi1> to vector<8x1xi32>
    %13 = arith.sitofp %12 : vector<8x1xi32> to vector<8x1xf32>
    %14 = vector.broadcast %9 : vector<1x32xf32> to vector<8x32xf32>
    %15 = vector.broadcast %13 : vector<8x1xf32> to vector<8x32xf32>
    %16 = arith.mulf %14, %15 : vector<8x32xf32>
    %17 = arith.addf %8, %16 : vector<8x32xf32>
    %18 = vector.extract_strided_slice %2 {offsets = [1, 0], sizes = [1, 32], strides = [1, 1]} : vector<16x32xf32> to vector<1x32xf32>
    %c1_i32 = arith.constant 1 : i32
    %19 = vector.broadcast %c1_i32 : i32 to vector<8x1xi32>
    %20 = arith.cmpi eq, %7, %19 : vector<8x1xi32>
    %21 = arith.extui %20 : vector<8x1xi1> to vector<8x1xi32>
    %22 = arith.sitofp %21 : vector<8x1xi32> to vector<8x1xf32>
    %23 = vector.broadcast %18 : vector<1x32xf32> to vector<8x32xf32>
    %24 = vector.broadcast %22 : vector<8x1xf32> to vector<8x32xf32>
    %25 = arith.mulf %23, %24 : vector<8x32xf32>
    %26 = arith.addf %17, %25 : vector<8x32xf32>
    %27 = vector.extract_strided_slice %2 {offsets = [2, 0], sizes = [1, 32], strides = [1, 1]} : vector<16x32xf32> to vector<1x32xf32>
    %c2_i32 = arith.constant 2 : i32
    %28 = vector.broadcast %c2_i32 : i32 to vector<8x1xi32>
    %29 = arith.cmpi eq, %7, %28 : vector<8x1xi32>
    %30 = arith.extui %29 : vector<8x1xi1> to vector<8x1xi32>
    %31 = arith.sitofp %30 : vector<8x1xi32> to vector<8x1xf32>
    %32 = vector.broadcast %27 : vector<1x32xf32> to vector<8x32xf32>
    %33 = vector.broadcast %31 : vector<8x1xf32> to vector<8x32xf32>
    %34 = arith.mulf %32, %33 : vector<8x32xf32>
    %35 = arith.addf %26, %34 : vector<8x32xf32>
    %36 = vector.extract_strided_slice %2 {offsets = [3, 0], sizes = [1, 32], strides = [1, 1]} : vector<16x32xf32> to vector<1x32xf32>
    %c3_i32 = arith.constant 3 : i32
    %37 = vector.broadcast %c3_i32 : i32 to vector<8x1xi32>
    %38 = arith.cmpi eq, %7, %37 : vector<8x1xi32>
    %39 = arith.extui %38 : vector<8x1xi1> to vector<8x1xi32>
    %40 = arith.sitofp %39 : vector<8x1xi32> to vector<8x1xf32>
    %41 = vector.broadcast %36 : vector<1x32xf32> to vector<8x32xf32>
    %42 = vector.broadcast %40 : vector<8x1xf32> to vector<8x32xf32>
    %43 = arith.mulf %41, %42 : vector<8x32xf32>
    %44 = arith.addf %35, %43 : vector<8x32xf32>
    %45 = vector.extract_strided_slice %2 {offsets = [4, 0], sizes = [1, 32], strides = [1, 1]} : vector<16x32xf32> to vector<1x32xf32>
    %c4_i32 = arith.constant 4 : i32
    %46 = vector.broadcast %c4_i32 : i32 to vector<8x1xi32>
    %47 = arith.cmpi eq, %7, %46 : vector<8x1xi32>
    %48 = arith.extui %47 : vector<8x1xi1> to vector<8x1xi32>
    %49 = arith.sitofp %48 : vector<8x1xi32> to vector<8x1xf32>
    %50 = vector.broadcast %45 : vector<1x32xf32> to vector<8x32xf32>
    %51 = vector.broadcast %49 : vector<8x1xf32> to vector<8x32xf32>
    %52 = arith.mulf %50, %51 : vector<8x32xf32>
    %53 = arith.addf %44, %52 : vector<8x32xf32>
    %54 = vector.extract_strided_slice %2 {offsets = [5, 0], sizes = [1, 32], strides = [1, 1]} : vector<16x32xf32> to vector<1x32xf32>
    %c5_i32 = arith.constant 5 : i32
    %55 = vector.broadcast %c5_i32 : i32 to vector<8x1xi32>
    %56 = arith.cmpi eq, %7, %55 : vector<8x1xi32>
    %57 = arith.extui %56 : vector<8x1xi1> to vector<8x1xi32>
    %58 = arith.sitofp %57 : vector<8x1xi32> to vector<8x1xf32>
    %59 = vector.broadcast %54 : vector<1x32xf32> to vector<8x32xf32>
    %60 = vector.broadcast %58 : vector<8x1xf32> to vector<8x32xf32>
    %61 = arith.mulf %59, %60 : vector<8x32xf32>
    %62 = arith.addf %53, %61 : vector<8x32xf32>
    %63 = vector.extract_strided_slice %2 {offsets = [6, 0], sizes = [1, 32], strides = [1, 1]} : vector<16x32xf32> to vector<1x32xf32>
    %c6_i32 = arith.constant 6 : i32
    %64 = vector.broadcast %c6_i32 : i32 to vector<8x1xi32>
    %65 = arith.cmpi eq, %7, %64 : vector<8x1xi32>
    %66 = arith.extui %65 : vector<8x1xi1> to vector<8x1xi32>
    %67 = arith.sitofp %66 : vector<8x1xi32> to vector<8x1xf32>
    %68 = vector.broadcast %63 : vector<1x32xf32> to vector<8x32xf32>
    %69 = vector.broadcast %67 : vector<8x1xf32> to vector<8x32xf32>
    %70 = arith.mulf %68, %69 : vector<8x32xf32>
    %71 = arith.addf %62, %70 : vector<8x32xf32>
    %72 = vector.extract_strided_slice %2 {offsets = [7, 0], sizes = [1, 32], strides = [1, 1]} : vector<16x32xf32> to vector<1x32xf32>
    %c7_i32 = arith.constant 7 : i32
    %73 = vector.broadcast %c7_i32 : i32 to vector<8x1xi32>
    %74 = arith.cmpi eq, %7, %73 : vector<8x1xi32>
    %75 = arith.extui %74 : vector<8x1xi1> to vector<8x1xi32>
    %76 = arith.sitofp %75 : vector<8x1xi32> to vector<8x1xf32>
    %77 = vector.broadcast %72 : vector<1x32xf32> to vector<8x32xf32>
    %78 = vector.broadcast %76 : vector<8x1xf32> to vector<8x32xf32>
    %79 = arith.mulf %77, %78 : vector<8x32xf32>
    %80 = arith.addf %71, %79 : vector<8x32xf32>
    %81 = vector.extract_strided_slice %2 {offsets = [8, 0], sizes = [1, 32], strides = [1, 1]} : vector<16x32xf32> to vector<1x32xf32>
    %c8_i32 = arith.constant 8 : i32
    %82 = vector.broadcast %c8_i32 : i32 to vector<8x1xi32>
    %83 = arith.cmpi eq, %7, %82 : vector<8x1xi32>
    %84 = arith.extui %83 : vector<8x1xi1> to vector<8x1xi32>
    %85 = arith.sitofp %84 : vector<8x1xi32> to vector<8x1xf32>
    %86 = vector.broadcast %81 : vector<1x32xf32> to vector<8x32xf32>
    %87 = vector.broadcast %85 : vector<8x1xf32> to vector<8x32xf32>
    %88 = arith.mulf %86, %87 : vector<8x32xf32>
    %89 = arith.addf %80, %88 : vector<8x32xf32>
    %90 = vector.extract_strided_slice %2 {offsets = [9, 0], sizes = [1, 32], strides = [1, 1]} : vector<16x32xf32> to vector<1x32xf32>
    %c9_i32 = arith.constant 9 : i32
    %91 = vector.broadcast %c9_i32 : i32 to vector<8x1xi32>
    %92 = arith.cmpi eq, %7, %91 : vector<8x1xi32>
    %93 = arith.extui %92 : vector<8x1xi1> to vector<8x1xi32>
    %94 = arith.sitofp %93 : vector<8x1xi32> to vector<8x1xf32>
    %95 = vector.broadcast %90 : vector<1x32xf32> to vector<8x32xf32>
    %96 = vector.broadcast %94 : vector<8x1xf32> to vector<8x32xf32>
    %97 = arith.mulf %95, %96 : vector<8x32xf32>
    %98 = arith.addf %89, %97 : vector<8x32xf32>
    %99 = vector.extract_strided_slice %2 {offsets = [10, 0], sizes = [1, 32], strides = [1, 1]} : vector<16x32xf32> to vector<1x32xf32>
    %c10_i32 = arith.constant 10 : i32
    %100 = vector.broadcast %c10_i32 : i32 to vector<8x1xi32>
    %101 = arith.cmpi eq, %7, %100 : vector<8x1xi32>
    %102 = arith.extui %101 : vector<8x1xi1> to vector<8x1xi32>
    %103 = arith.sitofp %102 : vector<8x1xi32> to vector<8x1xf32>
    %104 = vector.broadcast %99 : vector<1x32xf32> to vector<8x32xf32>
    %105 = vector.broadcast %103 : vector<8x1xf32> to vector<8x32xf32>
    %106 = arith.mulf %104, %105 : vector<8x32xf32>
    %107 = arith.addf %98, %106 : vector<8x32xf32>
    %108 = vector.extract_strided_slice %2 {offsets = [11, 0], sizes = [1, 32], strides = [1, 1]} : vector<16x32xf32> to vector<1x32xf32>
    %c11_i32 = arith.constant 11 : i32
    %109 = vector.broadcast %c11_i32 : i32 to vector<8x1xi32>
    %110 = arith.cmpi eq, %7, %109 : vector<8x1xi32>
    %111 = arith.extui %110 : vector<8x1xi1> to vector<8x1xi32>
    %112 = arith.sitofp %111 : vector<8x1xi32> to vector<8x1xf32>
    %113 = vector.broadcast %108 : vector<1x32xf32> to vector<8x32xf32>
    %114 = vector.broadcast %112 : vector<8x1xf32> to vector<8x32xf32>
    %115 = arith.mulf %113, %114 : vector<8x32xf32>
    %116 = arith.addf %107, %115 : vector<8x32xf32>
    %117 = vector.extract_strided_slice %2 {offsets = [12, 0], sizes = [1, 32], strides = [1, 1]} : vector<16x32xf32> to vector<1x32xf32>
    %c12_i32 = arith.constant 12 : i32
    %118 = vector.broadcast %c12_i32 : i32 to vector<8x1xi32>
    %119 = arith.cmpi eq, %7, %118 : vector<8x1xi32>
    %120 = arith.extui %119 : vector<8x1xi1> to vector<8x1xi32>
    %121 = arith.sitofp %120 : vector<8x1xi32> to vector<8x1xf32>
    %122 = vector.broadcast %117 : vector<1x32xf32> to vector<8x32xf32>
    %123 = vector.broadcast %121 : vector<8x1xf32> to vector<8x32xf32>
    %124 = arith.mulf %122, %123 : vector<8x32xf32>
    %125 = arith.addf %116, %124 : vector<8x32xf32>
    %126 = vector.extract_strided_slice %2 {offsets = [13, 0], sizes = [1, 32], strides = [1, 1]} : vector<16x32xf32> to vector<1x32xf32>
    %c13_i32 = arith.constant 13 : i32
    %127 = vector.broadcast %c13_i32 : i32 to vector<8x1xi32>
    %128 = arith.cmpi eq, %7, %127 : vector<8x1xi32>
    %129 = arith.extui %128 : vector<8x1xi1> to vector<8x1xi32>
    %130 = arith.sitofp %129 : vector<8x1xi32> to vector<8x1xf32>
    %131 = vector.broadcast %126 : vector<1x32xf32> to vector<8x32xf32>
    %132 = vector.broadcast %130 : vector<8x1xf32> to vector<8x32xf32>
    %133 = arith.mulf %131, %132 : vector<8x32xf32>
    %134 = arith.addf %125, %133 : vector<8x32xf32>
    %135 = vector.extract_strided_slice %2 {offsets = [14, 0], sizes = [1, 32], strides = [1, 1]} : vector<16x32xf32> to vector<1x32xf32>
    %c14_i32 = arith.constant 14 : i32
    %136 = vector.broadcast %c14_i32 : i32 to vector<8x1xi32>
    %137 = arith.cmpi eq, %7, %136 : vector<8x1xi32>
    %138 = arith.extui %137 : vector<8x1xi1> to vector<8x1xi32>
    %139 = arith.sitofp %138 : vector<8x1xi32> to vector<8x1xf32>
    %140 = vector.broadcast %135 : vector<1x32xf32> to vector<8x32xf32>
    %141 = vector.broadcast %139 : vector<8x1xf32> to vector<8x32xf32>
    %142 = arith.mulf %140, %141 : vector<8x32xf32>
    %143 = arith.addf %134, %142 : vector<8x32xf32>
    %144 = vector.extract_strided_slice %2 {offsets = [15, 0], sizes = [1, 32], strides = [1, 1]} : vector<16x32xf32> to vector<1x32xf32>
    %c15_i32 = arith.constant 15 : i32
    %145 = vector.broadcast %c15_i32 : i32 to vector<8x1xi32>
    %146 = arith.cmpi eq, %7, %145 : vector<8x1xi32>
    %147 = arith.extui %146 : vector<8x1xi1> to vector<8x1xi32>
    %148 = arith.sitofp %147 : vector<8x1xi32> to vector<8x1xf32>
    %149 = vector.broadcast %144 : vector<1x32xf32> to vector<8x32xf32>
    %150 = vector.broadcast %148 : vector<8x1xf32> to vector<8x32xf32>
    %151 = arith.mulf %149, %150 : vector<8x32xf32>
    %152 = arith.addf %143, %151 : vector<8x32xf32>
    %153 = vector.extract_strided_slice %0 {offsets = [0, 0], sizes = [8, 32], strides = [1, 1]} : vector<8x256xf32> to vector<8x32xf32>
    %154 = arith.addf %152, %153 : vector<8x32xf32>
    %155 = vector.extract_strided_slice %1 {offsets = [0, 1], sizes = [8, 1], strides = [1, 1]} : vector<8x8xi32> to vector<8x1xi32>
    %cst_9 = arith.constant 0.000000e+00 : f32
    %156 = vector.broadcast %cst_9 : f32 to vector<8x32xf32>
    %157 = vector.extract_strided_slice %2 {offsets = [0, 0], sizes = [1, 32], strides = [1, 1]} : vector<16x32xf32> to vector<1x32xf32>
    %c0_i32_10 = arith.constant 0 : i32
    %158 = vector.broadcast %c0_i32_10 : i32 to vector<8x1xi32>
    %159 = arith.cmpi eq, %155, %158 : vector<8x1xi32>
    %160 = arith.extui %159 : vector<8x1xi1> to vector<8x1xi32>
    %161 = arith.sitofp %160 : vector<8x1xi32> to vector<8x1xf32>
    %162 = vector.broadcast %157 : vector<1x32xf32> to vector<8x32xf32>
    %163 = vector.broadcast %161 : vector<8x1xf32> to vector<8x32xf32>
    %164 = arith.mulf %162, %163 : vector<8x32xf32>
    %165 = arith.addf %156, %164 : vector<8x32xf32>
    %166 = vector.extract_strided_slice %2 {offsets = [1, 0], sizes = [1, 32], strides = [1, 1]} : vector<16x32xf32> to vector<1x32xf32>
    %c1_i32_11 = arith.constant 1 : i32
    %167 = vector.broadcast %c1_i32_11 : i32 to vector<8x1xi32>
    %168 = arith.cmpi eq, %155, %167 : vector<8x1xi32>
    %169 = arith.extui %168 : vector<8x1xi1> to vector<8x1xi32>
    %170 = arith.sitofp %169 : vector<8x1xi32> to vector<8x1xf32>
    %171 = vector.broadcast %166 : vector<1x32xf32> to vector<8x32xf32>
    %172 = vector.broadcast %170 : vector<8x1xf32> to vector<8x32xf32>
    %173 = arith.mulf %171, %172 : vector<8x32xf32>
    %174 = arith.addf %165, %173 : vector<8x32xf32>
    %175 = vector.extract_strided_slice %2 {offsets = [2, 0], sizes = [1, 32], strides = [1, 1]} : vector<16x32xf32> to vector<1x32xf32>
    %c2_i32_12 = arith.constant 2 : i32
    %176 = vector.broadcast %c2_i32_12 : i32 to vector<8x1xi32>
    %177 = arith.cmpi eq, %155, %176 : vector<8x1xi32>
    %178 = arith.extui %177 : vector<8x1xi1> to vector<8x1xi32>
    %179 = arith.sitofp %178 : vector<8x1xi32> to vector<8x1xf32>
    %180 = vector.broadcast %175 : vector<1x32xf32> to vector<8x32xf32>
    %181 = vector.broadcast %179 : vector<8x1xf32> to vector<8x32xf32>
    %182 = arith.mulf %180, %181 : vector<8x32xf32>
    %183 = arith.addf %174, %182 : vector<8x32xf32>
    %184 = vector.extract_strided_slice %2 {offsets = [3, 0], sizes = [1, 32], strides = [1, 1]} : vector<16x32xf32> to vector<1x32xf32>
    %c3_i32_13 = arith.constant 3 : i32
    %185 = vector.broadcast %c3_i32_13 : i32 to vector<8x1xi32>
    %186 = arith.cmpi eq, %155, %185 : vector<8x1xi32>
    %187 = arith.extui %186 : vector<8x1xi1> to vector<8x1xi32>
    %188 = arith.sitofp %187 : vector<8x1xi32> to vector<8x1xf32>
    %189 = vector.broadcast %184 : vector<1x32xf32> to vector<8x32xf32>
    %190 = vector.broadcast %188 : vector<8x1xf32> to vector<8x32xf32>
    %191 = arith.mulf %189, %190 : vector<8x32xf32>
    %192 = arith.addf %183, %191 : vector<8x32xf32>
    %193 = vector.extract_strided_slice %2 {offsets = [4, 0], sizes = [1, 32], strides = [1, 1]} : vector<16x32xf32> to vector<1x32xf32>
    %c4_i32_14 = arith.constant 4 : i32
    %194 = vector.broadcast %c4_i32_14 : i32 to vector<8x1xi32>
    %195 = arith.cmpi eq, %155, %194 : vector<8x1xi32>
    %196 = arith.extui %195 : vector<8x1xi1> to vector<8x1xi32>
    %197 = arith.sitofp %196 : vector<8x1xi32> to vector<8x1xf32>
    %198 = vector.broadcast %193 : vector<1x32xf32> to vector<8x32xf32>
    %199 = vector.broadcast %197 : vector<8x1xf32> to vector<8x32xf32>
    %200 = arith.mulf %198, %199 : vector<8x32xf32>
    %201 = arith.addf %192, %200 : vector<8x32xf32>
    %202 = vector.extract_strided_slice %2 {offsets = [5, 0], sizes = [1, 32], strides = [1, 1]} : vector<16x32xf32> to vector<1x32xf32>
    %c5_i32_15 = arith.constant 5 : i32
    %203 = vector.broadcast %c5_i32_15 : i32 to vector<8x1xi32>
    %204 = arith.cmpi eq, %155, %203 : vector<8x1xi32>
    %205 = arith.extui %204 : vector<8x1xi1> to vector<8x1xi32>
    %206 = arith.sitofp %205 : vector<8x1xi32> to vector<8x1xf32>
    %207 = vector.broadcast %202 : vector<1x32xf32> to vector<8x32xf32>
    %208 = vector.broadcast %206 : vector<8x1xf32> to vector<8x32xf32>
    %209 = arith.mulf %207, %208 : vector<8x32xf32>
    %210 = arith.addf %201, %209 : vector<8x32xf32>
    %211 = vector.extract_strided_slice %2 {offsets = [6, 0], sizes = [1, 32], strides = [1, 1]} : vector<16x32xf32> to vector<1x32xf32>
    %c6_i32_16 = arith.constant 6 : i32
    %212 = vector.broadcast %c6_i32_16 : i32 to vector<8x1xi32>
    %213 = arith.cmpi eq, %155, %212 : vector<8x1xi32>
    %214 = arith.extui %213 : vector<8x1xi1> to vector<8x1xi32>
    %215 = arith.sitofp %214 : vector<8x1xi32> to vector<8x1xf32>
    %216 = vector.broadcast %211 : vector<1x32xf32> to vector<8x32xf32>
    %217 = vector.broadcast %215 : vector<8x1xf32> to vector<8x32xf32>
    %218 = arith.mulf %216, %217 : vector<8x32xf32>
    %219 = arith.addf %210, %218 : vector<8x32xf32>
    %220 = vector.extract_strided_slice %2 {offsets = [7, 0], sizes = [1, 32], strides = [1, 1]} : vector<16x32xf32> to vector<1x32xf32>
    %c7_i32_17 = arith.constant 7 : i32
    %221 = vector.broadcast %c7_i32_17 : i32 to vector<8x1xi32>
    %222 = arith.cmpi eq, %155, %221 : vector<8x1xi32>
    %223 = arith.extui %222 : vector<8x1xi1> to vector<8x1xi32>
    %224 = arith.sitofp %223 : vector<8x1xi32> to vector<8x1xf32>
    %225 = vector.broadcast %220 : vector<1x32xf32> to vector<8x32xf32>
    %226 = vector.broadcast %224 : vector<8x1xf32> to vector<8x32xf32>
    %227 = arith.mulf %225, %226 : vector<8x32xf32>
    %228 = arith.addf %219, %227 : vector<8x32xf32>
    %229 = vector.extract_strided_slice %2 {offsets = [8, 0], sizes = [1, 32], strides = [1, 1]} : vector<16x32xf32> to vector<1x32xf32>
    %c8_i32_18 = arith.constant 8 : i32
    %230 = vector.broadcast %c8_i32_18 : i32 to vector<8x1xi32>
    %231 = arith.cmpi eq, %155, %230 : vector<8x1xi32>
    %232 = arith.extui %231 : vector<8x1xi1> to vector<8x1xi32>
    %233 = arith.sitofp %232 : vector<8x1xi32> to vector<8x1xf32>
    %234 = vector.broadcast %229 : vector<1x32xf32> to vector<8x32xf32>
    %235 = vector.broadcast %233 : vector<8x1xf32> to vector<8x32xf32>
    %236 = arith.mulf %234, %235 : vector<8x32xf32>
    %237 = arith.addf %228, %236 : vector<8x32xf32>
    %238 = vector.extract_strided_slice %2 {offsets = [9, 0], sizes = [1, 32], strides = [1, 1]} : vector<16x32xf32> to vector<1x32xf32>
    %c9_i32_19 = arith.constant 9 : i32
    %239 = vector.broadcast %c9_i32_19 : i32 to vector<8x1xi32>
    %240 = arith.cmpi eq, %155, %239 : vector<8x1xi32>
    %241 = arith.extui %240 : vector<8x1xi1> to vector<8x1xi32>
    %242 = arith.sitofp %241 : vector<8x1xi32> to vector<8x1xf32>
    %243 = vector.broadcast %238 : vector<1x32xf32> to vector<8x32xf32>
    %244 = vector.broadcast %242 : vector<8x1xf32> to vector<8x32xf32>
    %245 = arith.mulf %243, %244 : vector<8x32xf32>
    %246 = arith.addf %237, %245 : vector<8x32xf32>
    %247 = vector.extract_strided_slice %2 {offsets = [10, 0], sizes = [1, 32], strides = [1, 1]} : vector<16x32xf32> to vector<1x32xf32>
    %c10_i32_20 = arith.constant 10 : i32
    %248 = vector.broadcast %c10_i32_20 : i32 to vector<8x1xi32>
    %249 = arith.cmpi eq, %155, %248 : vector<8x1xi32>
    %250 = arith.extui %249 : vector<8x1xi1> to vector<8x1xi32>
    %251 = arith.sitofp %250 : vector<8x1xi32> to vector<8x1xf32>
    %252 = vector.broadcast %247 : vector<1x32xf32> to vector<8x32xf32>
    %253 = vector.broadcast %251 : vector<8x1xf32> to vector<8x32xf32>
    %254 = arith.mulf %252, %253 : vector<8x32xf32>
    %255 = arith.addf %246, %254 : vector<8x32xf32>
    %256 = vector.extract_strided_slice %2 {offsets = [11, 0], sizes = [1, 32], strides = [1, 1]} : vector<16x32xf32> to vector<1x32xf32>
    %c11_i32_21 = arith.constant 11 : i32
    %257 = vector.broadcast %c11_i32_21 : i32 to vector<8x1xi32>
    %258 = arith.cmpi eq, %155, %257 : vector<8x1xi32>
    %259 = arith.extui %258 : vector<8x1xi1> to vector<8x1xi32>
    %260 = arith.sitofp %259 : vector<8x1xi32> to vector<8x1xf32>
    %261 = vector.broadcast %256 : vector<1x32xf32> to vector<8x32xf32>
    %262 = vector.broadcast %260 : vector<8x1xf32> to vector<8x32xf32>
    %263 = arith.mulf %261, %262 : vector<8x32xf32>
    %264 = arith.addf %255, %263 : vector<8x32xf32>
    %265 = vector.extract_strided_slice %2 {offsets = [12, 0], sizes = [1, 32], strides = [1, 1]} : vector<16x32xf32> to vector<1x32xf32>
    %c12_i32_22 = arith.constant 12 : i32
    %266 = vector.broadcast %c12_i32_22 : i32 to vector<8x1xi32>
    %267 = arith.cmpi eq, %155, %266 : vector<8x1xi32>
    %268 = arith.extui %267 : vector<8x1xi1> to vector<8x1xi32>
    %269 = arith.sitofp %268 : vector<8x1xi32> to vector<8x1xf32>
    %270 = vector.broadcast %265 : vector<1x32xf32> to vector<8x32xf32>
    %271 = vector.broadcast %269 : vector<8x1xf32> to vector<8x32xf32>
    %272 = arith.mulf %270, %271 : vector<8x32xf32>
    %273 = arith.addf %264, %272 : vector<8x32xf32>
    %274 = vector.extract_strided_slice %2 {offsets = [13, 0], sizes = [1, 32], strides = [1, 1]} : vector<16x32xf32> to vector<1x32xf32>
    %c13_i32_23 = arith.constant 13 : i32
    %275 = vector.broadcast %c13_i32_23 : i32 to vector<8x1xi32>
    %276 = arith.cmpi eq, %155, %275 : vector<8x1xi32>
    %277 = arith.extui %276 : vector<8x1xi1> to vector<8x1xi32>
    %278 = arith.sitofp %277 : vector<8x1xi32> to vector<8x1xf32>
    %279 = vector.broadcast %274 : vector<1x32xf32> to vector<8x32xf32>
    %280 = vector.broadcast %278 : vector<8x1xf32> to vector<8x32xf32>
    %281 = arith.mulf %279, %280 : vector<8x32xf32>
    %282 = arith.addf %273, %281 : vector<8x32xf32>
    %283 = vector.extract_strided_slice %2 {offsets = [14, 0], sizes = [1, 32], strides = [1, 1]} : vector<16x32xf32> to vector<1x32xf32>
    %c14_i32_24 = arith.constant 14 : i32
    %284 = vector.broadcast %c14_i32_24 : i32 to vector<8x1xi32>
    %285 = arith.cmpi eq, %155, %284 : vector<8x1xi32>
    %286 = arith.extui %285 : vector<8x1xi1> to vector<8x1xi32>
    %287 = arith.sitofp %286 : vector<8x1xi32> to vector<8x1xf32>
    %288 = vector.broadcast %283 : vector<1x32xf32> to vector<8x32xf32>
    %289 = vector.broadcast %287 : vector<8x1xf32> to vector<8x32xf32>
    %290 = arith.mulf %288, %289 : vector<8x32xf32>
    %291 = arith.addf %282, %290 : vector<8x32xf32>
    %292 = vector.extract_strided_slice %2 {offsets = [15, 0], sizes = [1, 32], strides = [1, 1]} : vector<16x32xf32> to vector<1x32xf32>
    %c15_i32_25 = arith.constant 15 : i32
    %293 = vector.broadcast %c15_i32_25 : i32 to vector<8x1xi32>
    %294 = arith.cmpi eq, %155, %293 : vector<8x1xi32>
    %295 = arith.extui %294 : vector<8x1xi1> to vector<8x1xi32>
    %296 = arith.sitofp %295 : vector<8x1xi32> to vector<8x1xf32>
    %297 = vector.broadcast %292 : vector<1x32xf32> to vector<8x32xf32>
    %298 = vector.broadcast %296 : vector<8x1xf32> to vector<8x32xf32>
    %299 = arith.mulf %297, %298 : vector<8x32xf32>
    %300 = arith.addf %291, %299 : vector<8x32xf32>
    %301 = vector.extract_strided_slice %0 {offsets = [0, 32], sizes = [8, 32], strides = [1, 1]} : vector<8x256xf32> to vector<8x32xf32>
    %302 = arith.addf %300, %301 : vector<8x32xf32>
    %303 = vector.extract_strided_slice %1 {offsets = [0, 2], sizes = [8, 1], strides = [1, 1]} : vector<8x8xi32> to vector<8x1xi32>
    %cst_26 = arith.constant 0.000000e+00 : f32
    %304 = vector.broadcast %cst_26 : f32 to vector<8x32xf32>
    %305 = vector.extract_strided_slice %2 {offsets = [0, 0], sizes = [1, 32], strides = [1, 1]} : vector<16x32xf32> to vector<1x32xf32>
    %c0_i32_27 = arith.constant 0 : i32
    %306 = vector.broadcast %c0_i32_27 : i32 to vector<8x1xi32>
    %307 = arith.cmpi eq, %303, %306 : vector<8x1xi32>
    %308 = arith.extui %307 : vector<8x1xi1> to vector<8x1xi32>
    %309 = arith.sitofp %308 : vector<8x1xi32> to vector<8x1xf32>
    %310 = vector.broadcast %305 : vector<1x32xf32> to vector<8x32xf32>
    %311 = vector.broadcast %309 : vector<8x1xf32> to vector<8x32xf32>
    %312 = arith.mulf %310, %311 : vector<8x32xf32>
    %313 = arith.addf %304, %312 : vector<8x32xf32>
    %314 = vector.extract_strided_slice %2 {offsets = [1, 0], sizes = [1, 32], strides = [1, 1]} : vector<16x32xf32> to vector<1x32xf32>
    %c1_i32_28 = arith.constant 1 : i32
    %315 = vector.broadcast %c1_i32_28 : i32 to vector<8x1xi32>
    %316 = arith.cmpi eq, %303, %315 : vector<8x1xi32>
    %317 = arith.extui %316 : vector<8x1xi1> to vector<8x1xi32>
    %318 = arith.sitofp %317 : vector<8x1xi32> to vector<8x1xf32>
    %319 = vector.broadcast %314 : vector<1x32xf32> to vector<8x32xf32>
    %320 = vector.broadcast %318 : vector<8x1xf32> to vector<8x32xf32>
    %321 = arith.mulf %319, %320 : vector<8x32xf32>
    %322 = arith.addf %313, %321 : vector<8x32xf32>
    %323 = vector.extract_strided_slice %2 {offsets = [2, 0], sizes = [1, 32], strides = [1, 1]} : vector<16x32xf32> to vector<1x32xf32>
    %c2_i32_29 = arith.constant 2 : i32
    %324 = vector.broadcast %c2_i32_29 : i32 to vector<8x1xi32>
    %325 = arith.cmpi eq, %303, %324 : vector<8x1xi32>
    %326 = arith.extui %325 : vector<8x1xi1> to vector<8x1xi32>
    %327 = arith.sitofp %326 : vector<8x1xi32> to vector<8x1xf32>
    %328 = vector.broadcast %323 : vector<1x32xf32> to vector<8x32xf32>
    %329 = vector.broadcast %327 : vector<8x1xf32> to vector<8x32xf32>
    %330 = arith.mulf %328, %329 : vector<8x32xf32>
    %331 = arith.addf %322, %330 : vector<8x32xf32>
    %332 = vector.extract_strided_slice %2 {offsets = [3, 0], sizes = [1, 32], strides = [1, 1]} : vector<16x32xf32> to vector<1x32xf32>
    %c3_i32_30 = arith.constant 3 : i32
    %333 = vector.broadcast %c3_i32_30 : i32 to vector<8x1xi32>
    %334 = arith.cmpi eq, %303, %333 : vector<8x1xi32>
    %335 = arith.extui %334 : vector<8x1xi1> to vector<8x1xi32>
    %336 = arith.sitofp %335 : vector<8x1xi32> to vector<8x1xf32>
    %337 = vector.broadcast %332 : vector<1x32xf32> to vector<8x32xf32>
    %338 = vector.broadcast %336 : vector<8x1xf32> to vector<8x32xf32>
    %339 = arith.mulf %337, %338 : vector<8x32xf32>
    %340 = arith.addf %331, %339 : vector<8x32xf32>
    %341 = vector.extract_strided_slice %2 {offsets = [4, 0], sizes = [1, 32], strides = [1, 1]} : vector<16x32xf32> to vector<1x32xf32>
    %c4_i32_31 = arith.constant 4 : i32
    %342 = vector.broadcast %c4_i32_31 : i32 to vector<8x1xi32>
    %343 = arith.cmpi eq, %303, %342 : vector<8x1xi32>
    %344 = arith.extui %343 : vector<8x1xi1> to vector<8x1xi32>
    %345 = arith.sitofp %344 : vector<8x1xi32> to vector<8x1xf32>
    %346 = vector.broadcast %341 : vector<1x32xf32> to vector<8x32xf32>
    %347 = vector.broadcast %345 : vector<8x1xf32> to vector<8x32xf32>
    %348 = arith.mulf %346, %347 : vector<8x32xf32>
    %349 = arith.addf %340, %348 : vector<8x32xf32>
    %350 = vector.extract_strided_slice %2 {offsets = [5, 0], sizes = [1, 32], strides = [1, 1]} : vector<16x32xf32> to vector<1x32xf32>
    %c5_i32_32 = arith.constant 5 : i32
    %351 = vector.broadcast %c5_i32_32 : i32 to vector<8x1xi32>
    %352 = arith.cmpi eq, %303, %351 : vector<8x1xi32>
    %353 = arith.extui %352 : vector<8x1xi1> to vector<8x1xi32>
    %354 = arith.sitofp %353 : vector<8x1xi32> to vector<8x1xf32>
    %355 = vector.broadcast %350 : vector<1x32xf32> to vector<8x32xf32>
    %356 = vector.broadcast %354 : vector<8x1xf32> to vector<8x32xf32>
    %357 = arith.mulf %355, %356 : vector<8x32xf32>
    %358 = arith.addf %349, %357 : vector<8x32xf32>
    %359 = vector.extract_strided_slice %2 {offsets = [6, 0], sizes = [1, 32], strides = [1, 1]} : vector<16x32xf32> to vector<1x32xf32>
    %c6_i32_33 = arith.constant 6 : i32
    %360 = vector.broadcast %c6_i32_33 : i32 to vector<8x1xi32>
    %361 = arith.cmpi eq, %303, %360 : vector<8x1xi32>
    %362 = arith.extui %361 : vector<8x1xi1> to vector<8x1xi32>
    %363 = arith.sitofp %362 : vector<8x1xi32> to vector<8x1xf32>
    %364 = vector.broadcast %359 : vector<1x32xf32> to vector<8x32xf32>
    %365 = vector.broadcast %363 : vector<8x1xf32> to vector<8x32xf32>
    %366 = arith.mulf %364, %365 : vector<8x32xf32>
    %367 = arith.addf %358, %366 : vector<8x32xf32>
    %368 = vector.extract_strided_slice %2 {offsets = [7, 0], sizes = [1, 32], strides = [1, 1]} : vector<16x32xf32> to vector<1x32xf32>
    %c7_i32_34 = arith.constant 7 : i32
    %369 = vector.broadcast %c7_i32_34 : i32 to vector<8x1xi32>
    %370 = arith.cmpi eq, %303, %369 : vector<8x1xi32>
    %371 = arith.extui %370 : vector<8x1xi1> to vector<8x1xi32>
    %372 = arith.sitofp %371 : vector<8x1xi32> to vector<8x1xf32>
    %373 = vector.broadcast %368 : vector<1x32xf32> to vector<8x32xf32>
    %374 = vector.broadcast %372 : vector<8x1xf32> to vector<8x32xf32>
    %375 = arith.mulf %373, %374 : vector<8x32xf32>
    %376 = arith.addf %367, %375 : vector<8x32xf32>
    %377 = vector.extract_strided_slice %2 {offsets = [8, 0], sizes = [1, 32], strides = [1, 1]} : vector<16x32xf32> to vector<1x32xf32>
    %c8_i32_35 = arith.constant 8 : i32
    %378 = vector.broadcast %c8_i32_35 : i32 to vector<8x1xi32>
    %379 = arith.cmpi eq, %303, %378 : vector<8x1xi32>
    %380 = arith.extui %379 : vector<8x1xi1> to vector<8x1xi32>
    %381 = arith.sitofp %380 : vector<8x1xi32> to vector<8x1xf32>
    %382 = vector.broadcast %377 : vector<1x32xf32> to vector<8x32xf32>
    %383 = vector.broadcast %381 : vector<8x1xf32> to vector<8x32xf32>
    %384 = arith.mulf %382, %383 : vector<8x32xf32>
    %385 = arith.addf %376, %384 : vector<8x32xf32>
    %386 = vector.extract_strided_slice %2 {offsets = [9, 0], sizes = [1, 32], strides = [1, 1]} : vector<16x32xf32> to vector<1x32xf32>
    %c9_i32_36 = arith.constant 9 : i32
    %387 = vector.broadcast %c9_i32_36 : i32 to vector<8x1xi32>
    %388 = arith.cmpi eq, %303, %387 : vector<8x1xi32>
    %389 = arith.extui %388 : vector<8x1xi1> to vector<8x1xi32>
    %390 = arith.sitofp %389 : vector<8x1xi32> to vector<8x1xf32>
    %391 = vector.broadcast %386 : vector<1x32xf32> to vector<8x32xf32>
    %392 = vector.broadcast %390 : vector<8x1xf32> to vector<8x32xf32>
    %393 = arith.mulf %391, %392 : vector<8x32xf32>
    %394 = arith.addf %385, %393 : vector<8x32xf32>
    %395 = vector.extract_strided_slice %2 {offsets = [10, 0], sizes = [1, 32], strides = [1, 1]} : vector<16x32xf32> to vector<1x32xf32>
    %c10_i32_37 = arith.constant 10 : i32
    %396 = vector.broadcast %c10_i32_37 : i32 to vector<8x1xi32>
    %397 = arith.cmpi eq, %303, %396 : vector<8x1xi32>
    %398 = arith.extui %397 : vector<8x1xi1> to vector<8x1xi32>
    %399 = arith.sitofp %398 : vector<8x1xi32> to vector<8x1xf32>
    %400 = vector.broadcast %395 : vector<1x32xf32> to vector<8x32xf32>
    %401 = vector.broadcast %399 : vector<8x1xf32> to vector<8x32xf32>
    %402 = arith.mulf %400, %401 : vector<8x32xf32>
    %403 = arith.addf %394, %402 : vector<8x32xf32>
    %404 = vector.extract_strided_slice %2 {offsets = [11, 0], sizes = [1, 32], strides = [1, 1]} : vector<16x32xf32> to vector<1x32xf32>
    %c11_i32_38 = arith.constant 11 : i32
    %405 = vector.broadcast %c11_i32_38 : i32 to vector<8x1xi32>
    %406 = arith.cmpi eq, %303, %405 : vector<8x1xi32>
    %407 = arith.extui %406 : vector<8x1xi1> to vector<8x1xi32>
    %408 = arith.sitofp %407 : vector<8x1xi32> to vector<8x1xf32>
    %409 = vector.broadcast %404 : vector<1x32xf32> to vector<8x32xf32>
    %410 = vector.broadcast %408 : vector<8x1xf32> to vector<8x32xf32>
    %411 = arith.mulf %409, %410 : vector<8x32xf32>
    %412 = arith.addf %403, %411 : vector<8x32xf32>
    %413 = vector.extract_strided_slice %2 {offsets = [12, 0], sizes = [1, 32], strides = [1, 1]} : vector<16x32xf32> to vector<1x32xf32>
    %c12_i32_39 = arith.constant 12 : i32
    %414 = vector.broadcast %c12_i32_39 : i32 to vector<8x1xi32>
    %415 = arith.cmpi eq, %303, %414 : vector<8x1xi32>
    %416 = arith.extui %415 : vector<8x1xi1> to vector<8x1xi32>
    %417 = arith.sitofp %416 : vector<8x1xi32> to vector<8x1xf32>
    %418 = vector.broadcast %413 : vector<1x32xf32> to vector<8x32xf32>
    %419 = vector.broadcast %417 : vector<8x1xf32> to vector<8x32xf32>
    %420 = arith.mulf %418, %419 : vector<8x32xf32>
    %421 = arith.addf %412, %420 : vector<8x32xf32>
    %422 = vector.extract_strided_slice %2 {offsets = [13, 0], sizes = [1, 32], strides = [1, 1]} : vector<16x32xf32> to vector<1x32xf32>
    %c13_i32_40 = arith.constant 13 : i32
    %423 = vector.broadcast %c13_i32_40 : i32 to vector<8x1xi32>
    %424 = arith.cmpi eq, %303, %423 : vector<8x1xi32>
    %425 = arith.extui %424 : vector<8x1xi1> to vector<8x1xi32>
    %426 = arith.sitofp %425 : vector<8x1xi32> to vector<8x1xf32>
    %427 = vector.broadcast %422 : vector<1x32xf32> to vector<8x32xf32>
    %428 = vector.broadcast %426 : vector<8x1xf32> to vector<8x32xf32>
    %429 = arith.mulf %427, %428 : vector<8x32xf32>
    %430 = arith.addf %421, %429 : vector<8x32xf32>
    %431 = vector.extract_strided_slice %2 {offsets = [14, 0], sizes = [1, 32], strides = [1, 1]} : vector<16x32xf32> to vector<1x32xf32>
    %c14_i32_41 = arith.constant 14 : i32
    %432 = vector.broadcast %c14_i32_41 : i32 to vector<8x1xi32>
    %433 = arith.cmpi eq, %303, %432 : vector<8x1xi32>
    %434 = arith.extui %433 : vector<8x1xi1> to vector<8x1xi32>
    %435 = arith.sitofp %434 : vector<8x1xi32> to vector<8x1xf32>
    %436 = vector.broadcast %431 : vector<1x32xf32> to vector<8x32xf32>
    %437 = vector.broadcast %435 : vector<8x1xf32> to vector<8x32xf32>
    %438 = arith.mulf %436, %437 : vector<8x32xf32>
    %439 = arith.addf %430, %438 : vector<8x32xf32>
    %440 = vector.extract_strided_slice %2 {offsets = [15, 0], sizes = [1, 32], strides = [1, 1]} : vector<16x32xf32> to vector<1x32xf32>
    %c15_i32_42 = arith.constant 15 : i32
    %441 = vector.broadcast %c15_i32_42 : i32 to vector<8x1xi32>
    %442 = arith.cmpi eq, %303, %441 : vector<8x1xi32>
    %443 = arith.extui %442 : vector<8x1xi1> to vector<8x1xi32>
    %444 = arith.sitofp %443 : vector<8x1xi32> to vector<8x1xf32>
    %445 = vector.broadcast %440 : vector<1x32xf32> to vector<8x32xf32>
    %446 = vector.broadcast %444 : vector<8x1xf32> to vector<8x32xf32>
    %447 = arith.mulf %445, %446 : vector<8x32xf32>
    %448 = arith.addf %439, %447 : vector<8x32xf32>
    %449 = vector.extract_strided_slice %0 {offsets = [0, 64], sizes = [8, 32], strides = [1, 1]} : vector<8x256xf32> to vector<8x32xf32>
    %450 = arith.addf %448, %449 : vector<8x32xf32>
    %451 = vector.extract_strided_slice %1 {offsets = [0, 3], sizes = [8, 1], strides = [1, 1]} : vector<8x8xi32> to vector<8x1xi32>
    %cst_43 = arith.constant 0.000000e+00 : f32
    %452 = vector.broadcast %cst_43 : f32 to vector<8x32xf32>
    %453 = vector.extract_strided_slice %2 {offsets = [0, 0], sizes = [1, 32], strides = [1, 1]} : vector<16x32xf32> to vector<1x32xf32>
    %c0_i32_44 = arith.constant 0 : i32
    %454 = vector.broadcast %c0_i32_44 : i32 to vector<8x1xi32>
    %455 = arith.cmpi eq, %451, %454 : vector<8x1xi32>
    %456 = arith.extui %455 : vector<8x1xi1> to vector<8x1xi32>
    %457 = arith.sitofp %456 : vector<8x1xi32> to vector<8x1xf32>
    %458 = vector.broadcast %453 : vector<1x32xf32> to vector<8x32xf32>
    %459 = vector.broadcast %457 : vector<8x1xf32> to vector<8x32xf32>
    %460 = arith.mulf %458, %459 : vector<8x32xf32>
    %461 = arith.addf %452, %460 : vector<8x32xf32>
    %462 = vector.extract_strided_slice %2 {offsets = [1, 0], sizes = [1, 32], strides = [1, 1]} : vector<16x32xf32> to vector<1x32xf32>
    %c1_i32_45 = arith.constant 1 : i32
    %463 = vector.broadcast %c1_i32_45 : i32 to vector<8x1xi32>
    %464 = arith.cmpi eq, %451, %463 : vector<8x1xi32>
    %465 = arith.extui %464 : vector<8x1xi1> to vector<8x1xi32>
    %466 = arith.sitofp %465 : vector<8x1xi32> to vector<8x1xf32>
    %467 = vector.broadcast %462 : vector<1x32xf32> to vector<8x32xf32>
    %468 = vector.broadcast %466 : vector<8x1xf32> to vector<8x32xf32>
    %469 = arith.mulf %467, %468 : vector<8x32xf32>
    %470 = arith.addf %461, %469 : vector<8x32xf32>
    %471 = vector.extract_strided_slice %2 {offsets = [2, 0], sizes = [1, 32], strides = [1, 1]} : vector<16x32xf32> to vector<1x32xf32>
    %c2_i32_46 = arith.constant 2 : i32
    %472 = vector.broadcast %c2_i32_46 : i32 to vector<8x1xi32>
    %473 = arith.cmpi eq, %451, %472 : vector<8x1xi32>
    %474 = arith.extui %473 : vector<8x1xi1> to vector<8x1xi32>
    %475 = arith.sitofp %474 : vector<8x1xi32> to vector<8x1xf32>
    %476 = vector.broadcast %471 : vector<1x32xf32> to vector<8x32xf32>
    %477 = vector.broadcast %475 : vector<8x1xf32> to vector<8x32xf32>
    %478 = arith.mulf %476, %477 : vector<8x32xf32>
    %479 = arith.addf %470, %478 : vector<8x32xf32>
    %480 = vector.extract_strided_slice %2 {offsets = [3, 0], sizes = [1, 32], strides = [1, 1]} : vector<16x32xf32> to vector<1x32xf32>
    %c3_i32_47 = arith.constant 3 : i32
    %481 = vector.broadcast %c3_i32_47 : i32 to vector<8x1xi32>
    %482 = arith.cmpi eq, %451, %481 : vector<8x1xi32>
    %483 = arith.extui %482 : vector<8x1xi1> to vector<8x1xi32>
    %484 = arith.sitofp %483 : vector<8x1xi32> to vector<8x1xf32>
    %485 = vector.broadcast %480 : vector<1x32xf32> to vector<8x32xf32>
    %486 = vector.broadcast %484 : vector<8x1xf32> to vector<8x32xf32>
    %487 = arith.mulf %485, %486 : vector<8x32xf32>
    %488 = arith.addf %479, %487 : vector<8x32xf32>
    %489 = vector.extract_strided_slice %2 {offsets = [4, 0], sizes = [1, 32], strides = [1, 1]} : vector<16x32xf32> to vector<1x32xf32>
    %c4_i32_48 = arith.constant 4 : i32
    %490 = vector.broadcast %c4_i32_48 : i32 to vector<8x1xi32>
    %491 = arith.cmpi eq, %451, %490 : vector<8x1xi32>
    %492 = arith.extui %491 : vector<8x1xi1> to vector<8x1xi32>
    %493 = arith.sitofp %492 : vector<8x1xi32> to vector<8x1xf32>
    %494 = vector.broadcast %489 : vector<1x32xf32> to vector<8x32xf32>
    %495 = vector.broadcast %493 : vector<8x1xf32> to vector<8x32xf32>
    %496 = arith.mulf %494, %495 : vector<8x32xf32>
    %497 = arith.addf %488, %496 : vector<8x32xf32>
    %498 = vector.extract_strided_slice %2 {offsets = [5, 0], sizes = [1, 32], strides = [1, 1]} : vector<16x32xf32> to vector<1x32xf32>
    %c5_i32_49 = arith.constant 5 : i32
    %499 = vector.broadcast %c5_i32_49 : i32 to vector<8x1xi32>
    %500 = arith.cmpi eq, %451, %499 : vector<8x1xi32>
    %501 = arith.extui %500 : vector<8x1xi1> to vector<8x1xi32>
    %502 = arith.sitofp %501 : vector<8x1xi32> to vector<8x1xf32>
    %503 = vector.broadcast %498 : vector<1x32xf32> to vector<8x32xf32>
    %504 = vector.broadcast %502 : vector<8x1xf32> to vector<8x32xf32>
    %505 = arith.mulf %503, %504 : vector<8x32xf32>
    %506 = arith.addf %497, %505 : vector<8x32xf32>
    %507 = vector.extract_strided_slice %2 {offsets = [6, 0], sizes = [1, 32], strides = [1, 1]} : vector<16x32xf32> to vector<1x32xf32>
    %c6_i32_50 = arith.constant 6 : i32
    %508 = vector.broadcast %c6_i32_50 : i32 to vector<8x1xi32>
    %509 = arith.cmpi eq, %451, %508 : vector<8x1xi32>
    %510 = arith.extui %509 : vector<8x1xi1> to vector<8x1xi32>
    %511 = arith.sitofp %510 : vector<8x1xi32> to vector<8x1xf32>
    %512 = vector.broadcast %507 : vector<1x32xf32> to vector<8x32xf32>
    %513 = vector.broadcast %511 : vector<8x1xf32> to vector<8x32xf32>
    %514 = arith.mulf %512, %513 : vector<8x32xf32>
    %515 = arith.addf %506, %514 : vector<8x32xf32>
    %516 = vector.extract_strided_slice %2 {offsets = [7, 0], sizes = [1, 32], strides = [1, 1]} : vector<16x32xf32> to vector<1x32xf32>
    %c7_i32_51 = arith.constant 7 : i32
    %517 = vector.broadcast %c7_i32_51 : i32 to vector<8x1xi32>
    %518 = arith.cmpi eq, %451, %517 : vector<8x1xi32>
    %519 = arith.extui %518 : vector<8x1xi1> to vector<8x1xi32>
    %520 = arith.sitofp %519 : vector<8x1xi32> to vector<8x1xf32>
    %521 = vector.broadcast %516 : vector<1x32xf32> to vector<8x32xf32>
    %522 = vector.broadcast %520 : vector<8x1xf32> to vector<8x32xf32>
    %523 = arith.mulf %521, %522 : vector<8x32xf32>
    %524 = arith.addf %515, %523 : vector<8x32xf32>
    %525 = vector.extract_strided_slice %2 {offsets = [8, 0], sizes = [1, 32], strides = [1, 1]} : vector<16x32xf32> to vector<1x32xf32>
    %c8_i32_52 = arith.constant 8 : i32
    %526 = vector.broadcast %c8_i32_52 : i32 to vector<8x1xi32>
    %527 = arith.cmpi eq, %451, %526 : vector<8x1xi32>
    %528 = arith.extui %527 : vector<8x1xi1> to vector<8x1xi32>
    %529 = arith.sitofp %528 : vector<8x1xi32> to vector<8x1xf32>
    %530 = vector.broadcast %525 : vector<1x32xf32> to vector<8x32xf32>
    %531 = vector.broadcast %529 : vector<8x1xf32> to vector<8x32xf32>
    %532 = arith.mulf %530, %531 : vector<8x32xf32>
    %533 = arith.addf %524, %532 : vector<8x32xf32>
    %534 = vector.extract_strided_slice %2 {offsets = [9, 0], sizes = [1, 32], strides = [1, 1]} : vector<16x32xf32> to vector<1x32xf32>
    %c9_i32_53 = arith.constant 9 : i32
    %535 = vector.broadcast %c9_i32_53 : i32 to vector<8x1xi32>
    %536 = arith.cmpi eq, %451, %535 : vector<8x1xi32>
    %537 = arith.extui %536 : vector<8x1xi1> to vector<8x1xi32>
    %538 = arith.sitofp %537 : vector<8x1xi32> to vector<8x1xf32>
    %539 = vector.broadcast %534 : vector<1x32xf32> to vector<8x32xf32>
    %540 = vector.broadcast %538 : vector<8x1xf32> to vector<8x32xf32>
    %541 = arith.mulf %539, %540 : vector<8x32xf32>
    %542 = arith.addf %533, %541 : vector<8x32xf32>
    %543 = vector.extract_strided_slice %2 {offsets = [10, 0], sizes = [1, 32], strides = [1, 1]} : vector<16x32xf32> to vector<1x32xf32>
    %c10_i32_54 = arith.constant 10 : i32
    %544 = vector.broadcast %c10_i32_54 : i32 to vector<8x1xi32>
    %545 = arith.cmpi eq, %451, %544 : vector<8x1xi32>
    %546 = arith.extui %545 : vector<8x1xi1> to vector<8x1xi32>
    %547 = arith.sitofp %546 : vector<8x1xi32> to vector<8x1xf32>
    %548 = vector.broadcast %543 : vector<1x32xf32> to vector<8x32xf32>
    %549 = vector.broadcast %547 : vector<8x1xf32> to vector<8x32xf32>
    %550 = arith.mulf %548, %549 : vector<8x32xf32>
    %551 = arith.addf %542, %550 : vector<8x32xf32>
    %552 = vector.extract_strided_slice %2 {offsets = [11, 0], sizes = [1, 32], strides = [1, 1]} : vector<16x32xf32> to vector<1x32xf32>
    %c11_i32_55 = arith.constant 11 : i32
    %553 = vector.broadcast %c11_i32_55 : i32 to vector<8x1xi32>
    %554 = arith.cmpi eq, %451, %553 : vector<8x1xi32>
    %555 = arith.extui %554 : vector<8x1xi1> to vector<8x1xi32>
    %556 = arith.sitofp %555 : vector<8x1xi32> to vector<8x1xf32>
    %557 = vector.broadcast %552 : vector<1x32xf32> to vector<8x32xf32>
    %558 = vector.broadcast %556 : vector<8x1xf32> to vector<8x32xf32>
    %559 = arith.mulf %557, %558 : vector<8x32xf32>
    %560 = arith.addf %551, %559 : vector<8x32xf32>
    %561 = vector.extract_strided_slice %2 {offsets = [12, 0], sizes = [1, 32], strides = [1, 1]} : vector<16x32xf32> to vector<1x32xf32>
    %c12_i32_56 = arith.constant 12 : i32
    %562 = vector.broadcast %c12_i32_56 : i32 to vector<8x1xi32>
    %563 = arith.cmpi eq, %451, %562 : vector<8x1xi32>
    %564 = arith.extui %563 : vector<8x1xi1> to vector<8x1xi32>
    %565 = arith.sitofp %564 : vector<8x1xi32> to vector<8x1xf32>
    %566 = vector.broadcast %561 : vector<1x32xf32> to vector<8x32xf32>
    %567 = vector.broadcast %565 : vector<8x1xf32> to vector<8x32xf32>
    %568 = arith.mulf %566, %567 : vector<8x32xf32>
    %569 = arith.addf %560, %568 : vector<8x32xf32>
    %570 = vector.extract_strided_slice %2 {offsets = [13, 0], sizes = [1, 32], strides = [1, 1]} : vector<16x32xf32> to vector<1x32xf32>
    %c13_i32_57 = arith.constant 13 : i32
    %571 = vector.broadcast %c13_i32_57 : i32 to vector<8x1xi32>
    %572 = arith.cmpi eq, %451, %571 : vector<8x1xi32>
    %573 = arith.extui %572 : vector<8x1xi1> to vector<8x1xi32>
    %574 = arith.sitofp %573 : vector<8x1xi32> to vector<8x1xf32>
    %575 = vector.broadcast %570 : vector<1x32xf32> to vector<8x32xf32>
    %576 = vector.broadcast %574 : vector<8x1xf32> to vector<8x32xf32>
    %577 = arith.mulf %575, %576 : vector<8x32xf32>
    %578 = arith.addf %569, %577 : vector<8x32xf32>
    %579 = vector.extract_strided_slice %2 {offsets = [14, 0], sizes = [1, 32], strides = [1, 1]} : vector<16x32xf32> to vector<1x32xf32>
    %c14_i32_58 = arith.constant 14 : i32
    %580 = vector.broadcast %c14_i32_58 : i32 to vector<8x1xi32>
    %581 = arith.cmpi eq, %451, %580 : vector<8x1xi32>
    %582 = arith.extui %581 : vector<8x1xi1> to vector<8x1xi32>
    %583 = arith.sitofp %582 : vector<8x1xi32> to vector<8x1xf32>
    %584 = vector.broadcast %579 : vector<1x32xf32> to vector<8x32xf32>
    %585 = vector.broadcast %583 : vector<8x1xf32> to vector<8x32xf32>
    %586 = arith.mulf %584, %585 : vector<8x32xf32>
    %587 = arith.addf %578, %586 : vector<8x32xf32>
    %588 = vector.extract_strided_slice %2 {offsets = [15, 0], sizes = [1, 32], strides = [1, 1]} : vector<16x32xf32> to vector<1x32xf32>
    %c15_i32_59 = arith.constant 15 : i32
    %589 = vector.broadcast %c15_i32_59 : i32 to vector<8x1xi32>
    %590 = arith.cmpi eq, %451, %589 : vector<8x1xi32>
    %591 = arith.extui %590 : vector<8x1xi1> to vector<8x1xi32>
    %592 = arith.sitofp %591 : vector<8x1xi32> to vector<8x1xf32>
    %593 = vector.broadcast %588 : vector<1x32xf32> to vector<8x32xf32>
    %594 = vector.broadcast %592 : vector<8x1xf32> to vector<8x32xf32>
    %595 = arith.mulf %593, %594 : vector<8x32xf32>
    %596 = arith.addf %587, %595 : vector<8x32xf32>
    %597 = vector.extract_strided_slice %0 {offsets = [0, 96], sizes = [8, 32], strides = [1, 1]} : vector<8x256xf32> to vector<8x32xf32>
    %598 = arith.addf %596, %597 : vector<8x32xf32>
    %599 = vector.extract_strided_slice %1 {offsets = [0, 4], sizes = [8, 1], strides = [1, 1]} : vector<8x8xi32> to vector<8x1xi32>
    %cst_60 = arith.constant 0.000000e+00 : f32
    %600 = vector.broadcast %cst_60 : f32 to vector<8x32xf32>
    %601 = vector.extract_strided_slice %2 {offsets = [0, 0], sizes = [1, 32], strides = [1, 1]} : vector<16x32xf32> to vector<1x32xf32>
    %c0_i32_61 = arith.constant 0 : i32
    %602 = vector.broadcast %c0_i32_61 : i32 to vector<8x1xi32>
    %603 = arith.cmpi eq, %599, %602 : vector<8x1xi32>
    %604 = arith.extui %603 : vector<8x1xi1> to vector<8x1xi32>
    %605 = arith.sitofp %604 : vector<8x1xi32> to vector<8x1xf32>
    %606 = vector.broadcast %601 : vector<1x32xf32> to vector<8x32xf32>
    %607 = vector.broadcast %605 : vector<8x1xf32> to vector<8x32xf32>
    %608 = arith.mulf %606, %607 : vector<8x32xf32>
    %609 = arith.addf %600, %608 : vector<8x32xf32>
    %610 = vector.extract_strided_slice %2 {offsets = [1, 0], sizes = [1, 32], strides = [1, 1]} : vector<16x32xf32> to vector<1x32xf32>
    %c1_i32_62 = arith.constant 1 : i32
    %611 = vector.broadcast %c1_i32_62 : i32 to vector<8x1xi32>
    %612 = arith.cmpi eq, %599, %611 : vector<8x1xi32>
    %613 = arith.extui %612 : vector<8x1xi1> to vector<8x1xi32>
    %614 = arith.sitofp %613 : vector<8x1xi32> to vector<8x1xf32>
    %615 = vector.broadcast %610 : vector<1x32xf32> to vector<8x32xf32>
    %616 = vector.broadcast %614 : vector<8x1xf32> to vector<8x32xf32>
    %617 = arith.mulf %615, %616 : vector<8x32xf32>
    %618 = arith.addf %609, %617 : vector<8x32xf32>
    %619 = vector.extract_strided_slice %2 {offsets = [2, 0], sizes = [1, 32], strides = [1, 1]} : vector<16x32xf32> to vector<1x32xf32>
    %c2_i32_63 = arith.constant 2 : i32
    %620 = vector.broadcast %c2_i32_63 : i32 to vector<8x1xi32>
    %621 = arith.cmpi eq, %599, %620 : vector<8x1xi32>
    %622 = arith.extui %621 : vector<8x1xi1> to vector<8x1xi32>
    %623 = arith.sitofp %622 : vector<8x1xi32> to vector<8x1xf32>
    %624 = vector.broadcast %619 : vector<1x32xf32> to vector<8x32xf32>
    %625 = vector.broadcast %623 : vector<8x1xf32> to vector<8x32xf32>
    %626 = arith.mulf %624, %625 : vector<8x32xf32>
    %627 = arith.addf %618, %626 : vector<8x32xf32>
    %628 = vector.extract_strided_slice %2 {offsets = [3, 0], sizes = [1, 32], strides = [1, 1]} : vector<16x32xf32> to vector<1x32xf32>
    %c3_i32_64 = arith.constant 3 : i32
    %629 = vector.broadcast %c3_i32_64 : i32 to vector<8x1xi32>
    %630 = arith.cmpi eq, %599, %629 : vector<8x1xi32>
    %631 = arith.extui %630 : vector<8x1xi1> to vector<8x1xi32>
    %632 = arith.sitofp %631 : vector<8x1xi32> to vector<8x1xf32>
    %633 = vector.broadcast %628 : vector<1x32xf32> to vector<8x32xf32>
    %634 = vector.broadcast %632 : vector<8x1xf32> to vector<8x32xf32>
    %635 = arith.mulf %633, %634 : vector<8x32xf32>
    %636 = arith.addf %627, %635 : vector<8x32xf32>
    %637 = vector.extract_strided_slice %2 {offsets = [4, 0], sizes = [1, 32], strides = [1, 1]} : vector<16x32xf32> to vector<1x32xf32>
    %c4_i32_65 = arith.constant 4 : i32
    %638 = vector.broadcast %c4_i32_65 : i32 to vector<8x1xi32>
    %639 = arith.cmpi eq, %599, %638 : vector<8x1xi32>
    %640 = arith.extui %639 : vector<8x1xi1> to vector<8x1xi32>
    %641 = arith.sitofp %640 : vector<8x1xi32> to vector<8x1xf32>
    %642 = vector.broadcast %637 : vector<1x32xf32> to vector<8x32xf32>
    %643 = vector.broadcast %641 : vector<8x1xf32> to vector<8x32xf32>
    %644 = arith.mulf %642, %643 : vector<8x32xf32>
    %645 = arith.addf %636, %644 : vector<8x32xf32>
    %646 = vector.extract_strided_slice %2 {offsets = [5, 0], sizes = [1, 32], strides = [1, 1]} : vector<16x32xf32> to vector<1x32xf32>
    %c5_i32_66 = arith.constant 5 : i32
    %647 = vector.broadcast %c5_i32_66 : i32 to vector<8x1xi32>
    %648 = arith.cmpi eq, %599, %647 : vector<8x1xi32>
    %649 = arith.extui %648 : vector<8x1xi1> to vector<8x1xi32>
    %650 = arith.sitofp %649 : vector<8x1xi32> to vector<8x1xf32>
    %651 = vector.broadcast %646 : vector<1x32xf32> to vector<8x32xf32>
    %652 = vector.broadcast %650 : vector<8x1xf32> to vector<8x32xf32>
    %653 = arith.mulf %651, %652 : vector<8x32xf32>
    %654 = arith.addf %645, %653 : vector<8x32xf32>
    %655 = vector.extract_strided_slice %2 {offsets = [6, 0], sizes = [1, 32], strides = [1, 1]} : vector<16x32xf32> to vector<1x32xf32>
    %c6_i32_67 = arith.constant 6 : i32
    %656 = vector.broadcast %c6_i32_67 : i32 to vector<8x1xi32>
    %657 = arith.cmpi eq, %599, %656 : vector<8x1xi32>
    %658 = arith.extui %657 : vector<8x1xi1> to vector<8x1xi32>
    %659 = arith.sitofp %658 : vector<8x1xi32> to vector<8x1xf32>
    %660 = vector.broadcast %655 : vector<1x32xf32> to vector<8x32xf32>
    %661 = vector.broadcast %659 : vector<8x1xf32> to vector<8x32xf32>
    %662 = arith.mulf %660, %661 : vector<8x32xf32>
    %663 = arith.addf %654, %662 : vector<8x32xf32>
    %664 = vector.extract_strided_slice %2 {offsets = [7, 0], sizes = [1, 32], strides = [1, 1]} : vector<16x32xf32> to vector<1x32xf32>
    %c7_i32_68 = arith.constant 7 : i32
    %665 = vector.broadcast %c7_i32_68 : i32 to vector<8x1xi32>
    %666 = arith.cmpi eq, %599, %665 : vector<8x1xi32>
    %667 = arith.extui %666 : vector<8x1xi1> to vector<8x1xi32>
    %668 = arith.sitofp %667 : vector<8x1xi32> to vector<8x1xf32>
    %669 = vector.broadcast %664 : vector<1x32xf32> to vector<8x32xf32>
    %670 = vector.broadcast %668 : vector<8x1xf32> to vector<8x32xf32>
    %671 = arith.mulf %669, %670 : vector<8x32xf32>
    %672 = arith.addf %663, %671 : vector<8x32xf32>
    %673 = vector.extract_strided_slice %2 {offsets = [8, 0], sizes = [1, 32], strides = [1, 1]} : vector<16x32xf32> to vector<1x32xf32>
    %c8_i32_69 = arith.constant 8 : i32
    %674 = vector.broadcast %c8_i32_69 : i32 to vector<8x1xi32>
    %675 = arith.cmpi eq, %599, %674 : vector<8x1xi32>
    %676 = arith.extui %675 : vector<8x1xi1> to vector<8x1xi32>
    %677 = arith.sitofp %676 : vector<8x1xi32> to vector<8x1xf32>
    %678 = vector.broadcast %673 : vector<1x32xf32> to vector<8x32xf32>
    %679 = vector.broadcast %677 : vector<8x1xf32> to vector<8x32xf32>
    %680 = arith.mulf %678, %679 : vector<8x32xf32>
    %681 = arith.addf %672, %680 : vector<8x32xf32>
    %682 = vector.extract_strided_slice %2 {offsets = [9, 0], sizes = [1, 32], strides = [1, 1]} : vector<16x32xf32> to vector<1x32xf32>
    %c9_i32_70 = arith.constant 9 : i32
    %683 = vector.broadcast %c9_i32_70 : i32 to vector<8x1xi32>
    %684 = arith.cmpi eq, %599, %683 : vector<8x1xi32>
    %685 = arith.extui %684 : vector<8x1xi1> to vector<8x1xi32>
    %686 = arith.sitofp %685 : vector<8x1xi32> to vector<8x1xf32>
    %687 = vector.broadcast %682 : vector<1x32xf32> to vector<8x32xf32>
    %688 = vector.broadcast %686 : vector<8x1xf32> to vector<8x32xf32>
    %689 = arith.mulf %687, %688 : vector<8x32xf32>
    %690 = arith.addf %681, %689 : vector<8x32xf32>
    %691 = vector.extract_strided_slice %2 {offsets = [10, 0], sizes = [1, 32], strides = [1, 1]} : vector<16x32xf32> to vector<1x32xf32>
    %c10_i32_71 = arith.constant 10 : i32
    %692 = vector.broadcast %c10_i32_71 : i32 to vector<8x1xi32>
    %693 = arith.cmpi eq, %599, %692 : vector<8x1xi32>
    %694 = arith.extui %693 : vector<8x1xi1> to vector<8x1xi32>
    %695 = arith.sitofp %694 : vector<8x1xi32> to vector<8x1xf32>
    %696 = vector.broadcast %691 : vector<1x32xf32> to vector<8x32xf32>
    %697 = vector.broadcast %695 : vector<8x1xf32> to vector<8x32xf32>
    %698 = arith.mulf %696, %697 : vector<8x32xf32>
    %699 = arith.addf %690, %698 : vector<8x32xf32>
    %700 = vector.extract_strided_slice %2 {offsets = [11, 0], sizes = [1, 32], strides = [1, 1]} : vector<16x32xf32> to vector<1x32xf32>
    %c11_i32_72 = arith.constant 11 : i32
    %701 = vector.broadcast %c11_i32_72 : i32 to vector<8x1xi32>
    %702 = arith.cmpi eq, %599, %701 : vector<8x1xi32>
    %703 = arith.extui %702 : vector<8x1xi1> to vector<8x1xi32>
    %704 = arith.sitofp %703 : vector<8x1xi32> to vector<8x1xf32>
    %705 = vector.broadcast %700 : vector<1x32xf32> to vector<8x32xf32>
    %706 = vector.broadcast %704 : vector<8x1xf32> to vector<8x32xf32>
    %707 = arith.mulf %705, %706 : vector<8x32xf32>
    %708 = arith.addf %699, %707 : vector<8x32xf32>
    %709 = vector.extract_strided_slice %2 {offsets = [12, 0], sizes = [1, 32], strides = [1, 1]} : vector<16x32xf32> to vector<1x32xf32>
    %c12_i32_73 = arith.constant 12 : i32
    %710 = vector.broadcast %c12_i32_73 : i32 to vector<8x1xi32>
    %711 = arith.cmpi eq, %599, %710 : vector<8x1xi32>
    %712 = arith.extui %711 : vector<8x1xi1> to vector<8x1xi32>
    %713 = arith.sitofp %712 : vector<8x1xi32> to vector<8x1xf32>
    %714 = vector.broadcast %709 : vector<1x32xf32> to vector<8x32xf32>
    %715 = vector.broadcast %713 : vector<8x1xf32> to vector<8x32xf32>
    %716 = arith.mulf %714, %715 : vector<8x32xf32>
    %717 = arith.addf %708, %716 : vector<8x32xf32>
    %718 = vector.extract_strided_slice %2 {offsets = [13, 0], sizes = [1, 32], strides = [1, 1]} : vector<16x32xf32> to vector<1x32xf32>
    %c13_i32_74 = arith.constant 13 : i32
    %719 = vector.broadcast %c13_i32_74 : i32 to vector<8x1xi32>
    %720 = arith.cmpi eq, %599, %719 : vector<8x1xi32>
    %721 = arith.extui %720 : vector<8x1xi1> to vector<8x1xi32>
    %722 = arith.sitofp %721 : vector<8x1xi32> to vector<8x1xf32>
    %723 = vector.broadcast %718 : vector<1x32xf32> to vector<8x32xf32>
    %724 = vector.broadcast %722 : vector<8x1xf32> to vector<8x32xf32>
    %725 = arith.mulf %723, %724 : vector<8x32xf32>
    %726 = arith.addf %717, %725 : vector<8x32xf32>
    %727 = vector.extract_strided_slice %2 {offsets = [14, 0], sizes = [1, 32], strides = [1, 1]} : vector<16x32xf32> to vector<1x32xf32>
    %c14_i32_75 = arith.constant 14 : i32
    %728 = vector.broadcast %c14_i32_75 : i32 to vector<8x1xi32>
    %729 = arith.cmpi eq, %599, %728 : vector<8x1xi32>
    %730 = arith.extui %729 : vector<8x1xi1> to vector<8x1xi32>
    %731 = arith.sitofp %730 : vector<8x1xi32> to vector<8x1xf32>
    %732 = vector.broadcast %727 : vector<1x32xf32> to vector<8x32xf32>
    %733 = vector.broadcast %731 : vector<8x1xf32> to vector<8x32xf32>
    %734 = arith.mulf %732, %733 : vector<8x32xf32>
    %735 = arith.addf %726, %734 : vector<8x32xf32>
    %736 = vector.extract_strided_slice %2 {offsets = [15, 0], sizes = [1, 32], strides = [1, 1]} : vector<16x32xf32> to vector<1x32xf32>
    %c15_i32_76 = arith.constant 15 : i32
    %737 = vector.broadcast %c15_i32_76 : i32 to vector<8x1xi32>
    %738 = arith.cmpi eq, %599, %737 : vector<8x1xi32>
    %739 = arith.extui %738 : vector<8x1xi1> to vector<8x1xi32>
    %740 = arith.sitofp %739 : vector<8x1xi32> to vector<8x1xf32>
    %741 = vector.broadcast %736 : vector<1x32xf32> to vector<8x32xf32>
    %742 = vector.broadcast %740 : vector<8x1xf32> to vector<8x32xf32>
    %743 = arith.mulf %741, %742 : vector<8x32xf32>
    %744 = arith.addf %735, %743 : vector<8x32xf32>
    %745 = vector.extract_strided_slice %0 {offsets = [0, 128], sizes = [8, 32], strides = [1, 1]} : vector<8x256xf32> to vector<8x32xf32>
    %746 = arith.addf %744, %745 : vector<8x32xf32>
    %747 = vector.extract_strided_slice %1 {offsets = [0, 5], sizes = [8, 1], strides = [1, 1]} : vector<8x8xi32> to vector<8x1xi32>
    %cst_77 = arith.constant 0.000000e+00 : f32
    %748 = vector.broadcast %cst_77 : f32 to vector<8x32xf32>
    %749 = vector.extract_strided_slice %2 {offsets = [0, 0], sizes = [1, 32], strides = [1, 1]} : vector<16x32xf32> to vector<1x32xf32>
    %c0_i32_78 = arith.constant 0 : i32
    %750 = vector.broadcast %c0_i32_78 : i32 to vector<8x1xi32>
    %751 = arith.cmpi eq, %747, %750 : vector<8x1xi32>
    %752 = arith.extui %751 : vector<8x1xi1> to vector<8x1xi32>
    %753 = arith.sitofp %752 : vector<8x1xi32> to vector<8x1xf32>
    %754 = vector.broadcast %749 : vector<1x32xf32> to vector<8x32xf32>
    %755 = vector.broadcast %753 : vector<8x1xf32> to vector<8x32xf32>
    %756 = arith.mulf %754, %755 : vector<8x32xf32>
    %757 = arith.addf %748, %756 : vector<8x32xf32>
    %758 = vector.extract_strided_slice %2 {offsets = [1, 0], sizes = [1, 32], strides = [1, 1]} : vector<16x32xf32> to vector<1x32xf32>
    %c1_i32_79 = arith.constant 1 : i32
    %759 = vector.broadcast %c1_i32_79 : i32 to vector<8x1xi32>
    %760 = arith.cmpi eq, %747, %759 : vector<8x1xi32>
    %761 = arith.extui %760 : vector<8x1xi1> to vector<8x1xi32>
    %762 = arith.sitofp %761 : vector<8x1xi32> to vector<8x1xf32>
    %763 = vector.broadcast %758 : vector<1x32xf32> to vector<8x32xf32>
    %764 = vector.broadcast %762 : vector<8x1xf32> to vector<8x32xf32>
    %765 = arith.mulf %763, %764 : vector<8x32xf32>
    %766 = arith.addf %757, %765 : vector<8x32xf32>
    %767 = vector.extract_strided_slice %2 {offsets = [2, 0], sizes = [1, 32], strides = [1, 1]} : vector<16x32xf32> to vector<1x32xf32>
    %c2_i32_80 = arith.constant 2 : i32
    %768 = vector.broadcast %c2_i32_80 : i32 to vector<8x1xi32>
    %769 = arith.cmpi eq, %747, %768 : vector<8x1xi32>
    %770 = arith.extui %769 : vector<8x1xi1> to vector<8x1xi32>
    %771 = arith.sitofp %770 : vector<8x1xi32> to vector<8x1xf32>
    %772 = vector.broadcast %767 : vector<1x32xf32> to vector<8x32xf32>
    %773 = vector.broadcast %771 : vector<8x1xf32> to vector<8x32xf32>
    %774 = arith.mulf %772, %773 : vector<8x32xf32>
    %775 = arith.addf %766, %774 : vector<8x32xf32>
    %776 = vector.extract_strided_slice %2 {offsets = [3, 0], sizes = [1, 32], strides = [1, 1]} : vector<16x32xf32> to vector<1x32xf32>
    %c3_i32_81 = arith.constant 3 : i32
    %777 = vector.broadcast %c3_i32_81 : i32 to vector<8x1xi32>
    %778 = arith.cmpi eq, %747, %777 : vector<8x1xi32>
    %779 = arith.extui %778 : vector<8x1xi1> to vector<8x1xi32>
    %780 = arith.sitofp %779 : vector<8x1xi32> to vector<8x1xf32>
    %781 = vector.broadcast %776 : vector<1x32xf32> to vector<8x32xf32>
    %782 = vector.broadcast %780 : vector<8x1xf32> to vector<8x32xf32>
    %783 = arith.mulf %781, %782 : vector<8x32xf32>
    %784 = arith.addf %775, %783 : vector<8x32xf32>
    %785 = vector.extract_strided_slice %2 {offsets = [4, 0], sizes = [1, 32], strides = [1, 1]} : vector<16x32xf32> to vector<1x32xf32>
    %c4_i32_82 = arith.constant 4 : i32
    %786 = vector.broadcast %c4_i32_82 : i32 to vector<8x1xi32>
    %787 = arith.cmpi eq, %747, %786 : vector<8x1xi32>
    %788 = arith.extui %787 : vector<8x1xi1> to vector<8x1xi32>
    %789 = arith.sitofp %788 : vector<8x1xi32> to vector<8x1xf32>
    %790 = vector.broadcast %785 : vector<1x32xf32> to vector<8x32xf32>
    %791 = vector.broadcast %789 : vector<8x1xf32> to vector<8x32xf32>
    %792 = arith.mulf %790, %791 : vector<8x32xf32>
    %793 = arith.addf %784, %792 : vector<8x32xf32>
    %794 = vector.extract_strided_slice %2 {offsets = [5, 0], sizes = [1, 32], strides = [1, 1]} : vector<16x32xf32> to vector<1x32xf32>
    %c5_i32_83 = arith.constant 5 : i32
    %795 = vector.broadcast %c5_i32_83 : i32 to vector<8x1xi32>
    %796 = arith.cmpi eq, %747, %795 : vector<8x1xi32>
    %797 = arith.extui %796 : vector<8x1xi1> to vector<8x1xi32>
    %798 = arith.sitofp %797 : vector<8x1xi32> to vector<8x1xf32>
    %799 = vector.broadcast %794 : vector<1x32xf32> to vector<8x32xf32>
    %800 = vector.broadcast %798 : vector<8x1xf32> to vector<8x32xf32>
    %801 = arith.mulf %799, %800 : vector<8x32xf32>
    %802 = arith.addf %793, %801 : vector<8x32xf32>
    %803 = vector.extract_strided_slice %2 {offsets = [6, 0], sizes = [1, 32], strides = [1, 1]} : vector<16x32xf32> to vector<1x32xf32>
    %c6_i32_84 = arith.constant 6 : i32
    %804 = vector.broadcast %c6_i32_84 : i32 to vector<8x1xi32>
    %805 = arith.cmpi eq, %747, %804 : vector<8x1xi32>
    %806 = arith.extui %805 : vector<8x1xi1> to vector<8x1xi32>
    %807 = arith.sitofp %806 : vector<8x1xi32> to vector<8x1xf32>
    %808 = vector.broadcast %803 : vector<1x32xf32> to vector<8x32xf32>
    %809 = vector.broadcast %807 : vector<8x1xf32> to vector<8x32xf32>
    %810 = arith.mulf %808, %809 : vector<8x32xf32>
    %811 = arith.addf %802, %810 : vector<8x32xf32>
    %812 = vector.extract_strided_slice %2 {offsets = [7, 0], sizes = [1, 32], strides = [1, 1]} : vector<16x32xf32> to vector<1x32xf32>
    %c7_i32_85 = arith.constant 7 : i32
    %813 = vector.broadcast %c7_i32_85 : i32 to vector<8x1xi32>
    %814 = arith.cmpi eq, %747, %813 : vector<8x1xi32>
    %815 = arith.extui %814 : vector<8x1xi1> to vector<8x1xi32>
    %816 = arith.sitofp %815 : vector<8x1xi32> to vector<8x1xf32>
    %817 = vector.broadcast %812 : vector<1x32xf32> to vector<8x32xf32>
    %818 = vector.broadcast %816 : vector<8x1xf32> to vector<8x32xf32>
    %819 = arith.mulf %817, %818 : vector<8x32xf32>
    %820 = arith.addf %811, %819 : vector<8x32xf32>
    %821 = vector.extract_strided_slice %2 {offsets = [8, 0], sizes = [1, 32], strides = [1, 1]} : vector<16x32xf32> to vector<1x32xf32>
    %c8_i32_86 = arith.constant 8 : i32
    %822 = vector.broadcast %c8_i32_86 : i32 to vector<8x1xi32>
    %823 = arith.cmpi eq, %747, %822 : vector<8x1xi32>
    %824 = arith.extui %823 : vector<8x1xi1> to vector<8x1xi32>
    %825 = arith.sitofp %824 : vector<8x1xi32> to vector<8x1xf32>
    %826 = vector.broadcast %821 : vector<1x32xf32> to vector<8x32xf32>
    %827 = vector.broadcast %825 : vector<8x1xf32> to vector<8x32xf32>
    %828 = arith.mulf %826, %827 : vector<8x32xf32>
    %829 = arith.addf %820, %828 : vector<8x32xf32>
    %830 = vector.extract_strided_slice %2 {offsets = [9, 0], sizes = [1, 32], strides = [1, 1]} : vector<16x32xf32> to vector<1x32xf32>
    %c9_i32_87 = arith.constant 9 : i32
    %831 = vector.broadcast %c9_i32_87 : i32 to vector<8x1xi32>
    %832 = arith.cmpi eq, %747, %831 : vector<8x1xi32>
    %833 = arith.extui %832 : vector<8x1xi1> to vector<8x1xi32>
    %834 = arith.sitofp %833 : vector<8x1xi32> to vector<8x1xf32>
    %835 = vector.broadcast %830 : vector<1x32xf32> to vector<8x32xf32>
    %836 = vector.broadcast %834 : vector<8x1xf32> to vector<8x32xf32>
    %837 = arith.mulf %835, %836 : vector<8x32xf32>
    %838 = arith.addf %829, %837 : vector<8x32xf32>
    %839 = vector.extract_strided_slice %2 {offsets = [10, 0], sizes = [1, 32], strides = [1, 1]} : vector<16x32xf32> to vector<1x32xf32>
    %c10_i32_88 = arith.constant 10 : i32
    %840 = vector.broadcast %c10_i32_88 : i32 to vector<8x1xi32>
    %841 = arith.cmpi eq, %747, %840 : vector<8x1xi32>
    %842 = arith.extui %841 : vector<8x1xi1> to vector<8x1xi32>
    %843 = arith.sitofp %842 : vector<8x1xi32> to vector<8x1xf32>
    %844 = vector.broadcast %839 : vector<1x32xf32> to vector<8x32xf32>
    %845 = vector.broadcast %843 : vector<8x1xf32> to vector<8x32xf32>
    %846 = arith.mulf %844, %845 : vector<8x32xf32>
    %847 = arith.addf %838, %846 : vector<8x32xf32>
    %848 = vector.extract_strided_slice %2 {offsets = [11, 0], sizes = [1, 32], strides = [1, 1]} : vector<16x32xf32> to vector<1x32xf32>
    %c11_i32_89 = arith.constant 11 : i32
    %849 = vector.broadcast %c11_i32_89 : i32 to vector<8x1xi32>
    %850 = arith.cmpi eq, %747, %849 : vector<8x1xi32>
    %851 = arith.extui %850 : vector<8x1xi1> to vector<8x1xi32>
    %852 = arith.sitofp %851 : vector<8x1xi32> to vector<8x1xf32>
    %853 = vector.broadcast %848 : vector<1x32xf32> to vector<8x32xf32>
    %854 = vector.broadcast %852 : vector<8x1xf32> to vector<8x32xf32>
    %855 = arith.mulf %853, %854 : vector<8x32xf32>
    %856 = arith.addf %847, %855 : vector<8x32xf32>
    %857 = vector.extract_strided_slice %2 {offsets = [12, 0], sizes = [1, 32], strides = [1, 1]} : vector<16x32xf32> to vector<1x32xf32>
    %c12_i32_90 = arith.constant 12 : i32
    %858 = vector.broadcast %c12_i32_90 : i32 to vector<8x1xi32>
    %859 = arith.cmpi eq, %747, %858 : vector<8x1xi32>
    %860 = arith.extui %859 : vector<8x1xi1> to vector<8x1xi32>
    %861 = arith.sitofp %860 : vector<8x1xi32> to vector<8x1xf32>
    %862 = vector.broadcast %857 : vector<1x32xf32> to vector<8x32xf32>
    %863 = vector.broadcast %861 : vector<8x1xf32> to vector<8x32xf32>
    %864 = arith.mulf %862, %863 : vector<8x32xf32>
    %865 = arith.addf %856, %864 : vector<8x32xf32>
    %866 = vector.extract_strided_slice %2 {offsets = [13, 0], sizes = [1, 32], strides = [1, 1]} : vector<16x32xf32> to vector<1x32xf32>
    %c13_i32_91 = arith.constant 13 : i32
    %867 = vector.broadcast %c13_i32_91 : i32 to vector<8x1xi32>
    %868 = arith.cmpi eq, %747, %867 : vector<8x1xi32>
    %869 = arith.extui %868 : vector<8x1xi1> to vector<8x1xi32>
    %870 = arith.sitofp %869 : vector<8x1xi32> to vector<8x1xf32>
    %871 = vector.broadcast %866 : vector<1x32xf32> to vector<8x32xf32>
    %872 = vector.broadcast %870 : vector<8x1xf32> to vector<8x32xf32>
    %873 = arith.mulf %871, %872 : vector<8x32xf32>
    %874 = arith.addf %865, %873 : vector<8x32xf32>
    %875 = vector.extract_strided_slice %2 {offsets = [14, 0], sizes = [1, 32], strides = [1, 1]} : vector<16x32xf32> to vector<1x32xf32>
    %c14_i32_92 = arith.constant 14 : i32
    %876 = vector.broadcast %c14_i32_92 : i32 to vector<8x1xi32>
    %877 = arith.cmpi eq, %747, %876 : vector<8x1xi32>
    %878 = arith.extui %877 : vector<8x1xi1> to vector<8x1xi32>
    %879 = arith.sitofp %878 : vector<8x1xi32> to vector<8x1xf32>
    %880 = vector.broadcast %875 : vector<1x32xf32> to vector<8x32xf32>
    %881 = vector.broadcast %879 : vector<8x1xf32> to vector<8x32xf32>
    %882 = arith.mulf %880, %881 : vector<8x32xf32>
    %883 = arith.addf %874, %882 : vector<8x32xf32>
    %884 = vector.extract_strided_slice %2 {offsets = [15, 0], sizes = [1, 32], strides = [1, 1]} : vector<16x32xf32> to vector<1x32xf32>
    %c15_i32_93 = arith.constant 15 : i32
    %885 = vector.broadcast %c15_i32_93 : i32 to vector<8x1xi32>
    %886 = arith.cmpi eq, %747, %885 : vector<8x1xi32>
    %887 = arith.extui %886 : vector<8x1xi1> to vector<8x1xi32>
    %888 = arith.sitofp %887 : vector<8x1xi32> to vector<8x1xf32>
    %889 = vector.broadcast %884 : vector<1x32xf32> to vector<8x32xf32>
    %890 = vector.broadcast %888 : vector<8x1xf32> to vector<8x32xf32>
    %891 = arith.mulf %889, %890 : vector<8x32xf32>
    %892 = arith.addf %883, %891 : vector<8x32xf32>
    %893 = vector.extract_strided_slice %0 {offsets = [0, 160], sizes = [8, 32], strides = [1, 1]} : vector<8x256xf32> to vector<8x32xf32>
    %894 = arith.addf %892, %893 : vector<8x32xf32>
    %895 = vector.extract_strided_slice %1 {offsets = [0, 6], sizes = [8, 1], strides = [1, 1]} : vector<8x8xi32> to vector<8x1xi32>
    %cst_94 = arith.constant 0.000000e+00 : f32
    %896 = vector.broadcast %cst_94 : f32 to vector<8x32xf32>
    %897 = vector.extract_strided_slice %2 {offsets = [0, 0], sizes = [1, 32], strides = [1, 1]} : vector<16x32xf32> to vector<1x32xf32>
    %c0_i32_95 = arith.constant 0 : i32
    %898 = vector.broadcast %c0_i32_95 : i32 to vector<8x1xi32>
    %899 = arith.cmpi eq, %895, %898 : vector<8x1xi32>
    %900 = arith.extui %899 : vector<8x1xi1> to vector<8x1xi32>
    %901 = arith.sitofp %900 : vector<8x1xi32> to vector<8x1xf32>
    %902 = vector.broadcast %897 : vector<1x32xf32> to vector<8x32xf32>
    %903 = vector.broadcast %901 : vector<8x1xf32> to vector<8x32xf32>
    %904 = arith.mulf %902, %903 : vector<8x32xf32>
    %905 = arith.addf %896, %904 : vector<8x32xf32>
    %906 = vector.extract_strided_slice %2 {offsets = [1, 0], sizes = [1, 32], strides = [1, 1]} : vector<16x32xf32> to vector<1x32xf32>
    %c1_i32_96 = arith.constant 1 : i32
    %907 = vector.broadcast %c1_i32_96 : i32 to vector<8x1xi32>
    %908 = arith.cmpi eq, %895, %907 : vector<8x1xi32>
    %909 = arith.extui %908 : vector<8x1xi1> to vector<8x1xi32>
    %910 = arith.sitofp %909 : vector<8x1xi32> to vector<8x1xf32>
    %911 = vector.broadcast %906 : vector<1x32xf32> to vector<8x32xf32>
    %912 = vector.broadcast %910 : vector<8x1xf32> to vector<8x32xf32>
    %913 = arith.mulf %911, %912 : vector<8x32xf32>
    %914 = arith.addf %905, %913 : vector<8x32xf32>
    %915 = vector.extract_strided_slice %2 {offsets = [2, 0], sizes = [1, 32], strides = [1, 1]} : vector<16x32xf32> to vector<1x32xf32>
    %c2_i32_97 = arith.constant 2 : i32
    %916 = vector.broadcast %c2_i32_97 : i32 to vector<8x1xi32>
    %917 = arith.cmpi eq, %895, %916 : vector<8x1xi32>
    %918 = arith.extui %917 : vector<8x1xi1> to vector<8x1xi32>
    %919 = arith.sitofp %918 : vector<8x1xi32> to vector<8x1xf32>
    %920 = vector.broadcast %915 : vector<1x32xf32> to vector<8x32xf32>
    %921 = vector.broadcast %919 : vector<8x1xf32> to vector<8x32xf32>
    %922 = arith.mulf %920, %921 : vector<8x32xf32>
    %923 = arith.addf %914, %922 : vector<8x32xf32>
    %924 = vector.extract_strided_slice %2 {offsets = [3, 0], sizes = [1, 32], strides = [1, 1]} : vector<16x32xf32> to vector<1x32xf32>
    %c3_i32_98 = arith.constant 3 : i32
    %925 = vector.broadcast %c3_i32_98 : i32 to vector<8x1xi32>
    %926 = arith.cmpi eq, %895, %925 : vector<8x1xi32>
    %927 = arith.extui %926 : vector<8x1xi1> to vector<8x1xi32>
    %928 = arith.sitofp %927 : vector<8x1xi32> to vector<8x1xf32>
    %929 = vector.broadcast %924 : vector<1x32xf32> to vector<8x32xf32>
    %930 = vector.broadcast %928 : vector<8x1xf32> to vector<8x32xf32>
    %931 = arith.mulf %929, %930 : vector<8x32xf32>
    %932 = arith.addf %923, %931 : vector<8x32xf32>
    %933 = vector.extract_strided_slice %2 {offsets = [4, 0], sizes = [1, 32], strides = [1, 1]} : vector<16x32xf32> to vector<1x32xf32>
    %c4_i32_99 = arith.constant 4 : i32
    %934 = vector.broadcast %c4_i32_99 : i32 to vector<8x1xi32>
    %935 = arith.cmpi eq, %895, %934 : vector<8x1xi32>
    %936 = arith.extui %935 : vector<8x1xi1> to vector<8x1xi32>
    %937 = arith.sitofp %936 : vector<8x1xi32> to vector<8x1xf32>
    %938 = vector.broadcast %933 : vector<1x32xf32> to vector<8x32xf32>
    %939 = vector.broadcast %937 : vector<8x1xf32> to vector<8x32xf32>
    %940 = arith.mulf %938, %939 : vector<8x32xf32>
    %941 = arith.addf %932, %940 : vector<8x32xf32>
    %942 = vector.extract_strided_slice %2 {offsets = [5, 0], sizes = [1, 32], strides = [1, 1]} : vector<16x32xf32> to vector<1x32xf32>
    %c5_i32_100 = arith.constant 5 : i32
    %943 = vector.broadcast %c5_i32_100 : i32 to vector<8x1xi32>
    %944 = arith.cmpi eq, %895, %943 : vector<8x1xi32>
    %945 = arith.extui %944 : vector<8x1xi1> to vector<8x1xi32>
    %946 = arith.sitofp %945 : vector<8x1xi32> to vector<8x1xf32>
    %947 = vector.broadcast %942 : vector<1x32xf32> to vector<8x32xf32>
    %948 = vector.broadcast %946 : vector<8x1xf32> to vector<8x32xf32>
    %949 = arith.mulf %947, %948 : vector<8x32xf32>
    %950 = arith.addf %941, %949 : vector<8x32xf32>
    %951 = vector.extract_strided_slice %2 {offsets = [6, 0], sizes = [1, 32], strides = [1, 1]} : vector<16x32xf32> to vector<1x32xf32>
    %c6_i32_101 = arith.constant 6 : i32
    %952 = vector.broadcast %c6_i32_101 : i32 to vector<8x1xi32>
    %953 = arith.cmpi eq, %895, %952 : vector<8x1xi32>
    %954 = arith.extui %953 : vector<8x1xi1> to vector<8x1xi32>
    %955 = arith.sitofp %954 : vector<8x1xi32> to vector<8x1xf32>
    %956 = vector.broadcast %951 : vector<1x32xf32> to vector<8x32xf32>
    %957 = vector.broadcast %955 : vector<8x1xf32> to vector<8x32xf32>
    %958 = arith.mulf %956, %957 : vector<8x32xf32>
    %959 = arith.addf %950, %958 : vector<8x32xf32>
    %960 = vector.extract_strided_slice %2 {offsets = [7, 0], sizes = [1, 32], strides = [1, 1]} : vector<16x32xf32> to vector<1x32xf32>
    %c7_i32_102 = arith.constant 7 : i32
    %961 = vector.broadcast %c7_i32_102 : i32 to vector<8x1xi32>
    %962 = arith.cmpi eq, %895, %961 : vector<8x1xi32>
    %963 = arith.extui %962 : vector<8x1xi1> to vector<8x1xi32>
    %964 = arith.sitofp %963 : vector<8x1xi32> to vector<8x1xf32>
    %965 = vector.broadcast %960 : vector<1x32xf32> to vector<8x32xf32>
    %966 = vector.broadcast %964 : vector<8x1xf32> to vector<8x32xf32>
    %967 = arith.mulf %965, %966 : vector<8x32xf32>
    %968 = arith.addf %959, %967 : vector<8x32xf32>
    %969 = vector.extract_strided_slice %2 {offsets = [8, 0], sizes = [1, 32], strides = [1, 1]} : vector<16x32xf32> to vector<1x32xf32>
    %c8_i32_103 = arith.constant 8 : i32
    %970 = vector.broadcast %c8_i32_103 : i32 to vector<8x1xi32>
    %971 = arith.cmpi eq, %895, %970 : vector<8x1xi32>
    %972 = arith.extui %971 : vector<8x1xi1> to vector<8x1xi32>
    %973 = arith.sitofp %972 : vector<8x1xi32> to vector<8x1xf32>
    %974 = vector.broadcast %969 : vector<1x32xf32> to vector<8x32xf32>
    %975 = vector.broadcast %973 : vector<8x1xf32> to vector<8x32xf32>
    %976 = arith.mulf %974, %975 : vector<8x32xf32>
    %977 = arith.addf %968, %976 : vector<8x32xf32>
    %978 = vector.extract_strided_slice %2 {offsets = [9, 0], sizes = [1, 32], strides = [1, 1]} : vector<16x32xf32> to vector<1x32xf32>
    %c9_i32_104 = arith.constant 9 : i32
    %979 = vector.broadcast %c9_i32_104 : i32 to vector<8x1xi32>
    %980 = arith.cmpi eq, %895, %979 : vector<8x1xi32>
    %981 = arith.extui %980 : vector<8x1xi1> to vector<8x1xi32>
    %982 = arith.sitofp %981 : vector<8x1xi32> to vector<8x1xf32>
    %983 = vector.broadcast %978 : vector<1x32xf32> to vector<8x32xf32>
    %984 = vector.broadcast %982 : vector<8x1xf32> to vector<8x32xf32>
    %985 = arith.mulf %983, %984 : vector<8x32xf32>
    %986 = arith.addf %977, %985 : vector<8x32xf32>
    %987 = vector.extract_strided_slice %2 {offsets = [10, 0], sizes = [1, 32], strides = [1, 1]} : vector<16x32xf32> to vector<1x32xf32>
    %c10_i32_105 = arith.constant 10 : i32
    %988 = vector.broadcast %c10_i32_105 : i32 to vector<8x1xi32>
    %989 = arith.cmpi eq, %895, %988 : vector<8x1xi32>
    %990 = arith.extui %989 : vector<8x1xi1> to vector<8x1xi32>
    %991 = arith.sitofp %990 : vector<8x1xi32> to vector<8x1xf32>
    %992 = vector.broadcast %987 : vector<1x32xf32> to vector<8x32xf32>
    %993 = vector.broadcast %991 : vector<8x1xf32> to vector<8x32xf32>
    %994 = arith.mulf %992, %993 : vector<8x32xf32>
    %995 = arith.addf %986, %994 : vector<8x32xf32>
    %996 = vector.extract_strided_slice %2 {offsets = [11, 0], sizes = [1, 32], strides = [1, 1]} : vector<16x32xf32> to vector<1x32xf32>
    %c11_i32_106 = arith.constant 11 : i32
    %997 = vector.broadcast %c11_i32_106 : i32 to vector<8x1xi32>
    %998 = arith.cmpi eq, %895, %997 : vector<8x1xi32>
    %999 = arith.extui %998 : vector<8x1xi1> to vector<8x1xi32>
    %1000 = arith.sitofp %999 : vector<8x1xi32> to vector<8x1xf32>
    %1001 = vector.broadcast %996 : vector<1x32xf32> to vector<8x32xf32>
    %1002 = vector.broadcast %1000 : vector<8x1xf32> to vector<8x32xf32>
    %1003 = arith.mulf %1001, %1002 : vector<8x32xf32>
    %1004 = arith.addf %995, %1003 : vector<8x32xf32>
    %1005 = vector.extract_strided_slice %2 {offsets = [12, 0], sizes = [1, 32], strides = [1, 1]} : vector<16x32xf32> to vector<1x32xf32>
    %c12_i32_107 = arith.constant 12 : i32
    %1006 = vector.broadcast %c12_i32_107 : i32 to vector<8x1xi32>
    %1007 = arith.cmpi eq, %895, %1006 : vector<8x1xi32>
    %1008 = arith.extui %1007 : vector<8x1xi1> to vector<8x1xi32>
    %1009 = arith.sitofp %1008 : vector<8x1xi32> to vector<8x1xf32>
    %1010 = vector.broadcast %1005 : vector<1x32xf32> to vector<8x32xf32>
    %1011 = vector.broadcast %1009 : vector<8x1xf32> to vector<8x32xf32>
    %1012 = arith.mulf %1010, %1011 : vector<8x32xf32>
    %1013 = arith.addf %1004, %1012 : vector<8x32xf32>
    %1014 = vector.extract_strided_slice %2 {offsets = [13, 0], sizes = [1, 32], strides = [1, 1]} : vector<16x32xf32> to vector<1x32xf32>
    %c13_i32_108 = arith.constant 13 : i32
    %1015 = vector.broadcast %c13_i32_108 : i32 to vector<8x1xi32>
    %1016 = arith.cmpi eq, %895, %1015 : vector<8x1xi32>
    %1017 = arith.extui %1016 : vector<8x1xi1> to vector<8x1xi32>
    %1018 = arith.sitofp %1017 : vector<8x1xi32> to vector<8x1xf32>
    %1019 = vector.broadcast %1014 : vector<1x32xf32> to vector<8x32xf32>
    %1020 = vector.broadcast %1018 : vector<8x1xf32> to vector<8x32xf32>
    %1021 = arith.mulf %1019, %1020 : vector<8x32xf32>
    %1022 = arith.addf %1013, %1021 : vector<8x32xf32>
    %1023 = vector.extract_strided_slice %2 {offsets = [14, 0], sizes = [1, 32], strides = [1, 1]} : vector<16x32xf32> to vector<1x32xf32>
    %c14_i32_109 = arith.constant 14 : i32
    %1024 = vector.broadcast %c14_i32_109 : i32 to vector<8x1xi32>
    %1025 = arith.cmpi eq, %895, %1024 : vector<8x1xi32>
    %1026 = arith.extui %1025 : vector<8x1xi1> to vector<8x1xi32>
    %1027 = arith.sitofp %1026 : vector<8x1xi32> to vector<8x1xf32>
    %1028 = vector.broadcast %1023 : vector<1x32xf32> to vector<8x32xf32>
    %1029 = vector.broadcast %1027 : vector<8x1xf32> to vector<8x32xf32>
    %1030 = arith.mulf %1028, %1029 : vector<8x32xf32>
    %1031 = arith.addf %1022, %1030 : vector<8x32xf32>
    %1032 = vector.extract_strided_slice %2 {offsets = [15, 0], sizes = [1, 32], strides = [1, 1]} : vector<16x32xf32> to vector<1x32xf32>
    %c15_i32_110 = arith.constant 15 : i32
    %1033 = vector.broadcast %c15_i32_110 : i32 to vector<8x1xi32>
    %1034 = arith.cmpi eq, %895, %1033 : vector<8x1xi32>
    %1035 = arith.extui %1034 : vector<8x1xi1> to vector<8x1xi32>
    %1036 = arith.sitofp %1035 : vector<8x1xi32> to vector<8x1xf32>
    %1037 = vector.broadcast %1032 : vector<1x32xf32> to vector<8x32xf32>
    %1038 = vector.broadcast %1036 : vector<8x1xf32> to vector<8x32xf32>
    %1039 = arith.mulf %1037, %1038 : vector<8x32xf32>
    %1040 = arith.addf %1031, %1039 : vector<8x32xf32>
    %1041 = vector.extract_strided_slice %0 {offsets = [0, 192], sizes = [8, 32], strides = [1, 1]} : vector<8x256xf32> to vector<8x32xf32>
    %1042 = arith.addf %1040, %1041 : vector<8x32xf32>
    %1043 = tpu.concatenate %154, %302, %450, %598, %746, %894, %1042 in 0 : vector<8x32xf32>, vector<8x32xf32>, vector<8x32xf32>, vector<8x32xf32>, vector<8x32xf32>, vector<8x32xf32>, vector<8x32xf32> -> vector<56x32xf32>
    %cst_111 = arith.constant dense<0.000000e+00> : vector<56x128xf32>
    %1044 = tpu.matmul %1043, %4, %cst_111 {dimension_numbers = #tpu.dot_dimension_numbers<[1], [0], [0], [1], [0, 0, 1, 1], [], []>} : vector<56x32xf32>, vector<32x128xf32>, vector<56x128xf32> -> vector<56x128xf32>
    %1045 = vector.broadcast %6 : vector<1x128xf32> to vector<56x128xf32>
    %1046 = arith.addf %1044, %1045 : vector<56x128xf32>
    %1047 = vector.extract_strided_slice %0 {offsets = [0, 0], sizes = [8, 32], strides = [1, 1]} : vector<8x256xf32> to vector<8x32xf32>
    %cst_112 = arith.constant dense<0.000000e+00> : vector<8x128xf32>
    %1048 = tpu.matmul %1047, %4, %cst_112 {dimension_numbers = #tpu.dot_dimension_numbers<[1], [0], [0], [1], [0, 0, 1, 1], [], []>} : vector<8x32xf32>, vector<32x128xf32>, vector<8x128xf32> -> vector<8x128xf32>
    %1049 = vector.broadcast %6 : vector<1x128xf32> to vector<8x128xf32>
    %1050 = arith.addf %1048, %1049 : vector<8x128xf32>
    %1051 = arith.negf %1050 : vector<8x128xf32>
    %1052 = math.exp %1051 : vector<8x128xf32>
    %cst_113 = arith.constant 1.000000e+00 : f32
    %1053 = vector.broadcast %cst_113 : f32 to vector<8x128xf32>
    %1054 = arith.addf %1053, %1052 : vector<8x128xf32>
    %1055 = arith.divf %1053, %1054 : vector<8x128xf32>
    %1056 = math.tanh %1050 : vector<8x128xf32>
    %1057 = vector.extract_strided_slice %1055 {offsets = [0, 0], sizes = [8, 32], strides = [1, 1]} : vector<8x128xf32> to vector<8x32xf32>
    %1058 = vector.extract_strided_slice %1056 {offsets = [0, 64], sizes = [8, 32], strides = [1, 1]} : vector<8x128xf32> to vector<8x32xf32>
    %1059 = arith.mulf %1057, %1058 : vector<8x32xf32>
    %1060 = vector.extract_strided_slice %1055 {offsets = [0, 96], sizes = [8, 32], strides = [1, 1]} : vector<8x128xf32> to vector<8x32xf32>
    %1061 = math.tanh %1059 : vector<8x32xf32>
    %1062 = arith.mulf %1060, %1061 : vector<8x32xf32>
    %1063 = vector.extract_strided_slice %1046 {offsets = [0, 0], sizes = [8, 128], strides = [1, 1]} : vector<56x128xf32> to vector<8x128xf32>
    %cst_114 = arith.constant dense<0.000000e+00> : vector<8x128xf32>
    %1064 = tpu.matmul %1062, %5, %cst_114 {dimension_numbers = #tpu.dot_dimension_numbers<[1], [0], [0], [1], [0, 0, 1, 1], [], []>} : vector<8x32xf32>, vector<32x128xf32>, vector<8x128xf32> -> vector<8x128xf32>
    %1065 = arith.addf %1064, %1063 : vector<8x128xf32>
    %1066 = arith.negf %1065 : vector<8x128xf32>
    %1067 = math.exp %1066 : vector<8x128xf32>
    %cst_115 = arith.constant 1.000000e+00 : f32
    %1068 = vector.broadcast %cst_115 : f32 to vector<8x128xf32>
    %1069 = arith.addf %1068, %1067 : vector<8x128xf32>
    %1070 = arith.divf %1068, %1069 : vector<8x128xf32>
    %1071 = math.tanh %1065 : vector<8x128xf32>
    %1072 = vector.extract_strided_slice %1070 {offsets = [0, 32], sizes = [8, 32], strides = [1, 1]} : vector<8x128xf32> to vector<8x32xf32>
    %1073 = arith.mulf %1072, %1059 : vector<8x32xf32>
    %1074 = vector.extract_strided_slice %1070 {offsets = [0, 0], sizes = [8, 32], strides = [1, 1]} : vector<8x128xf32> to vector<8x32xf32>
    %1075 = vector.extract_strided_slice %1071 {offsets = [0, 64], sizes = [8, 32], strides = [1, 1]} : vector<8x128xf32> to vector<8x32xf32>
    %1076 = arith.mulf %1074, %1075 : vector<8x32xf32>
    %1077 = arith.addf %1073, %1076 : vector<8x32xf32>
    %1078 = vector.extract_strided_slice %1070 {offsets = [0, 96], sizes = [8, 32], strides = [1, 1]} : vector<8x128xf32> to vector<8x32xf32>
    %1079 = math.tanh %1077 : vector<8x32xf32>
    %1080 = arith.mulf %1078, %1079 : vector<8x32xf32>
    %1081 = vector.extract_strided_slice %1046 {offsets = [8, 0], sizes = [8, 128], strides = [1, 1]} : vector<56x128xf32> to vector<8x128xf32>
    %cst_116 = arith.constant dense<0.000000e+00> : vector<8x128xf32>
    %1082 = tpu.matmul %1080, %5, %cst_116 {dimension_numbers = #tpu.dot_dimension_numbers<[1], [0], [0], [1], [0, 0, 1, 1], [], []>} : vector<8x32xf32>, vector<32x128xf32>, vector<8x128xf32> -> vector<8x128xf32>
    %1083 = arith.addf %1082, %1081 : vector<8x128xf32>
    %1084 = arith.negf %1083 : vector<8x128xf32>
    %1085 = math.exp %1084 : vector<8x128xf32>
    %cst_117 = arith.constant 1.000000e+00 : f32
    %1086 = vector.broadcast %cst_117 : f32 to vector<8x128xf32>
    %1087 = arith.addf %1086, %1085 : vector<8x128xf32>
    %1088 = arith.divf %1086, %1087 : vector<8x128xf32>
    %1089 = math.tanh %1083 : vector<8x128xf32>
    %1090 = vector.extract_strided_slice %1088 {offsets = [0, 32], sizes = [8, 32], strides = [1, 1]} : vector<8x128xf32> to vector<8x32xf32>
    %1091 = arith.mulf %1090, %1077 : vector<8x32xf32>
    %1092 = vector.extract_strided_slice %1088 {offsets = [0, 0], sizes = [8, 32], strides = [1, 1]} : vector<8x128xf32> to vector<8x32xf32>
    %1093 = vector.extract_strided_slice %1089 {offsets = [0, 64], sizes = [8, 32], strides = [1, 1]} : vector<8x128xf32> to vector<8x32xf32>
    %1094 = arith.mulf %1092, %1093 : vector<8x32xf32>
    %1095 = arith.addf %1091, %1094 : vector<8x32xf32>
    %1096 = vector.extract_strided_slice %1088 {offsets = [0, 96], sizes = [8, 32], strides = [1, 1]} : vector<8x128xf32> to vector<8x32xf32>
    %1097 = math.tanh %1095 : vector<8x32xf32>
    %1098 = arith.mulf %1096, %1097 : vector<8x32xf32>
    %1099 = vector.extract_strided_slice %1046 {offsets = [16, 0], sizes = [8, 128], strides = [1, 1]} : vector<56x128xf32> to vector<8x128xf32>
    %cst_118 = arith.constant dense<0.000000e+00> : vector<8x128xf32>
    %1100 = tpu.matmul %1098, %5, %cst_118 {dimension_numbers = #tpu.dot_dimension_numbers<[1], [0], [0], [1], [0, 0, 1, 1], [], []>} : vector<8x32xf32>, vector<32x128xf32>, vector<8x128xf32> -> vector<8x128xf32>
    %1101 = arith.addf %1100, %1099 : vector<8x128xf32>
    %1102 = arith.negf %1101 : vector<8x128xf32>
    %1103 = math.exp %1102 : vector<8x128xf32>
    %cst_119 = arith.constant 1.000000e+00 : f32
    %1104 = vector.broadcast %cst_119 : f32 to vector<8x128xf32>
    %1105 = arith.addf %1104, %1103 : vector<8x128xf32>
    %1106 = arith.divf %1104, %1105 : vector<8x128xf32>
    %1107 = math.tanh %1101 : vector<8x128xf32>
    %1108 = vector.extract_strided_slice %1106 {offsets = [0, 32], sizes = [8, 32], strides = [1, 1]} : vector<8x128xf32> to vector<8x32xf32>
    %1109 = arith.mulf %1108, %1095 : vector<8x32xf32>
    %1110 = vector.extract_strided_slice %1106 {offsets = [0, 0], sizes = [8, 32], strides = [1, 1]} : vector<8x128xf32> to vector<8x32xf32>
    %1111 = vector.extract_strided_slice %1107 {offsets = [0, 64], sizes = [8, 32], strides = [1, 1]} : vector<8x128xf32> to vector<8x32xf32>
    %1112 = arith.mulf %1110, %1111 : vector<8x32xf32>
    %1113 = arith.addf %1109, %1112 : vector<8x32xf32>
    %1114 = vector.extract_strided_slice %1106 {offsets = [0, 96], sizes = [8, 32], strides = [1, 1]} : vector<8x128xf32> to vector<8x32xf32>
    %1115 = math.tanh %1113 : vector<8x32xf32>
    %1116 = arith.mulf %1114, %1115 : vector<8x32xf32>
    %1117 = vector.extract_strided_slice %1046 {offsets = [24, 0], sizes = [8, 128], strides = [1, 1]} : vector<56x128xf32> to vector<8x128xf32>
    %cst_120 = arith.constant dense<0.000000e+00> : vector<8x128xf32>
    %1118 = tpu.matmul %1116, %5, %cst_120 {dimension_numbers = #tpu.dot_dimension_numbers<[1], [0], [0], [1], [0, 0, 1, 1], [], []>} : vector<8x32xf32>, vector<32x128xf32>, vector<8x128xf32> -> vector<8x128xf32>
    %1119 = arith.addf %1118, %1117 : vector<8x128xf32>
    %1120 = arith.negf %1119 : vector<8x128xf32>
    %1121 = math.exp %1120 : vector<8x128xf32>
    %cst_121 = arith.constant 1.000000e+00 : f32
    %1122 = vector.broadcast %cst_121 : f32 to vector<8x128xf32>
    %1123 = arith.addf %1122, %1121 : vector<8x128xf32>
    %1124 = arith.divf %1122, %1123 : vector<8x128xf32>
    %1125 = math.tanh %1119 : vector<8x128xf32>
    %1126 = vector.extract_strided_slice %1124 {offsets = [0, 32], sizes = [8, 32], strides = [1, 1]} : vector<8x128xf32> to vector<8x32xf32>
    %1127 = arith.mulf %1126, %1113 : vector<8x32xf32>
    %1128 = vector.extract_strided_slice %1124 {offsets = [0, 0], sizes = [8, 32], strides = [1, 1]} : vector<8x128xf32> to vector<8x32xf32>
    %1129 = vector.extract_strided_slice %1125 {offsets = [0, 64], sizes = [8, 32], strides = [1, 1]} : vector<8x128xf32> to vector<8x32xf32>
    %1130 = arith.mulf %1128, %1129 : vector<8x32xf32>
    %1131 = arith.addf %1127, %1130 : vector<8x32xf32>
    %1132 = vector.extract_strided_slice %1124 {offsets = [0, 96], sizes = [8, 32], strides = [1, 1]} : vector<8x128xf32> to vector<8x32xf32>
    %1133 = math.tanh %1131 : vector<8x32xf32>
    %1134 = arith.mulf %1132, %1133 : vector<8x32xf32>
    %1135 = vector.extract_strided_slice %1046 {offsets = [32, 0], sizes = [8, 128], strides = [1, 1]} : vector<56x128xf32> to vector<8x128xf32>
    %cst_122 = arith.constant dense<0.000000e+00> : vector<8x128xf32>
    %1136 = tpu.matmul %1134, %5, %cst_122 {dimension_numbers = #tpu.dot_dimension_numbers<[1], [0], [0], [1], [0, 0, 1, 1], [], []>} : vector<8x32xf32>, vector<32x128xf32>, vector<8x128xf32> -> vector<8x128xf32>
    %1137 = arith.addf %1136, %1135 : vector<8x128xf32>
    %1138 = arith.negf %1137 : vector<8x128xf32>
    %1139 = math.exp %1138 : vector<8x128xf32>
    %cst_123 = arith.constant 1.000000e+00 : f32
    %1140 = vector.broadcast %cst_123 : f32 to vector<8x128xf32>
    %1141 = arith.addf %1140, %1139 : vector<8x128xf32>
    %1142 = arith.divf %1140, %1141 : vector<8x128xf32>
    %1143 = math.tanh %1137 : vector<8x128xf32>
    %1144 = vector.extract_strided_slice %1142 {offsets = [0, 32], sizes = [8, 32], strides = [1, 1]} : vector<8x128xf32> to vector<8x32xf32>
    %1145 = arith.mulf %1144, %1131 : vector<8x32xf32>
    %1146 = vector.extract_strided_slice %1142 {offsets = [0, 0], sizes = [8, 32], strides = [1, 1]} : vector<8x128xf32> to vector<8x32xf32>
    %1147 = vector.extract_strided_slice %1143 {offsets = [0, 64], sizes = [8, 32], strides = [1, 1]} : vector<8x128xf32> to vector<8x32xf32>
    %1148 = arith.mulf %1146, %1147 : vector<8x32xf32>
    %1149 = arith.addf %1145, %1148 : vector<8x32xf32>
    %1150 = vector.extract_strided_slice %1142 {offsets = [0, 96], sizes = [8, 32], strides = [1, 1]} : vector<8x128xf32> to vector<8x32xf32>
    %1151 = math.tanh %1149 : vector<8x32xf32>
    %1152 = arith.mulf %1150, %1151 : vector<8x32xf32>
    %1153 = vector.extract_strided_slice %1046 {offsets = [40, 0], sizes = [8, 128], strides = [1, 1]} : vector<56x128xf32> to vector<8x128xf32>
    %cst_124 = arith.constant dense<0.000000e+00> : vector<8x128xf32>
    %1154 = tpu.matmul %1152, %5, %cst_124 {dimension_numbers = #tpu.dot_dimension_numbers<[1], [0], [0], [1], [0, 0, 1, 1], [], []>} : vector<8x32xf32>, vector<32x128xf32>, vector<8x128xf32> -> vector<8x128xf32>
    %1155 = arith.addf %1154, %1153 : vector<8x128xf32>
    %1156 = arith.negf %1155 : vector<8x128xf32>
    %1157 = math.exp %1156 : vector<8x128xf32>
    %cst_125 = arith.constant 1.000000e+00 : f32
    %1158 = vector.broadcast %cst_125 : f32 to vector<8x128xf32>
    %1159 = arith.addf %1158, %1157 : vector<8x128xf32>
    %1160 = arith.divf %1158, %1159 : vector<8x128xf32>
    %1161 = math.tanh %1155 : vector<8x128xf32>
    %1162 = vector.extract_strided_slice %1160 {offsets = [0, 32], sizes = [8, 32], strides = [1, 1]} : vector<8x128xf32> to vector<8x32xf32>
    %1163 = arith.mulf %1162, %1149 : vector<8x32xf32>
    %1164 = vector.extract_strided_slice %1160 {offsets = [0, 0], sizes = [8, 32], strides = [1, 1]} : vector<8x128xf32> to vector<8x32xf32>
    %1165 = vector.extract_strided_slice %1161 {offsets = [0, 64], sizes = [8, 32], strides = [1, 1]} : vector<8x128xf32> to vector<8x32xf32>
    %1166 = arith.mulf %1164, %1165 : vector<8x32xf32>
    %1167 = arith.addf %1163, %1166 : vector<8x32xf32>
    %1168 = vector.extract_strided_slice %1160 {offsets = [0, 96], sizes = [8, 32], strides = [1, 1]} : vector<8x128xf32> to vector<8x32xf32>
    %1169 = math.tanh %1167 : vector<8x32xf32>
    %1170 = arith.mulf %1168, %1169 : vector<8x32xf32>
    %1171 = vector.extract_strided_slice %1046 {offsets = [48, 0], sizes = [8, 128], strides = [1, 1]} : vector<56x128xf32> to vector<8x128xf32>
    %cst_126 = arith.constant dense<0.000000e+00> : vector<8x128xf32>
    %1172 = tpu.matmul %1170, %5, %cst_126 {dimension_numbers = #tpu.dot_dimension_numbers<[1], [0], [0], [1], [0, 0, 1, 1], [], []>} : vector<8x32xf32>, vector<32x128xf32>, vector<8x128xf32> -> vector<8x128xf32>
    %1173 = arith.addf %1172, %1171 : vector<8x128xf32>
    %1174 = arith.negf %1173 : vector<8x128xf32>
    %1175 = math.exp %1174 : vector<8x128xf32>
    %cst_127 = arith.constant 1.000000e+00 : f32
    %1176 = vector.broadcast %cst_127 : f32 to vector<8x128xf32>
    %1177 = arith.addf %1176, %1175 : vector<8x128xf32>
    %1178 = arith.divf %1176, %1177 : vector<8x128xf32>
    %1179 = math.tanh %1173 : vector<8x128xf32>
    %1180 = vector.extract_strided_slice %1178 {offsets = [0, 32], sizes = [8, 32], strides = [1, 1]} : vector<8x128xf32> to vector<8x32xf32>
    %1181 = arith.mulf %1180, %1167 : vector<8x32xf32>
    %1182 = vector.extract_strided_slice %1178 {offsets = [0, 0], sizes = [8, 32], strides = [1, 1]} : vector<8x128xf32> to vector<8x32xf32>
    %1183 = vector.extract_strided_slice %1179 {offsets = [0, 64], sizes = [8, 32], strides = [1, 1]} : vector<8x128xf32> to vector<8x32xf32>
    %1184 = arith.mulf %1182, %1183 : vector<8x32xf32>
    %1185 = arith.addf %1181, %1184 : vector<8x32xf32>
    %1186 = vector.extract_strided_slice %1178 {offsets = [0, 96], sizes = [8, 32], strides = [1, 1]} : vector<8x128xf32> to vector<8x32xf32>
    %1187 = math.tanh %1185 : vector<8x32xf32>
    %1188 = arith.mulf %1186, %1187 : vector<8x32xf32>
    %1189 = tpu.concatenate %1062, %1080, %1098, %1116, %1134, %1152, %1170, %1188 in 0 : vector<8x32xf32>, vector<8x32xf32>, vector<8x32xf32>, vector<8x32xf32>, vector<8x32xf32>, vector<8x32xf32>, vector<8x32xf32>, vector<8x32xf32> -> vector<64x32xf32>
    %c0_128 = arith.constant 0 : index
    %c0_129 = arith.constant 0 : index
    %1190 = vector.load %arg6[%c0_128, %c0_129] : memref<32x64xf32, #tpu.memory_space<vmem>>, vector<32x64xf32>
    %c0_130 = arith.constant 0 : index
    %c0_131 = arith.constant 0 : index
    %1191 = vector.load %arg7[%c0_130, %c0_131] : memref<64x16xf32, #tpu.memory_space<vmem>>, vector<64x16xf32>
    %c1 = arith.constant 1 : index
    %c0_132 = arith.constant 0 : index
    %1192 = vector.load %arg5[%c1, %c0_132] : memref<8x128xf32, #tpu.memory_space<vmem>>, vector<1x64xf32>
    %c2 = arith.constant 2 : index
    %c0_133 = arith.constant 0 : index
    %1193 = vector.load %arg5[%c2, %c0_133] : memref<8x128xf32, #tpu.memory_space<vmem>>, vector<1x16xf32>
    %cst_134 = arith.constant dense<0.000000e+00> : vector<64x64xf32>
    %1194 = tpu.matmul %1189, %1190, %cst_134 {dimension_numbers = #tpu.dot_dimension_numbers<[1], [0], [0], [1], [0, 0, 1, 1], [], []>} : vector<64x32xf32>, vector<32x64xf32>, vector<64x64xf32> -> vector<64x64xf32>
    %1195 = vector.broadcast %1192 : vector<1x64xf32> to vector<64x64xf32>
    %1196 = arith.addf %1194, %1195 : vector<64x64xf32>
    %cst_135 = arith.constant 0.000000e+00 : f32
    %1197 = vector.broadcast %cst_135 : f32 to vector<64x64xf32>
    %1198 = arith.maximumf %1196, %1197 : vector<64x64xf32>
    %cst_136 = arith.constant dense<0.000000e+00> : vector<64x16xf32>
    %1199 = tpu.matmul %1198, %1191, %cst_136 {dimension_numbers = #tpu.dot_dimension_numbers<[1], [0], [0], [1], [0, 0, 1, 1], [], []>} : vector<64x64xf32>, vector<64x16xf32>, vector<64x16xf32> -> vector<64x16xf32>
    %1200 = vector.broadcast %1193 : vector<1x16xf32> to vector<64x16xf32>
    %1201 = arith.addf %1199, %1200 : vector<64x16xf32>
    %cst_137 = arith.constant dense<0xFF800000> : vector<64xf32>
    %1202 = vector.multi_reduction <maximumf>, %1201, %cst_137 [1] : vector<64x16xf32> to vector<64xf32>
    %1203 = vector.shape_cast %1202 : vector<64xf32> to vector<64x1xf32>
    %1204 = vector.broadcast %1203 : vector<64x1xf32> to vector<64x16xf32>
    %1205 = arith.subf %1201, %1204 : vector<64x16xf32>
    %1206 = math.exp %1205 : vector<64x16xf32>
    %cst_138 = arith.constant dense<0.000000e+00> : vector<64xf32>
    %1207 = vector.multi_reduction <add>, %1206, %cst_138 [1] : vector<64x16xf32> to vector<64xf32>
    %1208 = vector.shape_cast %1207 : vector<64xf32> to vector<64x1xf32>
    %1209 = math.log %1208 : vector<64x1xf32>
    %c0_139 = arith.constant 0 : index
    %c0_140 = arith.constant 0 : index
    %1210 = vector.load %arg2[%c0_139, %c0_140] : memref<8x8xi32, #tpu.memory_space<vmem>>, vector<8x8xi32>
    %1211 = tpu.iota {dimensions = array<i32: 1>} : vector<8x16xi32>
    %1212 = vector.extract_strided_slice %1210 {offsets = [0, 0], sizes = [8, 1], strides = [1, 1]} : vector<8x8xi32> to vector<8x1xi32>
    %1213 = vector.broadcast %1212 : vector<8x1xi32> to vector<8x16xi32>
    %1214 = arith.cmpi eq, %1213, %1211 : vector<8x16xi32>
    %1215 = arith.extui %1214 : vector<8x16xi1> to vector<8x16xi32>
    %1216 = arith.sitofp %1215 : vector<8x16xi32> to vector<8x16xf32>
    %1217 = vector.extract_strided_slice %1210 {offsets = [0, 1], sizes = [8, 1], strides = [1, 1]} : vector<8x8xi32> to vector<8x1xi32>
    %1218 = vector.broadcast %1217 : vector<8x1xi32> to vector<8x16xi32>
    %1219 = arith.cmpi eq, %1218, %1211 : vector<8x16xi32>
    %1220 = arith.extui %1219 : vector<8x16xi1> to vector<8x16xi32>
    %1221 = arith.sitofp %1220 : vector<8x16xi32> to vector<8x16xf32>
    %1222 = vector.extract_strided_slice %1210 {offsets = [0, 2], sizes = [8, 1], strides = [1, 1]} : vector<8x8xi32> to vector<8x1xi32>
    %1223 = vector.broadcast %1222 : vector<8x1xi32> to vector<8x16xi32>
    %1224 = arith.cmpi eq, %1223, %1211 : vector<8x16xi32>
    %1225 = arith.extui %1224 : vector<8x16xi1> to vector<8x16xi32>
    %1226 = arith.sitofp %1225 : vector<8x16xi32> to vector<8x16xf32>
    %1227 = vector.extract_strided_slice %1210 {offsets = [0, 3], sizes = [8, 1], strides = [1, 1]} : vector<8x8xi32> to vector<8x1xi32>
    %1228 = vector.broadcast %1227 : vector<8x1xi32> to vector<8x16xi32>
    %1229 = arith.cmpi eq, %1228, %1211 : vector<8x16xi32>
    %1230 = arith.extui %1229 : vector<8x16xi1> to vector<8x16xi32>
    %1231 = arith.sitofp %1230 : vector<8x16xi32> to vector<8x16xf32>
    %1232 = vector.extract_strided_slice %1210 {offsets = [0, 4], sizes = [8, 1], strides = [1, 1]} : vector<8x8xi32> to vector<8x1xi32>
    %1233 = vector.broadcast %1232 : vector<8x1xi32> to vector<8x16xi32>
    %1234 = arith.cmpi eq, %1233, %1211 : vector<8x16xi32>
    %1235 = arith.extui %1234 : vector<8x16xi1> to vector<8x16xi32>
    %1236 = arith.sitofp %1235 : vector<8x16xi32> to vector<8x16xf32>
    %1237 = vector.extract_strided_slice %1210 {offsets = [0, 5], sizes = [8, 1], strides = [1, 1]} : vector<8x8xi32> to vector<8x1xi32>
    %1238 = vector.broadcast %1237 : vector<8x1xi32> to vector<8x16xi32>
    %1239 = arith.cmpi eq, %1238, %1211 : vector<8x16xi32>
    %1240 = arith.extui %1239 : vector<8x16xi1> to vector<8x16xi32>
    %1241 = arith.sitofp %1240 : vector<8x16xi32> to vector<8x16xf32>
    %1242 = vector.extract_strided_slice %1210 {offsets = [0, 6], sizes = [8, 1], strides = [1, 1]} : vector<8x8xi32> to vector<8x1xi32>
    %1243 = vector.broadcast %1242 : vector<8x1xi32> to vector<8x16xi32>
    %1244 = arith.cmpi eq, %1243, %1211 : vector<8x16xi32>
    %1245 = arith.extui %1244 : vector<8x16xi1> to vector<8x16xi32>
    %1246 = arith.sitofp %1245 : vector<8x16xi32> to vector<8x16xf32>
    %1247 = vector.extract_strided_slice %1210 {offsets = [0, 7], sizes = [8, 1], strides = [1, 1]} : vector<8x8xi32> to vector<8x1xi32>
    %1248 = vector.broadcast %1247 : vector<8x1xi32> to vector<8x16xi32>
    %1249 = arith.cmpi eq, %1248, %1211 : vector<8x16xi32>
    %1250 = arith.extui %1249 : vector<8x16xi1> to vector<8x16xi32>
    %1251 = arith.sitofp %1250 : vector<8x16xi32> to vector<8x16xf32>
    %1252 = tpu.concatenate %1216, %1221, %1226, %1231, %1236, %1241, %1246, %1251 in 0 : vector<8x16xf32>, vector<8x16xf32>, vector<8x16xf32>, vector<8x16xf32>, vector<8x16xf32>, vector<8x16xf32>, vector<8x16xf32>, vector<8x16xf32> -> vector<64x16xf32>
    %1253 = arith.mulf %1201, %1252 : vector<64x16xf32>
    %cst_141 = arith.constant dense<0.000000e+00> : vector<64xf32>
    %1254 = vector.multi_reduction <add>, %1253, %cst_141 [1] : vector<64x16xf32> to vector<64xf32>
    %1255 = vector.shape_cast %1254 : vector<64xf32> to vector<64x1xf32>
    %1256 = arith.subf %1255, %1203 : vector<64x1xf32>
    %1257 = arith.subf %1256, %1209 : vector<64x1xf32>
    %1258 = vector.extract_strided_slice %1257 {offsets = [0, 0], sizes = [8, 1], strides = [1, 1]} : vector<64x1xf32> to vector<8x1xf32>
    %1259 = vector.extract_strided_slice %1257 {offsets = [8, 0], sizes = [8, 1], strides = [1, 1]} : vector<64x1xf32> to vector<8x1xf32>
    %1260 = arith.addf %1258, %1259 : vector<8x1xf32>
    %1261 = vector.extract_strided_slice %1257 {offsets = [16, 0], sizes = [8, 1], strides = [1, 1]} : vector<64x1xf32> to vector<8x1xf32>
    %1262 = arith.addf %1260, %1261 : vector<8x1xf32>
    %1263 = vector.extract_strided_slice %1257 {offsets = [24, 0], sizes = [8, 1], strides = [1, 1]} : vector<64x1xf32> to vector<8x1xf32>
    %1264 = arith.addf %1262, %1263 : vector<8x1xf32>
    %1265 = vector.extract_strided_slice %1257 {offsets = [32, 0], sizes = [8, 1], strides = [1, 1]} : vector<64x1xf32> to vector<8x1xf32>
    %1266 = arith.addf %1264, %1265 : vector<8x1xf32>
    %1267 = vector.extract_strided_slice %1257 {offsets = [40, 0], sizes = [8, 1], strides = [1, 1]} : vector<64x1xf32> to vector<8x1xf32>
    %1268 = arith.addf %1266, %1267 : vector<8x1xf32>
    %1269 = vector.extract_strided_slice %1257 {offsets = [48, 0], sizes = [8, 1], strides = [1, 1]} : vector<64x1xf32> to vector<8x1xf32>
    %1270 = arith.addf %1268, %1269 : vector<8x1xf32>
    %1271 = vector.extract_strided_slice %1257 {offsets = [56, 0], sizes = [8, 1], strides = [1, 1]} : vector<64x1xf32> to vector<8x1xf32>
    %1272 = arith.addf %1270, %1271 : vector<8x1xf32>
    %1273 = vector.shape_cast %1272 : vector<8x1xf32> to vector<8x1xf32>
    %1274 = vector.broadcast %1273 : vector<8x1xf32> to vector<8x128xf32>
    %c0_142 = arith.constant 0 : index
    %c0_143 = arith.constant 0 : index
    %1275 = vector.load %arg8[%c0_142, %c0_143] : memref<8x128xf32, #tpu.memory_space<vmem>>, vector<8x128xf32>
    tpu.vector_store %arg8[%c0_142, %c0_143], %1274 {strides = array<i32>} : memref<8x128xf32, #tpu.memory_space<vmem>>, vector<8x128xf32>,
    return
  }
  func.func @transform_0(%arg0: i32) -> (i32, i32) {
    %c0_i32 = arith.constant 0 : i32
    %c0_i32_0 = arith.constant 0 : i32
    return %arg0, %c0_i32 : i32, i32
  }
  func.func @transform_1(%arg0: i32) -> (i32, i32) {
    %c0_i32 = arith.constant 0 : i32
    %c0_i32_0 = arith.constant 0 : i32
    return %arg0, %c0_i32 : i32, i32
  }
  func.func @transform_2(%arg0: i32) -> (i32, i32) {
    %c0_i32 = arith.constant 0 : i32
    %c0_i32_0 = arith.constant 0 : i32
    %c0_i32_1 = arith.constant 0 : i32
    return %c0_i32, %c0_i32_0 : i32, i32
  }
  func.func @transform_3(%arg0: i32) -> (i32, i32) {
    %c0_i32 = arith.constant 0 : i32
    %c0_i32_0 = arith.constant 0 : i32
    %c0_i32_1 = arith.constant 0 : i32
    return %c0_i32, %c0_i32_0 : i32, i32
  }
  func.func @transform_4(%arg0: i32) -> (i32, i32) {
    %c0_i32 = arith.constant 0 : i32
    %c0_i32_0 = arith.constant 0 : i32
    %c0_i32_1 = arith.constant 0 : i32
    return %c0_i32, %c0_i32_0 : i32, i32
  }
  func.func @transform_5(%arg0: i32) -> (i32, i32) {
    %c0_i32 = arith.constant 0 : i32
    %c0_i32_0 = arith.constant 0 : i32
    %c0_i32_1 = arith.constant 0 : i32
    return %c0_i32, %c0_i32_0 : i32, i32
  }
  func.func @transform_6(%arg0: i32) -> (i32, i32) {
    %c0_i32 = arith.constant 0 : i32
    %c0_i32_0 = arith.constant 0 : i32
    %c0_i32_1 = arith.constant 0 : i32
    return %c0_i32, %c0_i32_0 : i32, i32
  }
  func.func @transform_7(%arg0: i32) -> (i32, i32) {
    %c0_i32 = arith.constant 0 : i32
    %c0_i32_0 = arith.constant 0 : i32
    return %arg0, %c0_i32 : i32, i32
  }
}

</mosaic_0001>

<bundles_post_ra>
// kernel: tpu_custom_call.1
= control target key start
LH: loop header
LB: loop body
LE: loop exit
PB: predicated region body
PF: predicated region fallthrough
CT: control target
= control target key end

     0   :  { %12 = vsyncpa [#allocation3], 0  ;;  %s3239_s0 = inlined_call_operand.vmem [shape: f32[8,256], index: 0, kind: input, shape index: {}]   ;;  %s3240_s1 = inlined_call_operand.hbm [shape: s32[8,8], index: 1, kind: input, shape index: {}]   ;;  %s3241_s2 = inlined_call_operand.hbm [shape: f32[16,32], index: 2, kind: input, shape index: {}]   ;;  %s3242_s3 = inlined_call_operand.vmem [shape: f32[32,256], index: 3, kind: input, shape index: {}]   ;;  %s3243_s4 = inlined_call_operand.hbm [shape: f32[8,128], index: 4, kind: input, shape index: {}]   ;;  %s3244_s5 = inlined_call_operand.hbm [shape: f32[32,64], index: 5, kind: input, shape index: {}]   ;;  %s3245_s6 = inlined_call_operand.vmem [shape: f32[64,16], index: 6, kind: input, shape index: {}]   ;;  %s3246_s7 = inlined_call_operand.hbm [shape: f32[8,128], index: 7, kind: output, shape index: {}]  }
   0x1   :  { %13 = vsyncpa [#allocation6], 0 }
   0x2   :  { %14 = vsyncpa [#allocation9], 0  ;;  %s33_s26 = sshll.u32 %s3241_s2, 4  ;;  %s34_s26 = int_to_ptr.hbm [resolvable:$true] %s33_s26 }
   0x3   :  { %15 = vsyncpa [#allocation4], 0  ;;  %s2416_s27 = smov [#allocation5]   ;;  %s23_s8 = sshll.u32 %s3240_s1, 4  ;;  %s24_s8 = int_to_ptr.hbm [resolvable:$true] %s23_s8 }
   0x4   :  { %s35_s28 = sshll.u32 %s2416_s27, 4  ;;  %s2417_s9 = smov 128   ;;  %s36_s28 = int_to_ptr.vmem [resolvable:$true] %s35_s28 }
   0x5   :  { %s2418_s10 = smov 8   ;;  %s2419_s11 = smov [#allocation2]  }
   0x6   :  { %41 = dma.hbm_to_vmem [thread:$0]  %s34_s26, 256, %s36_s28, [#allocation6], %s2417_s9, %s2417_s9, %s2418_s10  }
   0x7   :  { %s25_s12 = sshll.u32 %s2419_s11, 4  ;;  %s49_s15 = sshll.u32 %s3243_s4, 4  ;;  %s26_s12 = int_to_ptr.vmem [resolvable:$true] %s25_s12  ;;  %s50_s15 = int_to_ptr.hbm [resolvable:$true] %s49_s15 }
   0x8   :  { %28 = dma.hbm_to_vmem [thread:$0]  %s24_s8, 128, %s26_s12, [#allocation3]  }
   0x9   :  { %s59_s17 = sshll.u32 %s3244_s5, 4  ;;  %s2420_s18 = smov [#allocation7]   ;;  %s60_s17 = int_to_ptr.hbm [resolvable:$true] %s59_s17 }
   0xa   :  { %s51_s19 = sshll.u32 %s2420_s18, 4  ;;  %s2421_s1 = smov [#allocation8]   ;;  %s52_s19 = int_to_ptr.vmem [resolvable:$true] %s51_s19 }
   0xb   :  { %54 = dma.hbm_to_vmem [thread:$0]  %s50_s15, 128, %s52_s19, [#allocation6]  }
   0xc   :  { %s61_s20 = sshll.u32 %s2421_s1, 4  ;;  %s62_s20 = int_to_ptr.vmem [resolvable:$true] %s61_s20 }
   0xd   :  { %67 = dma.hbm_to_vmem [thread:$0]  %s60_s17, 512, %s62_s20, [#allocation9], %s2417_s9, %s2417_s9, %s2418_s10  }
   0xe   :  { %2408 = dma.done.wait [#allocation3], 128  }
   0xf   :  { %2409 = vsyncadd [#allocation3], 4294967168 }
  0x10   :  { %2410 = dma.done.wait [#allocation6], 384  }
  0x11   :  { %2411 = vsyncadd [#allocation6], 4294966912 }
  0x12   :  { %2412 = dma.done.wait [#allocation9], 512  }
  0x13   :  { %2413 = vsyncadd [#allocation9], 4294966784  ;;  %v97_v0 = vld [vmem:[%s3242_s3 + $0x30] sm:$0xff]  ;;  %v95_v1 = vld [vmem:[%s3242_s3 + $0x20] sm:$0xff]  ;;  %vm877_vm0 = vcmask 261120   ;;  %v2422_v6 = vmov 0  }
  0x14   :  { %951 = vmatpush.msra.mxu2 %v97_v0  ;;  %911 = vmatpush.msra.mxu0 %v97_v0  ;;  %v93_v2 = vld [vmem:[%s3242_s3 + $0x10] sm:$0xff]  ;;  %v91_v3 = vld [vmem:[%s3242_s3] sm:$0xff]  ;;  %v2423_v7 = vmov 0.0   ;;  %v2529_v16 = vld [vmem:[#allocation7] ss:$0 sm:$0xff]  ;;  %s2424_s29 = smov 64  }
  0x15   :  { %v2502_v4 = vld [vmem:[%s3239_s0] sm:$0xff]  ;;  %1868 = vset.pattern.permute.xlu1 %v2422_v6  ;;  %1890 = vset.pattern.permute.xlu0 %v2422_v6  ;;  %s2425_s30 = smov 32   ;;  %s2426_s8 = smov 96   ;;  %v89_v53 = vld [vmem:[#allocation5] sm:$0xff] }
  0x16   :  { %952 = vmatpush.msra.mxu2 %v95_v1  ;;  %912 = vmatpush.msra.mxu0 %v95_v1  ;;  %v2506_v5 = vld [vmem:[#allocation2] sm:$0xff]  ;;  %v2573_v54 = vperm.slane %v89_v53, 0  ;;  %v2575_v55 = vperm.slane %v89_v53, 1  ;;  %v2579_v61 = vperm.slane %v89_v53, 2  ;;  %v2581_v1 = vperm.slane %v89_v53, 3  ;;  %s1766_s11 = sshll.u32 %s3246_s7, 4  ;;  %s1767_s11 = int_to_ptr.hbm [resolvable:$true] %s1766_s11 }
  0x17   :  { %vm100_vm1 = vcmp.eq.s32.totalorder %v2506_v5, 0  ;;  %vm111_vm2 = vcmp.eq.s32.totalorder %v2506_v5, 1  ;;  %1879 = vset.pattern.permute.xlu2 %v2422_v6  ;;  %vm122_vm3 = vcmp.eq.s32.totalorder %v2506_v5, 2  ;;  %vm133_vm4 = vcmp.eq.s32.totalorder %v2506_v5, 3 }
  0x18   :  { %953 = vmatpush.msra.mxu2 %v93_v2  ;;  %913 = vmatpush.msra.mxu0 %v93_v2  ;;  %v1778_v8 = vsel %vm100_vm1, 1.0, %v2423_v7  ;;  %v1779_v9 = vsel %vm111_vm2, 1.0, %v2423_v7  ;;  %v1780_v11 = vsel %vm122_vm3, 1.0, %v2423_v7  ;;  %v1781_v12 = vsel %vm133_vm4, 1.0, %v2423_v7 }
  0x19   :  { %v2515_v10 = vpack.i.bf16 %v1779_v9, %v1778_v8  ;;  %v2522_v13 = vpack.i.bf16 %v1781_v12, %v1780_v11  ;;  %vm210_vm5 = vcmp.eq.s32.totalorder %v2506_v5, 10  ;;  %vm221_vm6 = vcmp.eq.s32.totalorder %v2506_v5, 11 }
  0x1a   :  { %954 = vmatpush.msra.mxu2 %v91_v3  ;;  %914 = vmatpush.msra.mxu0 %v91_v3  ;;  %v1788_v14 = vsel %vm210_vm5, 1.0, %v2423_v7  ;;  %v1789_v15 = vsel %vm221_vm6, 1.0, %v2423_v7  ;;  %vm254_vm7 = vcmp.eq.s32.totalorder %v2506_v5, 14  ;;  %vm265_vm8 = vcmp.eq.s32.totalorder %v2506_v5, 15 }
  0x1b   :  { %1801 = vmatmul.msk.f32.vlgmr.msra.gmra.mxu2 %vm877_vm0, %v2502_v4  ;;  %1870 = vperm.xlu1 %1868, %v2515_v10   ;;  %v2531_v17 = vpack.i.bf16 %v1789_v15, %v1788_v14  ;;  %v1792_v20 = vsel %vm254_vm7, 1.0, %v2423_v7  ;;  %v1793_v21 = vsel %vm265_vm8, 1.0, %v2423_v7  ;;  %vm144_vm9 = vcmp.eq.s32.totalorder %v2506_v5, 4 }
  0x1c   :  { %v2539_v22 = vpack.i.bf16 %v1793_v21, %v1792_v20  ;;  %vm155_vm10 = vcmp.eq.s32.totalorder %v2506_v5, 5  ;;  %v1782_v30 = vsel %vm144_vm9, 1.0, %v2423_v7  ;;  %vm166_vm11 = vcmp.eq.s32.totalorder %v2506_v5, 6 }
  0x1d   :  { %v1783_v31 = vsel %vm155_vm10, 1.0, %v2423_v7  ;;  %vm177_vm12 = vcmp.eq.s32.totalorder %v2506_v5, 7  ;;  %v1784_v34 = vsel %vm166_vm11, 1.0, %v2423_v7  ;;  %vm232_vm1 = vcmp.eq.s32.totalorder %v2506_v5, 12 }
  0x1e   :  { %v2547_v32 = vpack.i.bf16 %v1783_v31, %v1782_v30  ;;  %v1785_v35 = vsel %vm177_vm12, 1.0, %v2423_v7  ;;  %vm243_vm2 = vcmp.eq.s32.totalorder %v2506_v5, 13  ;;  %v1790_v42 = vsel %vm232_vm1, 1.0, %v2423_v7 }
  0x1f   :  { %v2554_v38 = vpack.i.bf16 %v1785_v35, %v1784_v34  ;;  %v1791_v43 = vsel %vm243_vm2, 1.0, %v2423_v7  ;;  %vm188_vm4 = vcmp.eq.s32.totalorder %v2506_v5, 8  ;;  %vm199_vm5 = vcmp.eq.s32.totalorder %v2506_v5, 9  ;;  %v2611_v34 = vld [vmem:[%s3242_s3 + $0x18] sm:$0xff]  ;;  %v2621_v35 = vld [vmem:[%s3242_s3 + $0x8] sm:$0xff] }
  0x20   :  { %1881 = vperm.xlu2 %1879, %v2547_v32   ;;  %v2561_v47 = vpack.i.bf16 %v1791_v43, %v1790_v42  ;;  %v1786_v49 = vsel %vm188_vm4, 1.0, %v2423_v7  ;;  %v1787_v50 = vsel %vm199_vm5, 1.0, %v2423_v7  ;;  %v2585_v9 = vperm.slane %v89_v53, 4 }
  0x21   :  { %v2570_v51 = vpack.i.bf16 %v1787_v50, %v1786_v49  ;;  %v2587_v14 = vperm.slane %v89_v53, 5 }
  0x23   :  { %1875 = vperm.xlu1 %1868, %v2522_v13  }
  0x28   :  { %1886 = vperm.xlu2 %1879, %v2554_v38  }
  0x2b   :  { %1897 = vperm.xlu1 %1868, %v2531_v17  }
  0x30   :  { %1902 = vperm.xlu2 %1879, %v2561_v47  }
  0x33   :  { %1907 = vperm.xlu1 %1868, %v2539_v22  }
  0x7a   :  { %v1882_v63 = vpop.permute.xlu2 %1881 }
  0x7b   :  { %v1883_v11 = vunpack.i.l.bf16 %v1882_v63  ;;  %v1884_v15 = vunpack.i.h.bf16 %v1882_v63 }
  0x7d   :  { %v164_v20 = vmul.f32 %v1884_v15, %v2587_v14 }
  0x8d   :  { %v1871_v52 = vpop.permute.xlu1 %1870 }
  0x8e   :  { %v1873_v56 = vunpack.i.h.bf16 %v1871_v52  ;;  %v1872_v57 = vunpack.i.l.bf16 %v1871_v52 }
  0x90   :  { %v120_v59 = vmul.f32 %v1873_v56, %v2575_v55  ;;  %v109_v60 = vmul.f32 %v1872_v57, %v2573_v54 }
  0x92   :  { %v121_v0 = vadd.f32 %v120_v59, %v109_v60 }
  0x95   :  { %v1876_v58 = vpop.permute.xlu1 %1875 }
  0x96   :  { %v1877_v62 = vunpack.i.l.bf16 %v1876_v58  ;;  %v1878_v2 = vunpack.i.h.bf16 %v1876_v58 }
  0x98   :  { %v131_v3 = vmul.f32 %v1877_v62, %v2579_v61  ;;  %v142_v5 = vmul.f32 %v1878_v2, %v2581_v1 }
  0x9a   :  { %v132_v8 = vadd.f32 %v131_v3, %v121_v0 }
  0x9c   :  { %v143_v12 = vadd.f32 %v142_v5, %v132_v8 }
  0x9e   :  { %v956_v18 = vpop.f32.mrf.mxu2 }
  0x9f   :  { %v957_v19 = vadd.f32 %v2529_v16, %v956_v18  ;;  %v153_v18 = vmul.f32 %v1883_v11, %v2585_v9 }
  0xa1   :  { %2189 = vtanh.f32 %v957_v19  ;;  %v1802_v24 = vmul.f32 -1.442695, %v957_v19  ;;  %v1887_v19 = vpop.permute.xlu2 %1886  ;;  %v154_v21 = vadd.f32 %v153_v18, %v143_v12 }
  0xa2   :  { %v1889_v31 = vunpack.i.h.bf16 %v1887_v19 }
  0xa3   :  { %2191 = vpow2.f32 %v1802_v24  ;;  %v1888_v24 = vunpack.i.l.bf16 %v1887_v19  ;;  %v165_v30 = vadd.f32 %v164_v20, %v154_v21 }
  0xa7   :  { %v2190_v23 = vpop.eup %2189 }
  0xa8   :  { %980 = vrot.lane.b32.xlu0 %v2190_v23, %s2424_s29  ;;  %v2591_v23 = vperm.slane %v89_v53, 6 }
  0xa9   :  { %v2192_v25 = vpop.eup %2191  ;;  %v1903_v50 = vpop.permute.xlu2 %1902 }
  0xaa   :  { %v962_v26 = vadd.f32 1.0, %v2192_v25  ;;  %v2596_v25 = vld [vmem:[%s3242_s3 + $0x38] sm:$0xff]  ;;  %v1904_v62 = vunpack.i.l.bf16 %v1903_v50  ;;  %v1905_v3 = vunpack.i.h.bf16 %v1903_v50  ;;  %v2431_v50 = vmov 5  }
  0xab   :  { %1007 = vmatpush.msrb.mxu2 %v2596_v25  ;;  %1073 = vmatpush.msrb.mxu0 %v2596_v25 }
  0xac   :  { %2193 = vrcp.f32 %v962_v26  ;;  %v974_v37 = vand.u32 2147483648, %v962_v26  ;;  %vm968_vm14 = vweird.f32 %v962_v26  ;;  %v972_v39 = vand.u32 2147483647, %v962_v26  ;;  %1135 = vmatpush.msra.mxu1 %v2596_v25  ;;  %1259 = vmatpush.msra.mxu3 %v2596_v25 }
  0xae   :  { %v975_v41 = vor.u32 1.1754944e-38, %v974_v37  ;;  %vm973_vm3 = vcmp.eq.f32.partialorder %v972_v39, 8.507059e+37 }
  0xb2   :  { %v2194_v27 = vpop.eup %2193 }
  0xb3   :  { %v964_v28 = vmul.f32 %v2194_v27, %v962_v26  ;;  %vm969_vm13 = vweird.f32 %v2194_v27  ;;  %v2601_v26 = vld [vmem:[%s3242_s3 + $0x28] sm:$0xff] }
  0xb4   :  { %vm970_vm15 = vmor %vm968_vm14, %vm969_vm13  ;;  %1008 = vmatpush.msrb.mxu2 %v2601_v26  ;;  %1074 = vmatpush.msrb.mxu0 %v2601_v26 }
  0xb5   :  { %v965_v29 = vsub.f32 1.0, %v964_v28  ;;  %v2603_v28 = vperm.slane %v89_v53, 7  ;;  %1136 = vmatpush.msra.mxu1 %v2601_v26  ;;  %1260 = vmatpush.msra.mxu3 %v2601_v26 }
  0xb6   :  { %1009 = vmatpush.msrb.mxu2 %v2611_v34  ;;  %1075 = vmatpush.msrb.mxu0 %v2611_v34 }
  0xb7   :  { %v966_v33 = vmul.f32 %v2194_v27, %v965_v29  ;;  %v186_v37 = vmul.f32 %v1889_v31, %v2603_v28  ;;  %1137 = vmatpush.msra.mxu1 %v2611_v34  ;;  %1261 = vmatpush.msra.mxu3 %v2611_v34 }
  0xb8   :  { %1010 = vmatpush.msrb.mxu2 %v2621_v35  ;;  %1076 = vmatpush.msrb.mxu0 %v2621_v35 }
  0xb9   :  { %v967_v36 = vadd.f32 %v2194_v27, %v966_v33  ;;  %v175_v33 = vmul.f32 %v1888_v24, %v2591_v23  ;;  %1138 = vmatpush.msra.mxu1 %v2621_v35  ;;  %1262 = vmatpush.msra.mxu3 %v2621_v35 }
  0xba   :  { %1197 = vmatpush.msra.mxu2 %v2596_v25 }
  0xbb   :  { %v971_v40 = vsel %vm970_vm15, %v2194_v27, %v967_v36  ;;  %v90_v36 = vld [vmem:[#allocation5 + $0x8] sm:$0xff]  ;;  %v176_v39 = vadd.f32 %v175_v33, %v165_v30  ;;  %1321 = vmatpush.msrb.mxu1 %v2596_v25 }
  0xbc   :  { %v976_v45 = vsel %vm973_vm3, %v975_v41, %v971_v40  ;;  %v1898_v40 = vpop.permute.xlu1 %1897  ;;  %v2631_v41 = vperm.slane %v90_v36, 0  ;;  %v2633_v42 = vperm.slane %v90_v36, 1  ;;  %v2637_v43 = vperm.slane %v90_v36, 2  ;;  %1198 = vmatpush.msra.mxu2 %v2601_v26 }
  0xbd   :  { %1322 = vmatpush.msrb.mxu1 %v2601_v26  ;;  %v2644_v52 = vperm.slane %v90_v36, 3  ;;  %v1900_v53 = vunpack.i.h.bf16 %v1898_v40  ;;  %v2651_v60 = vperm.slane %v90_v36, 4  ;;  %v2656_v2 = vperm.slane %v90_v36, 5 }
  0xbe   :  { %1199 = vmatpush.msra.mxu2 %v2611_v34  ;;  %v2658_v8 = vperm.slane %v90_v36, 6  ;;  %v2661_v18 = vperm.slane %v90_v36, 7  ;;  %v2428_v36 = vmov 2  }
  0xbf   :  { %1323 = vmatpush.msrb.mxu1 %v2611_v34  ;;  %v230_v63 = vmul.f32 %v1900_v53, %v2644_v52  ;;  %v241_v15 = vmul.f32 %v1904_v62, %v2651_v60  ;;  %v252_v20 = vmul.f32 %v1905_v3, %v2656_v2 }
  0xc0   :  { %1200 = vmatpush.msra.mxu2 %v2621_v35 }
  0xc1   :  { %1324 = vmatpush.msrb.mxu1 %v2621_v35 }
  0xc4   :  { %v1908_v5 = vpop.permute.xlu1 %1907 }
  0xc5   :  { %v1909_v11 = vunpack.i.l.bf16 %v1908_v5  ;;  %v1910_v19 = vunpack.i.h.bf16 %v1908_v5 }
  0xc7   :  { %v263_v24 = vmul.f32 %v1909_v11, %v2658_v8 }
 0x11a   :  { %v981_v44 = vpop.permute.xlu0 %980 }
 0x11b   :  { %v983_v46 = vmul.f32 %v981_v44, %v976_v45 }
 0x11d   :  { %2195 = vtanh.f32 %v983_v46  ;;  %1036 = vrot.lane.b32.xlu1 %v983_v46, %s2425_s30  ;;  %v187_v46 = vadd.f32 %v186_v37, %v176_v39  ;;  %v2427_v39 = vmov 1  }
 0x11e   :  { %1911 = vset.pattern.permute.xlu1 %v2427_v39  ;;  %1917 = vset.pattern.permute.xlu2 %v2427_v39 }
 0x123   :  { %v2196_v48 = vpop.eup %2195 }
 0x124   :  { %986 = vrot.lane.b32.xlu0 %v2196_v48, %s2426_s8 }
 0x125   :  { %1913 = vperm.xlu1 %1911, %v2522_v13  }
 0x12c   :  { %1892 = vperm.xlu0 %1890, %v2570_v51  }
 0x12d   :  { %1923 = vset.pattern.permute.xlu1 %v2428_v36 }
 0x12e   :  { %1925 = vperm.xlu1 %1923, %v2515_v10  }
 0x134   :  { %1934 = vset.pattern.permute.xlu0 %v2428_v36 }
 0x135   :  { %1936 = vperm.xlu0 %1934, %v2522_v13  }
 0x136   :  { %1940 = vset.pattern.permute.xlu1 %v2427_v39 }
 0x137   :  { %1942 = vperm.xlu1 %1940, %v2570_v51  }
 0x13d   :  { %1965 = vperm.xlu0 %1934, %v2554_v38  }
 0x145   :  { %1980 = vperm.xlu0 %1934, %v2570_v51  }
 0x14d   :  { %1984 = vset.pattern.permute.xlu0 %v2427_v39 }
 0x14e   :  { %1986 = vperm.xlu0 %1984, %v2515_v10  }
 0x196   :  { %v987_v27 = vpop.permute.xlu0 %986 }
 0x197   :  { %v989_v29 = vmul.f32 %v987_v27, %v976_v45  ;;  %v1899_v45 = vunpack.i.l.bf16 %v1898_v40  ;;  %v2429_v40 = vmov 3  }
 0x198   :  { %1952 = vset.pattern.permute.xlu1 %v2429_v40 }
 0x199   :  { %991 = vrot.lane.b32.xlu2 %v989_v29, %s2425_s30  ;;  %v219_v58 = vmul.f32 %v1899_v45, %v2637_v43  ;;  %v274_v29 = vmul.f32 %v1910_v19, %v2661_v18  ;;  %1954 = vperm.xlu1 %1952, %v2515_v10   ;;  %v3247_v45 = vmov 4  }
 0x19e   :  { %v1893_v44 = vpop.permute.xlu0 %1892 }
 0x19f   :  { %v1895_v48 = vunpack.i.h.bf16 %v1893_v44  ;;  %v1894_v49 = vunpack.i.l.bf16 %v1893_v44 }
 0x1a1   :  { %v208_v56 = vmul.f32 %v1895_v48, %v2633_v42  ;;  %v197_v57 = vmul.f32 %v1894_v49, %v2631_v41  ;;  %1919 = vperm.xlu2 %1917, %v2547_v32   ;;  %1970 = vperm.xlu1 %1952, %v2522_v13   ;;  %v2719_v48 = vpop.permute.xlu1 %1036 }
 0x1a3   :  { %v198_v59 = vadd.f32 %v197_v57, %v187_v46 }
 0x1a5   :  { %v209_v0 = vadd.f32 %v208_v56, %v198_v59 }
 0x1a7   :  { %v220_v12 = vadd.f32 %v219_v58, %v209_v0 }
 0x1a9   :  { %v231_v21 = vadd.f32 %v230_v63, %v220_v12  ;;  %1930 = vperm.xlu2 %1917, %v2554_v38   ;;  %1991 = vperm.xlu1 %1952, %v2547_v32   ;;  %v2432_v63 = vmov 6  }
 0x1ab   :  { %v242_v27 = vadd.f32 %v241_v15, %v231_v21 }
 0x1ad   :  { %v253_v30 = vadd.f32 %v252_v20, %v242_v27 }
 0x1af   :  { %v264_v31 = vadd.f32 %v263_v24, %v253_v30  ;;  %v2756_v24 = vpop.permute.xlu0 %1936 }
 0x1b1   :  { %v275_v33 = vadd.f32 %v274_v29, %v264_v31  ;;  %1946 = vset.pattern.permute.xlu2 %v2428_v36  ;;  %2006 = vset.pattern.permute.xlu1 %v2428_v36 }
 0x1b2   :  { %1948 = vperm.xlu2 %1946, %v2547_v32   ;;  %2008 = vperm.xlu1 %2006, %v2531_v17  }
 0x1b3   :  { %v276_v37 = vadd.f32 %v275_v33, %v2502_v4 }
 0x1b5   :  { %1794 = vmatmul.msk.f32.vlgmr.msra.gmra.mxu0 %vm877_vm0, %v276_v37 }
 0x1ba   :  { %1958 = vset.pattern.permute.xlu2 %v2427_v39  ;;  %2018 = vset.pattern.permute.xlu1 %v3247_v45 }
 0x1bb   :  { %1960 = vperm.xlu2 %1958, %v2531_v17   ;;  %2020 = vperm.xlu1 %2018, %v2522_v13  }
 0x1c3   :  { %1975 = vperm.xlu2 %1958, %v2561_v47   ;;  %2037 = vperm.xlu1 %2018, %v2547_v32  }
 0x1cb   :  { %1995 = vset.pattern.permute.xlu2 %v3247_v45  ;;  %2041 = vset.pattern.permute.xlu1 %v2431_v50 }
 0x1cc   :  { %1997 = vperm.xlu2 %1995, %v2515_v10   ;;  %2043 = vperm.xlu1 %2041, %v2515_v10  }
 0x1d4   :  { %2012 = vset.pattern.permute.xlu2 %v2429_v40  ;;  %2057 = vset.pattern.permute.xlu1 %v3247_v45 }
 0x1d5   :  { %2014 = vperm.xlu2 %2012, %v2554_v38   ;;  %2059 = vperm.xlu1 %2057, %v2554_v38  }
 0x1dd   :  { %2024 = vset.pattern.permute.xlu2 %v2428_v36  ;;  %2075 = vperm.xlu1 %2057, %v2570_v51  }
 0x1de   :  { %2026 = vperm.xlu2 %2024, %v2561_v47  }
 0x1e5   :  { %2084 = vset.pattern.permute.xlu1 %v2432_v63 }
 0x1e6   :  { %374 = vrot.lane.b32.xlu2 %v2502_v4, %s2426_s8  ;;  %2086 = vperm.xlu1 %2084, %v2515_v10  }
 0x1ee   :  { %2048 = vperm.xlu2 %2024, %v2539_v22   ;;  %2095 = vset.pattern.permute.xlu1 %v3247_v45 }
 0x1ef   :  { %2097 = vperm.xlu1 %2095, %v2531_v17  }
 0x1f3   :  { %v2685_v44 = vpop.permute.xlu2 %991 }
 0x1f4   :  { %1803 = vmatmul.msk.f32.vlgmr.msrb.gmra.mxu2 %vm877_vm0, %v2685_v44 }
 0x1f5   :  { %1383 = vmatpush.msrb.mxu2 %v2596_v25 }
 0x1f6   :  { %2063 = vset.pattern.permute.xlu2 %v2431_v50 }
 0x1f7   :  { %1384 = vmatpush.msrb.mxu2 %v2601_v26  ;;  %2113 = vperm.xlu1 %2095, %v2561_v47  }
 0x1f9   :  { %1385 = vmatpush.msrb.mxu2 %v2611_v34 }
 0x1fb   :  { %1386 = vmatpush.msrb.mxu2 %v2621_v35  ;;  %v2713_v25 = vpop.permute.xlu2 %1919 }
 0x1ff   :  { %2122 = vset.pattern.permute.xlu1 %v2432_v63 }
 0x200   :  { %2124 = vperm.xlu1 %2122, %v2547_v32  }
 0x203   :  { %v2722_v49 = vpop.permute.xlu2 %1930 }
 0x208   :  { %2134 = vset.pattern.permute.xlu1 %v2431_v50 }
 0x209   :  { %2136 = vperm.xlu1 %2134, %v2531_v17  }
 0x20c   :  { %v2730_v56 = vpop.permute.xlu2 %1948 }
 0x211   :  { %2147 = vperm.xlu1 %2134, %v2561_v47  }
 0x215   :  { %v2737_v58 = vpop.permute.xlu2 %1960 }
 0x219   :  { %2162 = vset.pattern.permute.xlu1 %v2432_v63 }
 0x21a   :  { %2164 = vperm.xlu1 %2162, %v2531_v17  }
 0x21d   :  { %v2744_v62 = vpop.permute.xlu2 %1975 }
 0x222   :  { %2179 = vset.pattern.permute.xlu1 %v2427_v39 }
 0x226   :  { %v2752_v15 = vpop.permute.xlu2 %1997 }
 0x22f   :  { %v2015_v33 = vpop.permute.xlu2 %2014 }
 0x232   :  { %v916_v26 = vpop.f32.mrf.mxu0 }
 0x233   :  { %v917_v34 = vadd.f32 %v2529_v16, %v916_v26  ;;  %v2728_v16 = vpop.permute.xlu1 %1913  ;;  %v2016_v26 = vunpack.i.l.bf16 %v2015_v33 }
 0x23b   :  { %v2735_v57 = vpop.permute.xlu1 %1925 }
 0x243   :  { %v2742_v59 = vpop.permute.xlu1 %1942 }
 0x24b   :  { %v1955_v0 = vpop.permute.xlu1 %1954 }
 0x24c   :  { %v1957_v3 = vunpack.i.h.bf16 %v1955_v0  ;;  %v1956_v5 = vunpack.i.l.bf16 %v1955_v0 }
 0x24e   :  { %v488_v11 = vmul.f32 %v1957_v3, %v2575_v55  ;;  %v482_v12 = vmul.f32 %v1956_v5, %v2573_v54  ;;  %v518_v3 = vmul.f32 %v2016_v26, %v2591_v23  ;;  %v2766_v5 = vpop.permute.xlu0 %1965 }
 0x250   :  { %v489_v20 = vadd.f32 %v488_v11, %v482_v12 }
 0x253   :  { %v1971_v19 = vpop.permute.xlu1 %1970 }
 0x254   :  { %v1973_v10 = vunpack.i.h.bf16 %v1971_v19  ;;  %v1972_v21 = vunpack.i.l.bf16 %v1971_v19 }
 0x256   :  { %v500_v27 = vmul.f32 %v1973_v10, %v2581_v1  ;;  %v494_v29 = vmul.f32 %v1972_v21, %v2579_v61  ;;  %v2770_v19 = vpop.permute.xlu0 %1980 }
 0x258   :  { %v495_v30 = vadd.f32 %v494_v29, %v489_v20  ;;  %v1915_v29 = vunpack.i.l.bf16 %v2728_v16 }
 0x25a   :  { %v501_v31 = vadd.f32 %v500_v27, %v495_v30  ;;  %v293_v26 = vmul.f32 %v1915_v29, %v2579_v61  ;;  %v1927_v29 = vunpack.i.l.bf16 %v2735_v57 }
 0x25b   :  { %v1992_v37 = vpop.permute.xlu1 %1991 }
 0x25e   :  { %v1987_v20 = vpop.permute.xlu0 %1986 }
 0x25f   :  { %v1989_v10 = vunpack.i.h.bf16 %v1987_v20  ;;  %v1988_v21 = vunpack.i.l.bf16 %v1987_v20 }
 0x261   :  { %v287_v30 = vmul.f32 %v1989_v10, %v2575_v55  ;;  %v1932_v10 = vunpack.i.l.bf16 %v2722_v49 }
 0x277   :  { %v1012_v35 = vpop.f32.mrf.mxu2 }
 0x278   :  { %v2717_v46 = vadd.f32 %v1012_v35, %v917_v34  ;;  %v1994_v34 = vunpack.i.h.bf16 %v1992_v37  ;;  %v1993_v35 = vunpack.i.l.bf16 %v1992_v37  ;;  %v1916_v37 = vunpack.i.h.bf16 %v2728_v16 }
 0x27a   :  { %2197 = vtanh.f32 %v2717_v46  ;;  %v506_v0 = vmul.f32 %v1993_v35, %v2585_v9  ;;  %v1804_v27 = vmul.f32 -1.442695, %v2717_v46 }
 0x27c   :  { %v507_v11 = vadd.f32 %v506_v0, %v501_v31  ;;  %v281_v31 = vmul.f32 %v1988_v21, %v2573_v54  ;;  %2199 = vpow2.f32 %v1804_v27  ;;  %v299_v0 = vmul.f32 %v1916_v37, %v2581_v1 }
 0x27d   :  { %v1928_v27 = vunpack.i.h.bf16 %v2735_v57  ;;  %v1933_v37 = vunpack.i.h.bf16 %v2722_v49  ;;  %v1944_v57 = vunpack.i.l.bf16 %v2742_v59 }
 0x280   :  { %v2198_v53 = vpop.eup %2197 }
 0x281   :  { %1041 = vrot.lane.b32.xlu0 %v2198_v53, %s2424_s29  ;;  %v512_v53 = vmul.f32 %v1994_v34, %v2587_v14  ;;  %v288_v34 = vadd.f32 %v287_v30, %v281_v31  ;;  %v2017_v30 = vunpack.i.h.bf16 %v2015_v33  ;;  %v2794_v31 = vpop.permute.xlu1 %2008 }
 0x282   :  { %v2200_v35 = vpop.eup %2199 }
 0x283   :  { %v513_v12 = vadd.f32 %v512_v53, %v507_v11  ;;  %v1921_v53 = vunpack.i.l.bf16 %v2713_v25  ;;  %v294_v46 = vadd.f32 %v293_v26, %v288_v34  ;;  %v1922_v11 = vunpack.i.h.bf16 %v2713_v25 }
 0x284   :  { %v317_v25 = vmul.f32 %v1932_v10, %v2591_v23 }
 0x285   :  { %v300_v20 = vadd.f32 %v299_v0, %v294_v46  ;;  %v311_v16 = vmul.f32 %v1922_v11, %v2587_v14  ;;  %v1938_v0 = vunpack.i.l.bf16 %v2756_v24  ;;  %v524_v46 = vmul.f32 %v2017_v30, %v2603_v28 }
 0x286   :  { %v323_v11 = vmul.f32 %v1933_v37, %v2603_v28 }
 0x289   :  { %2002 = vperm.xlu0 %1984, %v2539_v22   ;;  %v2807_v10 = vpop.permute.xlu1 %2020 }
 0x291   :  { %2030 = vset.pattern.permute.xlu0 %v2429_v40 }
 0x292   :  { %2032 = vperm.xlu0 %2030, %v2570_v51  }
 0x29a   :  { %2053 = vperm.xlu0 %2030, %v2531_v17  }
 0x2a2   :  { %2070 = vperm.xlu0 %2030, %v2561_v47  }
 0x2aa   :  { %474 = vrot.lane.b32.xlu0 %v2502_v4, %s2424_s29  ;;  %v519_v4 = vadd.f32 %v518_v3, %v513_v12  ;;  %v2785_v3 = vadd.f32 1.0, %v2200_v35  ;;  %v305_v12 = vmul.f32 %v1921_v53, %v2585_v9  ;;  %v388_v35 = vmul.f32 %v1928_v27, %v2575_v55 }
 0x2ab   :  { %v382_v53 = vmul.f32 %v1927_v29, %v2573_v54  ;;  %v1945_v27 = vunpack.i.h.bf16 %v2742_v59  ;;  %v329_v29 = vmul.f32 %v1944_v57, %v2631_v41  ;;  %v1963_v57 = vunpack.i.h.bf16 %v2737_v58 }
 0x2ac   :  { %2201 = vrcp.f32 %v2785_v3  ;;  %v306_v21 = vadd.f32 %v305_v12, %v300_v20  ;;  %v1939_v20 = vunpack.i.h.bf16 %v2756_v24  ;;  %vm1024_vm7 = vweird.f32 %v2785_v3 }
 0x2ad   :  { %v389_v49 = vadd.f32 %v388_v35, %v382_v53  ;;  %v1962_v35 = vunpack.i.l.bf16 %v2737_v58  ;;  %v335_v24 = vmul.f32 %v1945_v27, %v2633_v42  ;;  %v1967_v27 = vunpack.i.l.bf16 %v2766_v5 }
 0x2ae   :  { %v312_v26 = vadd.f32 %v311_v16, %v306_v21  ;;  %v394_v16 = vmul.f32 %v1938_v0, %v2579_v61  ;;  %v2809_v21 = vadd.f32 %v524_v46, %v519_v4  ;;  %v1951_v4 = vunpack.i.h.bf16 %v2730_v56 }
 0x2af   :  { %v347_v58 = vmul.f32 %v1963_v57, %v2644_v52  ;;  %v1982_v57 = vunpack.i.l.bf16 %v2770_v19 }
 0x2b0   :  { %v318_v33 = vadd.f32 %v317_v25, %v312_v26  ;;  %v400_v25 = vmul.f32 %v1939_v20, %v2581_v1  ;;  %v395_v26 = vadd.f32 %v394_v16, %v389_v49  ;;  %v2822_v49 = vpop.permute.xlu1 %2037  ;;  %v412_v20 = vmul.f32 %v1951_v4, %v2587_v14 }
 0x2b2   :  { %2091 = vperm.xlu0 %2030, %v2539_v22   ;;  %v2202_v34 = vpop.eup %2201  ;;  %v324_v30 = vadd.f32 %v323_v11, %v318_v33  ;;  %v401_v59 = vadd.f32 %v400_v25, %v395_v26  ;;  %v341_v11 = vmul.f32 %v1962_v35, %v2637_v43  ;;  %v1968_v25 = vunpack.i.h.bf16 %v2766_v5 }
 0x2b3   :  { %v1020_v12 = vmul.f32 %v2202_v34, %v2785_v3  ;;  %vm1025_vm6 = vweird.f32 %v2202_v34  ;;  %v418_v35 = vmul.f32 %v1967_v27, %v2591_v23  ;;  %v430_v27 = vmul.f32 %v1982_v57, %v2631_v41 }
 0x2b4   :  { %v330_v0 = vadd.f32 %v329_v29, %v324_v30  ;;  %vm1026_vm8 = vmor %vm1024_vm7, %vm1025_vm6  ;;  %v1977_v29 = vunpack.i.l.bf16 %v2744_v62  ;;  %v424_v5 = vmul.f32 %v1968_v25, %v2603_v28 }
 0x2b5   :  { %v1021_v37 = vsub.f32 1.0, %v1020_v12 }
 0x2b6   :  { %v336_v12 = vadd.f32 %v335_v24, %v330_v0  ;;  %v353_v4 = vmul.f32 %v1977_v29, %v2651_v60 }
 0x2b7   :  { %v1022_v53 = vmul.f32 %v2202_v34, %v1021_v37 }
 0x2b8   :  { %v342_v37 = vadd.f32 %v341_v11, %v336_v12  ;;  %v2842_v11 = vpop.permute.xlu2 %2026 }
 0x2b9   :  { %v1023_v33 = vadd.f32 %v2202_v34, %v1022_v53  ;;  %v2029_v17 = vunpack.i.h.bf16 %v2842_v11 }
 0x2ba   :  { %2106 = vset.pattern.permute.xlu0 %v2432_v63 }
 0x2bb   :  { %2108 = vperm.xlu0 %2106, %v2522_v13   ;;  %v1027_v30 = vsel %vm1026_vm8, %v2202_v34, %v1023_v33  ;;  %v348_v34 = vadd.f32 %v347_v58, %v342_v37  ;;  %v2845_v33 = vpop.permute.xlu1 %2043 }
 0x2bd   :  { %v354_v12 = vadd.f32 %v353_v4, %v348_v34 }
 0x2c3   :  { %2128 = vset.pattern.permute.xlu0 %v3247_v45  ;;  %v1950_v45 = vunpack.i.l.bf16 %v2730_v56  ;;  %v1030_v56 = vand.u32 2147483648, %v2785_v3 }
 0x2c4   :  { %2130 = vperm.xlu0 %2128, %v2539_v22  }
 0x2c5   :  { %v406_v46 = vmul.f32 %v1950_v45, %v2585_v9  ;;  %v1028_v45 = vand.u32 2147483647, %v2785_v3  ;;  %v1031_v24 = vor.u32 1.1754944e-38, %v1030_v56  ;;  %v1978_v3 = vunpack.i.h.bf16 %v2744_v62 }
 0x2c7   :  { %v407_v16 = vadd.f32 %v406_v46, %v401_v59  ;;  %vm1029_vm9 = vcmp.eq.f32.partialorder %v1028_v45, 8.507059e+37  ;;  %v359_v62 = vmul.f32 %v1978_v3, %v2656_v2  ;;  %v2000_v45 = vunpack.i.h.bf16 %v2752_v15 }
 0x2c8   :  { %v2833_v0 = vsel %vm1029_vm9, %v1031_v24, %v1027_v30 }
 0x2c9   :  { %v413_v26 = vadd.f32 %v412_v20, %v407_v16  ;;  %v1983_v16 = vunpack.i.h.bf16 %v2770_v19  ;;  %v360_v58 = vadd.f32 %v359_v62, %v354_v12  ;;  %v588_v19 = vmul.f32 %v2000_v45, %v2575_v55 }
 0x2ca   :  { %v2028_v62 = vunpack.i.l.bf16 %v2842_v11  ;;  %v460_v11 = vmul.f32 %v2029_v17, %v2656_v2 }
 0x2cb   :  { %v419_v59 = vadd.f32 %v418_v35, %v413_v26  ;;  %v436_v37 = vmul.f32 %v1983_v16, %v2633_v42  ;;  %v2010_v26 = vunpack.i.l.bf16 %v2794_v31  ;;  %v1999_v35 = vunpack.i.l.bf16 %v2752_v15 }
 0x2cc   :  { %2156 = vset.pattern.permute.xlu0 %v2431_v50 }
 0x2cd   :  { %v425_v20 = vadd.f32 %v424_v5, %v419_v59  ;;  %v2011_v5 = vunpack.i.h.bf16 %v2794_v31  ;;  %v442_v59 = vmul.f32 %v2010_v26, %v2637_v43  ;;  %2158 = vperm.xlu0 %2156, %v2539_v22   ;;  %v582_v15 = vmul.f32 %v1999_v35, %v2573_v54 }
 0x2ce   :  { %v454_v26 = vmul.f32 %v2028_v62, %v2651_v60 }
 0x2cf   :  { %v431_v25 = vadd.f32 %v430_v27, %v425_v20  ;;  %v448_v16 = vmul.f32 %v2011_v5, %v2644_v52  ;;  %v589_v45 = vadd.f32 %v588_v19, %v582_v15 }
 0x2d1   :  { %v437_v34 = vadd.f32 %v436_v37, %v431_v25  ;;  %v2879_v25 = vld [vmem:[%s3239_s0 + $0x8] sm:$0xff] }
 0x2d2   :  { %772 = vrot.lane.b32.xlu1 %v2879_v25, %s2426_s8 }
 0x2d3   :  { %v443_v27 = vadd.f32 %v442_v59, %v437_v34 }
 0x2d5   :  { %872 = vrot.lane.b32.xlu0 %v2879_v25, %s2424_s29 }
 0x2d6   :  { %2178 = vset.pattern.permute.xlu0 %v2422_v6 }
 0x2f3   :  { %v1042_v53 = vpop.permute.xlu0 %1041 }
 0x2f4   :  { %v1044_v46 = vmul.f32 %v1042_v53, %v2833_v0  ;;  %v375_v53 = vpop.permute.xlu2 %374 }
 0x2f6   :  { %1046 = vrot.lane.b32.xlu2 %v1044_v46, %s2425_s30  ;;  %v2859_v46 = vpop.permute.xlu1 %2059 }
 0x2fb   :  { %v2003_v56 = vpop.permute.xlu0 %2002 }
 0x2fc   :  { %v2005_v29 = vunpack.i.h.bf16 %v2003_v56  ;;  %v2004_v30 = vunpack.i.l.bf16 %v2003_v56 }
 0x2fe   :  { %v365_v24 = vmul.f32 %v2004_v30, %v2658_v8  ;;  %2065 = vperm.xlu2 %2063, %v2522_v13   ;;  %v371_v3 = vmul.f32 %v2005_v29, %v2661_v18  ;;  %v2022_v13 = vunpack.i.l.bf16 %v2807_v10 }
 0x300   :  { %v366_v4 = vadd.f32 %v365_v24, %v360_v58  ;;  %v2023_v58 = vunpack.i.h.bf16 %v2807_v10  ;;  %v594_v29 = vmul.f32 %v2022_v13, %v2579_v61  ;;  %v449_v10 = vadd.f32 %v448_v16, %v443_v27 }
 0x301   :  { %v2040_v13 = vunpack.i.h.bf16 %v2822_v49 }
 0x302   :  { %v372_v57 = vadd.f32 %v371_v3, %v366_v4  ;;  %v600_v24 = vmul.f32 %v2023_v58, %v2581_v1  ;;  %v595_v19 = vadd.f32 %v594_v29, %v589_v45  ;;  %v2076_v3 = vpop.permute.xlu1 %2075 }
 0x304   :  { %v2033_v12 = vpop.permute.xlu0 %2032  ;;  %v377_v20 = vadd.f32 %v375_v53, %v372_v57  ;;  %v2039_v53 = vunpack.i.l.bf16 %v2822_v49  ;;  %v601_v57 = vadd.f32 %v600_v24, %v595_v19  ;;  %v2061_v49 = vunpack.i.l.bf16 %v2859_v46 }
 0x305   :  { %v2035_v56 = vunpack.i.h.bf16 %v2033_v12  ;;  %v2034_v31 = vunpack.i.l.bf16 %v2033_v12  ;;  %v2062_v24 = vunpack.i.h.bf16 %v2859_v46 }
 0x306   :  { %1795 = vmatmul.msk.f32.gmra.mxu0 %vm877_vm0, %v377_v20  ;;  %2080 = vperm.xlu2 %2063, %v2547_v32   ;;  %v2049_v32 = vpop.permute.xlu2 %2048  ;;  %v606_v62 = vmul.f32 %v2039_v53, %v2585_v9  ;;  %v618_v19 = vmul.f32 %v2061_v49, %v2591_v23 }
 0x307   :  { %v536_v30 = vmul.f32 %v2035_v56, %v2633_v42  ;;  %v530_v37 = vmul.f32 %v2034_v31, %v2631_v41  ;;  %v2050_v5 = vunpack.i.l.bf16 %v2049_v32  ;;  %v2051_v20 = vunpack.i.h.bf16 %v2049_v32 }
 0x308   :  { %v612_v56 = vmul.f32 %v2040_v13, %v2587_v14  ;;  %v607_v31 = vadd.f32 %v606_v62, %v601_v57  ;;  %v2285_v57 = vld [vmem:[%s3239_s0] sm:$0xff]  ;;  %v2078_v62 = vunpack.i.h.bf16 %v2076_v3 }
 0x309   :  { %v531_v35 = vadd.f32 %v530_v37, %v2809_v21  ;;  %v455_v21 = vadd.f32 %v454_v26, %v449_v10  ;;  %v466_v16 = vmul.f32 %v2050_v5, %v2658_v8  ;;  %v472_v39 = vmul.f32 %v2051_v20, %v2661_v18 }
 0x30a   :  { %v613_v26 = vadd.f32 %v612_v56, %v607_v31 }
 0x30b   :  { %v537_v4 = vadd.f32 %v536_v30, %v531_v35  ;;  %v461_v45 = vadd.f32 %v460_v11, %v455_v21  ;;  %v2087_v30 = vpop.permute.xlu1 %2086  ;;  %v624_v11 = vmul.f32 %v2062_v24, %v2603_v28 }
 0x30c   :  { %v2054_v34 = vpop.permute.xlu0 %2053  ;;  %v619_v5 = vadd.f32 %v618_v19, %v613_v26  ;;  %v2089_v56 = vunpack.i.h.bf16 %v2087_v30  ;;  %v2088_v31 = vunpack.i.l.bf16 %v2087_v30 }
 0x30d   :  { %v2056_v59 = vunpack.i.h.bf16 %v2054_v34  ;;  %v2055_v15 = vunpack.i.l.bf16 %v2054_v34  ;;  %v467_v10 = vadd.f32 %v466_v16, %v461_v45 }
 0x30e   :  { %2102 = vperm.xlu2 %2063, %v2554_v38   ;;  %v625_v46 = vadd.f32 %v624_v11, %v619_v5 }
 0x30f   :  { %v548_v6 = vmul.f32 %v2056_v59, %v2644_v52  ;;  %v542_v12 = vmul.f32 %v2055_v15, %v2637_v43  ;;  %v2077_v59 = vunpack.i.l.bf16 %v2076_v3  ;;  %v780_v3 = vmul.f32 %v2088_v31, %v2573_v54 }
 0x310   :  { %v1039_v31 = vmul.f32 %v2719_v48, %v2833_v0 }
 0x311   :  { %v543_v27 = vadd.f32 %v542_v12, %v537_v4  ;;  %v473_v4 = vadd.f32 %v472_v39, %v467_v10  ;;  %v636_v12 = vmul.f32 %v2078_v62, %v2633_v42 }
 0x313   :  { %v549_v58 = vadd.f32 %v548_v6, %v543_v27  ;;  %v2098_v13 = vpop.permute.xlu1 %2097  ;;  %v630_v6 = vmul.f32 %v2077_v59, %v2631_v41 }
 0x314   :  { %v2071_v29 = vpop.permute.xlu0 %2070  ;;  %v2099_v16 = vunpack.i.l.bf16 %v2098_v13 }
 0x315   :  { %v2073_v37 = vunpack.i.h.bf16 %v2071_v29  ;;  %v2072_v17 = vunpack.i.l.bf16 %v2071_v29  ;;  %v631_v20 = vadd.f32 %v630_v6, %v625_v46 }
 0x316   :  { %2118 = vperm.xlu2 %2063, %v2570_v51   ;;  %v642_v49 = vmul.f32 %v2099_v16, %v2637_v43 }
 0x317   :  { %v560_v35 = vmul.f32 %v2073_v37, %v2656_v2  ;;  %v554_v32 = vmul.f32 %v2072_v17, %v2651_v60  ;;  %v637_v45 = vadd.f32 %v636_v12, %v631_v20  ;;  %v786_v37 = vmul.f32 %v2089_v56, %v2575_v55 }
 0x319   :  { %v555_v53 = vadd.f32 %v554_v32, %v549_v58  ;;  %v2100_v58 = vunpack.i.h.bf16 %v2098_v13  ;;  %v643_v39 = vadd.f32 %v642_v49, %v637_v45  ;;  %v2045_v49 = vunpack.i.l.bf16 %v2845_v33 }
 0x31b   :  { %v2907_v34 = vadd.f32 %v560_v35, %v555_v53  ;;  %v2114_v29 = vpop.permute.xlu1 %2113  ;;  %v648_v17 = vmul.f32 %v2100_v58, %v2644_v52  ;;  %v787_v35 = vadd.f32 %v786_v37, %v780_v3  ;;  %v2046_v58 = vunpack.i.h.bf16 %v2845_v33 }
 0x31c   :  { %v475_v15 = vpop.permute.xlu0 %474  ;;  %v2115_v26 = vunpack.i.l.bf16 %v2114_v29  ;;  %v2116_v53 = vunpack.i.h.bf16 %v2114_v29  ;;  %v679_v3 = vmul.f32 %v2045_v49, %v2573_v54 }
 0x31d   :  { %v477_v21 = vadd.f32 %v475_v15, %v473_v4  ;;  %v649_v19 = vadd.f32 %v648_v17, %v643_v39  ;;  %v685_v37 = vmul.f32 %v2046_v58, %v2575_v55 }
 0x31e   :  { %574 = vrot.lane.b32.xlu2 %v2285_v57, %s2425_s30  ;;  %v654_v30 = vmul.f32 %v2115_v26, %v2651_v60  ;;  %v660_v59 = vmul.f32 %v2116_v53, %v2656_v2 }
 0x31f   :  { %1796 = vmatmul.msk.f32.gmra.mxu0 %vm877_vm0, %v477_v21  ;;  %2140 = vset.pattern.permute.xlu2 %v2432_v63 }
 0x320   :  { %v655_v15 = vadd.f32 %v654_v30, %v649_v19 }
 0x322   :  { %v661_v13 = vadd.f32 %v660_v59, %v655_v15 }
 0x324   :  { %v2918_v27 = vpop.permute.xlu0 %2091 }
 0x32d   :  { %v2109_v10 = vpop.permute.xlu0 %2108 }
 0x32e   :  { %v2111_v32 = vunpack.i.h.bf16 %v2109_v10  ;;  %v2110_v24 = vunpack.i.l.bf16 %v2109_v10 }
 0x330   :  { %v798_v4 = vmul.f32 %v2111_v32, %v2581_v1  ;;  %v792_v11 = vmul.f32 %v2110_v24, %v2579_v61  ;;  %v2125_v32 = vpop.permute.xlu1 %2124 }
 0x331   :  { %v2127_v24 = vunpack.i.h.bf16 %v2125_v32  ;;  %v2126_v19 = vunpack.i.l.bf16 %v2125_v32 }
 0x332   :  { %v793_v5 = vadd.f32 %v792_v11, %v787_v35 }
 0x333   :  { %v810_v55 = vmul.f32 %v2127_v24, %v2587_v14  ;;  %v804_v54 = vmul.f32 %v2126_v19, %v2585_v9 }
 0x334   :  { %v799_v21 = vadd.f32 %v798_v4, %v793_v5 }
 0x336   :  { %v2131_v57 = vpop.permute.xlu0 %2130  ;;  %v805_v5 = vadd.f32 %v804_v54, %v799_v21 }
 0x337   :  { %v2133_v46 = vunpack.i.h.bf16 %v2131_v57  ;;  %v2132_v62 = vunpack.i.l.bf16 %v2131_v57 }
 0x338   :  { %v2948_v15 = vadd.f32 %v810_v55, %v805_v5  ;;  %v2137_v57 = vpop.permute.xlu1 %2136 }
 0x339   :  { %v672_v6 = vmul.f32 %v2133_v46, %v2661_v18  ;;  %v666_v12 = vmul.f32 %v2132_v62, %v2658_v8 }
 0x33b   :  { %v667_v20 = vadd.f32 %v666_v12, %v661_v13  ;;  %v2093_v12 = vunpack.i.l.bf16 %v2918_v27 }
 0x33d   :  { %v673_v16 = vadd.f32 %v672_v6, %v667_v20 }
 0x33f   :  { %v2931_v56 = vadd.f32 %v673_v16, %v2879_v25  ;;  %v686_v25 = vadd.f32 %v685_v37, %v679_v3  ;;  %v2094_v16 = vunpack.i.h.bf16 %v2918_v27  ;;  %v2138_v37 = vunpack.i.l.bf16 %v2137_v57 }
 0x341   :  { %v572_v3 = vmul.f32 %v2094_v16, %v2661_v18 }
 0x350   :  { %v1047_v45 = vpop.permute.xlu2 %1046 }
 0x351   :  { %v2937_v29 = vadd.f32 %v1047_v45, %v1039_v31  ;;  %v2148_v31 = vpop.permute.xlu1 %2147 }
 0x352   :  { %v2150_v24 = vunpack.i.h.bf16 %v2148_v31 }
 0x353   :  { %2203 = vtanh.f32 %v2937_v29 }
 0x358   :  { %v2066_v17 = vpop.permute.xlu2 %2065 }
 0x359   :  { %v2204_v39 = vpop.eup %2203  ;;  %v2068_v26 = vunpack.i.h.bf16 %v2066_v17  ;;  %v2067_v10 = vunpack.i.l.bf16 %v2066_v17 }
 0x35a   :  { %1052 = vrot.lane.b32.xlu2 %v2204_v39, %s2424_s29 }
 0x35b   :  { %v691_v48 = vmul.f32 %v2067_v10, %v2579_v61  ;;  %v697_v35 = vmul.f32 %v2068_v26, %v2581_v1  ;;  %v739_v26 = vmul.f32 %v2138_v37, %v2637_v43  ;;  %v2149_v10 = vunpack.i.l.bf16 %v2148_v31 }
 0x35d   :  { %v692_v33 = vadd.f32 %v691_v48, %v686_v25  ;;  %v2139_v25 = vunpack.i.h.bf16 %v2137_v57  ;;  %v2159_v48 = vpop.permute.xlu0 %2158  ;;  %v751_v54 = vmul.f32 %v2149_v10, %v2651_v60 }
 0x35f   :  { %v698_v30 = vadd.f32 %v697_v35, %v692_v33  ;;  %v745_v32 = vmul.f32 %v2139_v25, %v2644_v52 }
 0x360   :  { %v2081_v53 = vpop.permute.xlu2 %2080 }
 0x361   :  { %v2083_v4 = vunpack.i.h.bf16 %v2081_v53  ;;  %v2082_v11 = vunpack.i.l.bf16 %v2081_v53 }
 0x362   :  { %2142 = vperm.xlu2 %2140, %v2554_v38   ;;  %v566_v38 = vmul.f32 %v2093_v12, %v2658_v8 }
 0x363   :  { %v703_v59 = vmul.f32 %v2082_v11, %v2585_v9  ;;  %v709_v61 = vmul.f32 %v2083_v4, %v2587_v14  ;;  %v757_v4 = vmul.f32 %v2150_v24, %v2656_v2  ;;  %v2161_v11 = vunpack.i.h.bf16 %v2159_v48 }
 0x365   :  { %v704_v1 = vadd.f32 %v703_v59, %v698_v30  ;;  %v2160_v30 = vunpack.i.l.bf16 %v2159_v48 }
 0x367   :  { %v710_v46 = vadd.f32 %v709_v61, %v704_v1  ;;  %v763_v59 = vmul.f32 %v2160_v30, %v2658_v8  ;;  %v769_v1 = vmul.f32 %v2161_v11, %v2661_v18  ;;  %v3001_v30 = vld [vmem:[#allocation7] ss:$0 sm:$0xff] }
 0x368   :  { %v2103_v13 = vpop.permute.xlu2 %2102 }
 0x369   :  { %v2105_v62 = vunpack.i.h.bf16 %v2103_v13  ;;  %v2104_v6 = vunpack.i.l.bf16 %v2103_v13 }
 0x36a   :  { %2152 = vperm.xlu2 %2140, %v2570_v51   ;;  %v567_v51 = vadd.f32 %v566_v38, %v2907_v34  ;;  %v2165_v34 = vpop.permute.xlu1 %2164 }
 0x36b   :  { %v715_v20 = vmul.f32 %v2104_v6, %v2591_v23  ;;  %v721_v9 = vmul.f32 %v2105_v62, %v2603_v28 }
 0x36c   :  { %v573_v33 = vadd.f32 %v572_v3, %v567_v51 }
 0x36d   :  { %v716_v21 = vadd.f32 %v715_v20, %v710_v46 }
 0x36f   :  { %v722_v45 = vadd.f32 %v721_v9, %v716_v21 }
 0x370   :  { %v2119_v14 = vpop.permute.xlu2 %2118 }
 0x371   :  { %v2121_v58 = vunpack.i.h.bf16 %v2119_v14  ;;  %v2120_v49 = vunpack.i.l.bf16 %v2119_v14  ;;  %v2166_v14 = vunpack.i.l.bf16 %v2165_v34 }
 0x372   :  { %2169 = vperm.xlu2 %2140, %v2561_v47   ;;  %v773_v46 = vpop.permute.xlu1 %772 }
 0x373   :  { %v733_v17 = vmul.f32 %v2121_v58, %v2633_v42  ;;  %v727_v39 = vmul.f32 %v2120_v49, %v2631_v41  ;;  %v2167_v58 = vunpack.i.h.bf16 %v2165_v34  ;;  %v840_v37 = vmul.f32 %v2166_v14, %v2637_v43 }
 0x375   :  { %v728_v27 = vadd.f32 %v727_v39, %v722_v45 }
 0x377   :  { %v734_v35 = vadd.f32 %v733_v17, %v728_v27  ;;  %v846_v17 = vmul.f32 %v2167_v58, %v2644_v52 }
 0x378   :  { %v575_v19 = vpop.permute.xlu2 %574 }
 0x379   :  { %v577_v53 = vadd.f32 %v575_v19, %v573_v33  ;;  %v740_v55 = vadd.f32 %v739_v26, %v734_v35 }
 0x37a   :  { %2174 = vperm.xlu2 %2140, %v2539_v22  }
 0x37b   :  { %1797 = vmatmul.msk.f32.gmra.mxu0 %vm877_vm0, %v577_v53  ;;  %v746_v47 = vadd.f32 %v745_v32, %v740_v55  ;;  %v873_v32 = vpop.permute.xlu0 %872 }
 0x37d   :  { %v752_v5 = vadd.f32 %v751_v54, %v746_v47 }
 0x37f   :  { %v758_v61 = vadd.f32 %v757_v4, %v752_v5 }
 0x381   :  { %v764_v57 = vadd.f32 %v763_v59, %v758_v61 }
 0x382   :  { %2180 = vset.pattern.permute.xlu2 %v2428_v36 }
 0x383   :  { %1798 = vmatmul.msk.f32.gmra.mxu0 %vm877_vm0, %v2931_v56  ;;  %v770_v13 = vadd.f32 %v769_v1, %v764_v57 }
 0x385   :  { %v775_v62 = vadd.f32 %v773_v46, %v770_v13 }
 0x38b   :  { %1799 = vmatmul.msk.f32.gmra.mxu0 %vm877_vm0, %v775_v62 }
 0x3b4   :  { %v1053_v6 = vpop.permute.xlu2 %1052 }
 0x3b5   :  { %v1055_v22 = vmul.f32 %v1053_v6, %v2833_v0 }
 0x3b7   :  { %1057 = vrot.lane.b32.xlu1 %v1055_v22, %s2425_s30 }
 0x3bc   :  { %v2143_v12 = vpop.permute.xlu2 %2142 }
 0x3bd   :  { %v2145_v20 = vunpack.i.h.bf16 %v2143_v12  ;;  %v2144_v9 = vunpack.i.l.bf16 %v2143_v12 }
 0x3bf   :  { %v816_v21 = vmul.f32 %v2144_v9, %v2591_v23  ;;  %v822_v16 = vmul.f32 %v2145_v20, %v2603_v28 }
 0x3c1   :  { %v817_v56 = vadd.f32 %v816_v21, %v2948_v15 }
 0x3c3   :  { %v823_v36 = vadd.f32 %v822_v16, %v817_v56 }
 0x3c4   :  { %v2153_v38 = vpop.permute.xlu2 %2152 }
 0x3c5   :  { %v2155_v31 = vunpack.i.h.bf16 %v2153_v38  ;;  %v2154_v45 = vunpack.i.l.bf16 %v2153_v38 }
 0x3c7   :  { %v834_v49 = vmul.f32 %v2155_v31, %v2633_v42  ;;  %v828_v0 = vmul.f32 %v2154_v45, %v2631_v41 }
 0x3c9   :  { %v829_v3 = vadd.f32 %v828_v0, %v823_v36 }
 0x3cb   :  { %v835_v23 = vadd.f32 %v834_v49, %v829_v3 }
 0x3cc   :  { %v2170_v39 = vpop.permute.xlu2 %2169 }
 0x3cd   :  { %v841_v28 = vadd.f32 %v840_v37, %v835_v23  ;;  %v2172_v51 = vunpack.i.h.bf16 %v2170_v39  ;;  %v2171_v15 = vunpack.i.l.bf16 %v2170_v39 }
 0x3cf   :  { %v847_v25 = vadd.f32 %v846_v17, %v841_v28  ;;  %v852_v27 = vmul.f32 %v2171_v15, %v2651_v60  ;;  %v858_v26 = vmul.f32 %v2172_v51, %v2656_v2  ;;  %v919_v60 = vpop.f32.mrf.mxu0 }
 0x3d0   :  { %v920_v34 = vadd.f32 %v3001_v30, %v919_v60 }
 0x3d1   :  { %v853_v10 = vadd.f32 %v852_v27, %v847_v25 }
 0x3d3   :  { %v859_v42 = vadd.f32 %v858_v26, %v853_v10 }
 0x3d4   :  { %v2175_v48 = vpop.permute.xlu2 %2174 }
 0x3d5   :  { %v2177_v35 = vunpack.i.h.bf16 %v2175_v48  ;;  %v2176_v41 = vunpack.i.l.bf16 %v2175_v48 }
 0x3d7   :  { %v870_v43 = vmul.f32 %v2177_v35, %v2661_v18  ;;  %v864_v33 = vmul.f32 %v2176_v41, %v2658_v8  ;;  %v922_v2 = vpop.f32.mrf.mxu0 }
 0x3d8   :  { %v923_v49 = vadd.f32 %v3001_v30, %v922_v2 }
 0x3d9   :  { %v865_v52 = vadd.f32 %v864_v33, %v859_v42 }
 0x3db   :  { %v871_v24 = vadd.f32 %v870_v43, %v865_v52 }
 0x3dd   :  { %v875_v19 = vadd.f32 %v873_v32, %v871_v24 }
 0x3df   :  { %1800 = vmatmul.msk.f32.gmra.mxu0 %vm877_vm0, %v875_v19 }
 0x3f8   :  { %v2993_v55 = vpop.f32.mrf.mxu0 }
 0x3f9   :  { %v926_v2 = vadd.f32 %v3001_v30, %v2993_v55 }
 0x400   :  { %v2995_v54 = vpop.f32.mrf.mxu0 }
 0x408   :  { %v2997_v18 = vpop.f32.mrf.mxu0 }
 0x429   :  { %v2989_v53 = vpop.permute.xlu1 %1057 }
 0x42a   :  { %1805 = vmatmul.msk.f32.vlgmr.msrb.gmra.mxu0 %vm877_vm0, %v2989_v53 }
 0x45c   :  { %v2999_v8 = vpop.f32.mrf.mxu0 }
 0x4a7   :  { %v1078_v47 = vpop.f32.mrf.mxu0 }
 0x4a8   :  { %v1079_v4 = vadd.f32 %v1078_v47, %v920_v34 }
 0x4aa   :  { %2205 = vtanh.f32 %v1079_v4  ;;  %v1806_v5 = vmul.f32 -1.442695, %v1079_v4 }
 0x4ac   :  { %2207 = vpow2.f32 %v1806_v5 }
 0x4b0   :  { %v2206_v11 = vpop.eup %2205 }
 0x4b1   :  { %1103 = vrot.lane.b32.xlu2 %v2206_v11, %s2424_s29 }
 0x4b2   :  { %v2208_v59 = vpop.eup %2207 }
 0x4b3   :  { %v1084_v61 = vadd.f32 1.0, %v2208_v59 }
 0x4b5   :  { %2209 = vrcp.f32 %v1084_v61  ;;  %v1096_v6 = vand.u32 2147483648, %v1084_v61  ;;  %vm1090_vm11 = vweird.f32 %v1084_v61  ;;  %v1094_v22 = vand.u32 2147483647, %v1084_v61 }
 0x4b7   :  { %v1097_v20 = vor.u32 1.1754944e-38, %v1096_v6  ;;  %vm1095_vm13 = vcmp.eq.f32.partialorder %v1094_v22, 8.507059e+37 }
 0x4bb   :  { %v2210_v1 = vpop.eup %2209 }
 0x4bc   :  { %v1086_v57 = vmul.f32 %v2210_v1, %v1084_v61  ;;  %vm1091_vm10 = vweird.f32 %v2210_v1 }
 0x4bd   :  { %vm1092_vm12 = vmor %vm1090_vm11, %vm1091_vm10  ;;  %vm1498_vm11 = vcmask 523264  }
 0x4be   :  { %v1087_v13 = vsub.f32 1.0, %v1086_v57 }
 0x4c0   :  { %v1088_v46 = vmul.f32 %v2210_v1, %v1087_v13 }
 0x4c2   :  { %v1089_v62 = vadd.f32 %v2210_v1, %v1088_v46 }
 0x4c4   :  { %v1093_v12 = vsel %vm1092_vm12, %v2210_v1, %v1089_v62 }
 0x4c5   :  { %v1098_v21 = vsel %vm1095_vm13, %v1097_v20, %v1093_v12 }
 0x4c6   :  { %v1101_v56 = vmul.f32 %v1098_v21, %v2937_v29 }
 0x50b   :  { %v1104_v9 = vpop.permute.xlu2 %1103 }
 0x50c   :  { %v1106_v16 = vmul.f32 %v1104_v9, %v1098_v21 }
 0x50e   :  { %1108 = vrot.lane.b32.xlu0 %v1106_v16, %s2425_s30 }
 0x580   :  { %v1109_v38 = vpop.permute.xlu0 %1108 }
 0x581   :  { %v1111_v14 = vadd.f32 %v1109_v38, %v1101_v56 }
 0x583   :  { %2211 = vtanh.f32 %v1111_v14 }
 0x589   :  { %v2212_v36 = vpop.eup %2211 }
 0x58a   :  { %1114 = vrot.lane.b32.xlu1 %v2212_v36, %s2424_s29 }
 0x5fc   :  { %v1115_v31 = vpop.permute.xlu1 %1114 }
 0x5fd   :  { %v1117_v45 = vmul.f32 %v1115_v31, %v1098_v21  ;;  %v1431_v31 = vld [vmem:[#allocation8 + $0x18] sm:$0xff] }
 0x5fe   :  { %1460 = vmatpush.msrb.mxu3 %v1431_v31 }
 0x5ff   :  { %1119 = vrot.lane.b32.xlu2 %v1117_v45, %s2425_s30  ;;  %v1430_v45 = vld [vmem:[#allocation8 + $0x10] sm:$0xff] }
 0x600   :  { %1461 = vmatpush.msrb.mxu3 %v1430_v45 }
 0x659   :  { %v3009_v58 = vpop.permute.xlu2 %1119 }
 0x65a   :  { %1807 = vmatmul.msk.f32.vlgmr.msra.gmra.mxu1 %vm877_vm0, %v3009_v58 }
 0x6d7   :  { %v1140_v0 = vpop.f32.mrf.mxu1 }
 0x6d8   :  { %v1141_v37 = vadd.f32 %v1140_v0, %v923_v49  ;;  %v1429_v49 = vld [vmem:[#allocation8 + $0x8] sm:$0xff]  ;;  %v1428_v0 = vld [vmem:[#allocation8] sm:$0xff] }
 0x6d9   :  { %1462 = vmatpush.msrb.mxu3 %v1429_v49 }
 0x6da   :  { %2213 = vtanh.f32 %v1141_v37  ;;  %v1808_v3 = vmul.f32 -1.442695, %v1141_v37 }
 0x6db   :  { %1463 = vmatpush.msrb.mxu3 %v1428_v0 }
 0x6dc   :  { %2215 = vpow2.f32 %v1808_v3 }
 0x6e0   :  { %v2214_v29 = vpop.eup %2213 }
 0x6e1   :  { %1165 = vrot.lane.b32.xlu0 %v2214_v29, %s2424_s29  ;;  %v929_v29 = vadd.f32 %v3001_v30, %v2995_v54 }
 0x6e2   :  { %v2216_v17 = vpop.eup %2215 }
 0x6e3   :  { %v1146_v23 = vadd.f32 1.0, %v2216_v17 }
 0x6e5   :  { %2217 = vrcp.f32 %v1146_v23  ;;  %v1158_v27 = vand.u32 2147483648, %v1146_v23  ;;  %vm1152_vm15 = vweird.f32 %v1146_v23  ;;  %v1156_v26 = vand.u32 2147483647, %v1146_v23 }
 0x6e7   :  { %v1159_v48 = vor.u32 1.1754944e-38, %v1158_v27  ;;  %vm1157_vm2 = vcmp.eq.f32.partialorder %v1156_v26, 8.507059e+37 }
 0x6eb   :  { %v2218_v39 = vpop.eup %2217 }
 0x6ec   :  { %v1148_v28 = vmul.f32 %v2218_v39, %v1146_v23  ;;  %vm1153_vm14 = vweird.f32 %v2218_v39 }
 0x6ed   :  { %vm1154_vm1 = vmor %vm1152_vm15, %vm1153_vm14 }
 0x6ee   :  { %v1149_v51 = vsub.f32 1.0, %v1148_v28 }
 0x6f0   :  { %v1150_v15 = vmul.f32 %v2218_v39, %v1149_v51 }
 0x6f2   :  { %v1151_v25 = vadd.f32 %v2218_v39, %v1150_v15 }
 0x6f4   :  { %v1155_v10 = vsel %vm1154_vm1, %v2218_v39, %v1151_v25 }
 0x6f5   :  { %v1160_v35 = vsel %vm1157_vm2, %v1159_v48, %v1155_v10 }
 0x6f6   :  { %v1163_v43 = vmul.f32 %v1160_v35, %v1111_v14 }
 0x753   :  { %v1166_v42 = vpop.permute.xlu0 %1165 }
 0x754   :  { %v1168_v41 = vmul.f32 %v1166_v42, %v1160_v35 }
 0x756   :  { %1170 = vrot.lane.b32.xlu1 %v1168_v41, %s2425_s30 }
 0x7c8   :  { %v1171_v33 = vpop.permute.xlu1 %1170 }
 0x7c9   :  { %v1173_v52 = vadd.f32 %v1171_v33, %v1163_v43 }
 0x7cb   :  { %2219 = vtanh.f32 %v1173_v52 }
 0x7d1   :  { %v2220_v32 = vpop.eup %2219 }
 0x7d2   :  { %1176 = vrot.lane.b32.xlu2 %v2220_v32, %s2424_s29  ;;  %v1439_v32 = vld [vmem:[%s3245_s6 + $0x38] sm:$0xff] }
 0x7d3   :  { %1531 = vmatpush.msra.mxu1 %v1439_v32 }
 0x82c   :  { %v1177_v24 = vpop.permute.xlu2 %1176 }
 0x82d   :  { %v1179_v19 = vmul.f32 %v1177_v24, %v1160_v35  ;;  %v1438_v24 = vld [vmem:[%s3245_s6 + $0x30] sm:$0xff] }
 0x82e   :  { %1532 = vmatpush.msra.mxu1 %v1438_v24 }
 0x82f   :  { %1181 = vrot.lane.b32.xlu0 %v1179_v19, %s2425_s30  ;;  %v1437_v19 = vld [vmem:[%s3245_s6 + $0x28] sm:$0xff] }
 0x830   :  { %1533 = vmatpush.msra.mxu1 %v1437_v19 }
 0x8a1   :  { %v1182_v60 = vpop.permute.xlu0 %1181 }
 0x8a2   :  { %1809 = vmatmul.msk.f32.vlgmr.msra.gmra.mxu2 %vm877_vm0, %v1182_v60 }
 0x8a3   :  { %1841 = vmatpush.msra.mxu2 %v1439_v32 }
 0x8a5   :  { %1842 = vmatpush.msra.mxu2 %v1438_v24 }
 0x8a7   :  { %1843 = vmatpush.msra.mxu2 %v1437_v19 }
 0x925   :  { %v1202_v34 = vpop.f32.mrf.mxu2 }
 0x926   :  { %v1203_v47 = vadd.f32 %v1202_v34, %v926_v2 }
 0x928   :  { %2221 = vtanh.f32 %v1203_v47  ;;  %v1810_v11 = vmul.f32 -1.442695, %v1203_v47  ;;  %v1435_v47 = vld [vmem:[%s3245_s6 + $0x18] sm:$0xff] }
 0x92a   :  { %2223 = vpow2.f32 %v1810_v11  ;;  %v1433_v11 = vld [vmem:[%s3245_s6 + $0x8] sm:$0xff] }
 0x92e   :  { %v2222_v4 = vpop.eup %2221 }
 0x92f   :  { %1227 = vrot.lane.b32.xlu1 %v2222_v4, %s2424_s29  ;;  %v1434_v4 = vld [vmem:[%s3245_s6 + $0x10] sm:$0xff] }
 0x930   :  { %v2224_v5 = vpop.eup %2223 }
 0x931   :  { %v1208_v59 = vadd.f32 1.0, %v2224_v5  ;;  %v1432_v5 = vld [vmem:[%s3245_s6] sm:$0xff] }
 0x933   :  { %2225 = vrcp.f32 %v1208_v59  ;;  %v1220_v62 = vand.u32 2147483648, %v1208_v59  ;;  %vm1214_vm4 = vweird.f32 %v1208_v59  ;;  %v1218_v55 = vand.u32 2147483647, %v1208_v59 }
 0x935   :  { %v1221_v22 = vor.u32 1.1754944e-38, %v1220_v62  ;;  %vm1219_vm6 = vcmp.eq.f32.partialorder %v1218_v55, 8.507059e+37 }
 0x939   :  { %v2226_v61 = vpop.eup %2225 }
 0x93a   :  { %v1210_v1 = vmul.f32 %v2226_v61, %v1208_v59  ;;  %vm1215_vm3 = vweird.f32 %v2226_v61 }
 0x93b   :  { %vm1216_vm5 = vmor %vm1214_vm4, %vm1215_vm3 }
 0x93c   :  { %v1211_v57 = vsub.f32 1.0, %v1210_v1 }
 0x93e   :  { %v1212_v13 = vmul.f32 %v2226_v61, %v1211_v57 }
 0x940   :  { %v1213_v46 = vadd.f32 %v2226_v61, %v1212_v13 }
 0x942   :  { %v1217_v6 = vsel %vm1216_vm5, %v2226_v61, %v1213_v46  ;;  %v3067_v61 = vld [vmem:[#allocation7 + $0x1] ss:$0 sm:$0xff]  ;;  %vm1564_vm5 = vcmask 130048  }
 0x943   :  { %v1222_v20 = vsel %vm1219_vm6, %v1221_v22, %v1217_v6 }
 0x944   :  { %v1225_v21 = vmul.f32 %v1222_v20, %v1173_v52 }
 0x9a1   :  { %v1228_v12 = vpop.permute.xlu1 %1227 }
 0x9a2   :  { %v1230_v9 = vmul.f32 %v1228_v12, %v1222_v20 }
 0x9a4   :  { %1232 = vrot.lane.b32.xlu2 %v1230_v9, %s2425_s30 }
 0x9fe   :  { %v1233_v16 = vpop.permute.xlu2 %1232 }
 0x9ff   :  { %v1235_v56 = vadd.f32 %v1233_v16, %v1225_v21 }
 0xa01   :  { %2227 = vtanh.f32 %v1235_v56 }
 0xa07   :  { %v2228_v38 = vpop.eup %2227 }
 0xa08   :  { %1238 = vrot.lane.b32.xlu0 %v2228_v38, %s2424_s29 }
 0xa7a   :  { %v1239_v14 = vpop.permute.xlu0 %1238 }
 0xa7b   :  { %v1241_v36 = vmul.f32 %v1239_v14, %v1222_v20  ;;  %v932_v14 = vadd.f32 %v3001_v30, %v2997_v18 }
 0xa7d   :  { %1243 = vrot.lane.b32.xlu1 %v1241_v36, %s2425_s30 }
 0xaef   :  { %v1244_v37 = vpop.permute.xlu1 %1243 }
 0xaf0   :  { %1811 = vmatmul.msk.f32.vlgmr.msra.gmra.mxu3 %vm877_vm0, %v1244_v37 }
 0xaf8   :  { %1817 = vmatmul.msk.f32.vlgmr.msrb.gmra.mxu3 %vm877_vm0, %v2685_v44 }
 0xb00   :  { %1818 = vmatmul.msk.f32.gmra.mxu3 %vm877_vm0, %v2989_v53 }
 0xb08   :  { %1819 = vmatmul.msk.f32.gmra.mxu3 %vm877_vm0, %v3009_v58 }
 0xb10   :  { %1820 = vmatmul.msk.f32.gmra.mxu3 %vm877_vm0, %v1182_v60  ;;  %v1436_v60 = vld [vmem:[%s3245_s6 + $0x20] sm:$0xff]  ;;  %s2434_s6 = smov [#allocation10]  }
 0xb11   :  { %1534 = vmatpush.msra.mxu1 %v1436_v60  ;;  %1844 = vmatpush.msra.mxu2 %v1436_v60 }
 0xb13   :  { %1535 = vmatpush.msra.mxu1 %v1435_v47  ;;  %1845 = vmatpush.msra.mxu2 %v1435_v47 }
 0xb15   :  { %1536 = vmatpush.msra.mxu1 %v1434_v4  ;;  %1846 = vmatpush.msra.mxu2 %v1434_v4 }
 0xb17   :  { %1537 = vmatpush.msra.mxu1 %v1433_v11  ;;  %1847 = vmatpush.msra.mxu2 %v1433_v11 }
 0xb18   :  { %1821 = vmatmul.msk.f32.gmra.mxu3 %vm877_vm0, %v1244_v37 }
 0xb19   :  { %1538 = vmatpush.msra.mxu1 %v1432_v5  ;;  %1848 = vmatpush.msra.mxu2 %v1432_v5 }
 0xb73   :  { %v1264_v3 = vpop.f32.mrf.mxu3 }
 0xb74   :  { %v1265_v17 = vadd.f32 %v1264_v3, %v929_v29 }
 0xb76   :  { %2229 = vtanh.f32 %v1265_v17  ;;  %v1812_v44 = vmul.f32 -1.442695, %v1265_v17 }
 0xb78   :  { %2231 = vpow2.f32 %v1812_v44 }
 0xb7b   :  { %v1465_v59 = vpop.f32.mrf.mxu3 }
 0xb7c   :  { %v2230_v23 = vpop.eup %2229  ;;  %v1466_v13 = vadd.f32 %v3067_v61, %v1465_v59 }
 0xb7d   :  { %1289 = vrot.lane.b32.xlu2 %v2230_v23, %s2424_s29 }
 0xb7e   :  { %v2232_v39 = vpop.eup %2231  ;;  %v1489_v46 = vmax.f32 %v1466_v13, 0.0 }
 0xb7f   :  { %v1270_v53 = vadd.f32 1.0, %v2232_v39 }
 0xb81   :  { %2233 = vrcp.f32 %v1270_v53  ;;  %v1282_v27 = vand.u32 2147483648, %v1270_v53  ;;  %vm1276_vm8 = vweird.f32 %v1270_v53  ;;  %v1280_v54 = vand.u32 2147483647, %v1270_v53 }
 0xb83   :  { %v1283_v10 = vor.u32 1.1754944e-38, %v1282_v27  ;;  %vm1281_vm10 = vcmp.eq.f32.partialorder %v1280_v54, 8.507059e+37  ;;  %v1468_v57 = vpop.f32.mrf.mxu3 }
 0xb84   :  { %v1469_v62 = vadd.f32 %v3067_v61, %v1468_v57 }
 0xb86   :  { %v1490_v6 = vmax.f32 %v1469_v62, 0.0 }
 0xb87   :  { %v2234_v28 = vpop.eup %2233 }
 0xb88   :  { %v1272_v58 = vmul.f32 %v2234_v28, %v1270_v53  ;;  %vm1277_vm7 = vweird.f32 %v2234_v28 }
 0xb89   :  { %vm1278_vm9 = vmor %vm1276_vm8, %vm1277_vm7 }
 0xb8a   :  { %v1273_v51 = vsub.f32 1.0, %v1272_v58 }
 0xb8b   :  { %v1471_v55 = vpop.f32.mrf.mxu3 }
 0xb8c   :  { %v1274_v15 = vmul.f32 %v2234_v28, %v1273_v51  ;;  %v1472_v22 = vadd.f32 %v3067_v61, %v1471_v55 }
 0xb8e   :  { %v1275_v25 = vadd.f32 %v2234_v28, %v1274_v15  ;;  %v1491_v20 = vmax.f32 %v1472_v22, 0.0 }
 0xb90   :  { %v1279_v26 = vsel %vm1278_vm9, %v2234_v28, %v1275_v25 }
 0xb91   :  { %v1284_v42 = vsel %vm1281_vm10, %v1283_v10, %v1279_v26 }
 0xb92   :  { %v1287_v41 = vmul.f32 %v1284_v42, %v1235_v56 }
 0xb93   :  { %v1474_v12 = vpop.f32.mrf.mxu3 }
 0xb94   :  { %v1475_v9 = vadd.f32 %v3067_v61, %v1474_v12 }
 0xb96   :  { %v1492_v21 = vmax.f32 %v1475_v9, 0.0  ;;  %v3098_v9 = vld [vmem:[#allocation7 + $0x2] ss:$0 sm:$0xff] }
 0xb9b   :  { %v1477_v16 = vpop.f32.mrf.mxu3 }
 0xb9c   :  { %v1478_v56 = vadd.f32 %v3067_v61, %v1477_v16 }
 0xb9e   :  { %v1493_v38 = vmax.f32 %v1478_v56, 0.0 }
 0xbd7   :  { %v1290_v48 = vpop.permute.xlu2 %1289 }
 0xbd8   :  { %v1292_v35 = vmul.f32 %v1290_v48, %v1284_v42 }
 0xbda   :  { %1294 = vrot.lane.b32.xlu0 %v1292_v35, %s2425_s30 }
 0xc4c   :  { %v1295_v43 = vpop.permute.xlu0 %1294 }
 0xc4d   :  { %v3038_v33 = vadd.f32 %v1295_v43, %v1287_v41 }
 0xc4f   :  { %2235 = vtanh.f32 %v3038_v33 }
 0xc55   :  { %v2236_v52 = vpop.eup %2235 }
 0xc56   :  { %1300 = vrot.lane.b32.xlu1 %v2236_v52, %s2424_s29 }
 0xcc8   :  { %v1301_v2 = vpop.permute.xlu1 %1300 }
 0xcc9   :  { %v1303_v34 = vmul.f32 %v1301_v2, %v1284_v42 }
 0xccb   :  { %1305 = vrot.lane.b32.xlu2 %v1303_v34, %s2425_s30 }
 0xd25   :  { %v1306_v1 = vpop.permute.xlu2 %1305 }
 0xd26   :  { %1813 = vmatmul.msk.f32.vlgmr.msrb.gmra.mxu1 %vm877_vm0, %v1306_v1  ;;  %1822 = vmatmul.msk.f32.gmra.mxu3 %vm877_vm0, %v1306_v1 }
 0xd2e   :  { %1825 = vmatmul.msk.f32.vlgmr.msra.gmra.mxu1 %vm1498_vm11, %v1489_v46 }
 0xd36   :  { %1826 = vmatmul.msk.f32.gmra.mxu1 %vm1498_vm11, %v1490_v6 }
 0xd3e   :  { %1827 = vmatmul.msk.f32.gmra.mxu1 %vm1498_vm11, %v1491_v20 }
 0xd46   :  { %1828 = vmatmul.msk.f32.gmra.mxu1 %vm1498_vm11, %v1492_v21 }
 0xd4e   :  { %1829 = vmatmul.msk.f32.gmra.mxu1 %vm1498_vm11, %v1493_v38 }
 0xda3   :  { %v1326_v36 = vpop.f32.mrf.mxu1 }
 0xda4   :  { %v1327_v31 = vadd.f32 %v1326_v36, %v932_v14 }
 0xda6   :  { %2237 = vtanh.f32 %v1327_v31  ;;  %v1814_v49 = vmul.f32 -1.442695, %v1327_v31 }
 0xda8   :  { %2239 = vpow2.f32 %v1814_v49 }
 0xda9   :  { %v1480_v42 = vpop.f32.mrf.mxu3 }
 0xdaa   :  { %v1481_v41 = vadd.f32 %v3067_v61, %v1480_v42 }
 0xdab   :  { %v1540_v22 = vpop.f32.mrf.mxu1 }
 0xdac   :  { %v2238_v45 = vpop.eup %2237  ;;  %v1494_v43 = vmax.f32 %v1481_v41, 0.0  ;;  %v1541_v21 = vadd.f32 %v3098_v9, %v1540_v22 }
 0xdad   :  { %1351 = vrot.lane.b32.xlu0 %v2238_v45, %s2424_s29 }
 0xdae   :  { %v2240_v0 = vpop.eup %2239  ;;  %v1565_v56 = vsel %vm1564_vm5, %v1541_v21, -inf }
 0xdaf   :  { %v1332_v37 = vadd.f32 1.0, %v2240_v0 }
 0xdb1   :  { %2241 = vrcp.f32 %v1332_v37  ;;  %v1344_v39 = vand.u32 2147483648, %v1332_v37  ;;  %vm1338_vm13 = vweird.f32 %v1332_v37  ;;  %v1342_v18 = vand.u32 2147483647, %v1332_v37 }
 0xdb3   :  { %v1345_v28 = vor.u32 1.1754944e-38, %v1344_v39  ;;  %vm1343_vm15 = vcmp.eq.f32.partialorder %v1342_v18, 8.507059e+37  ;;  %v1543_v12 = vpop.f32.mrf.mxu1 }
 0xdb7   :  { %v2242_v29 = vpop.eup %2241 }
 0xdb8   :  { %v1334_v3 = vmul.f32 %v2242_v29, %v1332_v37  ;;  %vm1339_vm12 = vweird.f32 %v2242_v29 }
 0xdb9   :  { %vm1340_vm14 = vmor %vm1338_vm13, %vm1339_vm12 }
 0xdba   :  { %v1335_v17 = vsub.f32 1.0, %v1334_v3  ;;  %v3114_v3 = vadd.f32 %v3098_v9, %v1543_v12 }
 0xdbb   :  { %v1546_v20 = vpop.f32.mrf.mxu1 }
 0xdbc   :  { %v1336_v23 = vmul.f32 %v2242_v29, %v1335_v17  ;;  %v1568_v17 = vsel %vm1564_vm5, %v3114_v3, -inf }
 0xdbe   :  { %v1337_v44 = vadd.f32 %v2242_v29, %v1336_v23 }
 0xdc0   :  { %v1341_v53 = vsel %vm1340_vm14, %v2242_v29, %v1337_v44 }
 0xdc1   :  { %v1346_v51 = vsel %vm1343_vm15, %v1345_v28, %v1341_v53 }
 0xdc2   :  { %v1349_v25 = vmul.f32 %v1346_v51, %v3038_v33  ;;  %v935_v33 = vadd.f32 %v3001_v30, %v2999_v8 }
 0xdc3   :  { %v1549_v16 = vpop.f32.mrf.mxu1 }
 0xdc4   :  { %v3103_v38 = vadd.f32 %v3098_v9, %v1549_v16  ;;  %v3248_v16 = vmov 4  }
 0xdc6   :  { %v1574_v14 = vsel %vm1564_vm5, %v3103_v38, -inf }
 0xdcb   :  { %v1552_v36 = vpop.f32.mrf.mxu1 }
 0xdcc   :  { %v3108_v31 = vadd.f32 %v3098_v9, %v1552_v36 }
 0xdce   :  { %v1577_v45 = vsel %vm1564_vm5, %v3108_v31, -inf }
 0xe1f   :  { %v1352_v58 = vpop.permute.xlu0 %1351 }
 0xe20   :  { %v1354_v15 = vmul.f32 %v1352_v58, %v1346_v51 }
 0xe22   :  { %1356 = vrot.lane.b32.xlu1 %v1354_v15, %s2425_s30  ;;  %v3127_v15 = vld [vmem:[#allocation2] sm:$0xff] }
 0xe94   :  { %v1357_v27 = vpop.permute.xlu1 %1356 }
 0xe95   :  { %v1359_v54 = vadd.f32 %v1357_v27, %v1349_v25 }
 0xe97   :  { %2243 = vtanh.f32 %v1359_v54 }
 0xe9d   :  { %v2244_v26 = vpop.eup %2243 }
 0xe9e   :  { %1362 = vrot.lane.b32.xlu2 %v2244_v26, %s2424_s29  ;;  %v3133_v26 = vadd.f32 %v3098_v9, %v1546_v20 }
 0xea0   :  { %v1571_v42 = vsel %vm1564_vm5, %v3133_v26, -inf }
 0xef8   :  { %v1363_v10 = vpop.permute.xlu2 %1362 }
 0xef9   :  { %v1365_v48 = vmul.f32 %v1363_v10, %v1346_v51 }
 0xefb   :  { %1367 = vrot.lane.b32.xlu0 %v1365_v48, %s2425_s30 }
 0xf6d   :  { %v1368_v35 = vpop.permute.xlu0 %1367 }
 0xf6e   :  { %1815 = vmatmul.msk.f32.vlgmr.msrb.gmra.mxu2 %vm877_vm0, %v1368_v35  ;;  %1823 = vmatmul.msk.f32.gmra.mxu3 %vm877_vm0, %v1368_v35 }
 0xf76   :  { %1830 = vmatmul.msk.f32.vlgmr.msra.gmra.mxu2 %vm1498_vm11, %v1494_v43 }
 0xff1   :  { %v1388_v52 = vpop.f32.mrf.mxu2  ;;  %v1483_v32 = vpop.f32.mrf.mxu3 }
 0xff2   :  { %v1389_v24 = vadd.f32 %v1388_v52, %v935_v33  ;;  %v1484_v19 = vadd.f32 %v3067_v61, %v1483_v32 }
 0xff4   :  { %2245 = vtanh.f32 %v1389_v24  ;;  %v1495_v60 = vmax.f32 %v1484_v19, 0.0  ;;  %v1816_v34 = vmul.f32 -1.442695, %v1389_v24 }
 0xff6   :  { %1831 = vmatmul.msk.f32.gmra.mxu2 %vm1498_vm11, %v1495_v60  ;;  %2247 = vpow2.f32 %v1816_v34  ;;  %v1653_v60 = vlaneseq }
 0xff9   :  { %v1555_v23 = vpop.f32.mrf.mxu2 }
 0xffa   :  { %v2246_v2 = vpop.eup %2245  ;;  %v3119_v44 = vadd.f32 %v3098_v9, %v1555_v23 }
 0xffb   :  { %1413 = vrot.lane.b32.xlu1 %v2246_v2, %s2424_s29  ;;  %v3152_v2 = vand.u32 127, %v1653_v60 }
 0xffc   :  { %v2248_v47 = vpop.eup %2247  ;;  %v1580_v39 = vsel %vm1564_vm5, %v3119_v44, -inf }
 0xffd   :  { %v1394_v4 = vadd.f32 1.0, %v2248_v47 }
 0xfff   :  { %2249 = vrcp.f32 %v1394_v4  ;;  %v1406_v1 = vand.u32 2147483648, %v1394_v4  ;;  %vm1400_vm2 = vweird.f32 %v1394_v4  ;;  %v1404_v57 = vand.u32 2147483647, %v1394_v4 }
0x1001   :  { %v1407_v46 = vor.u32 1.1754944e-38, %v1406_v1  ;;  %vm1405_vm4 = vcmp.eq.f32.partialorder %v1404_v57, 8.507059e+37 }
0x1005   :  { %v2250_v11 = vpop.eup %2249 }
0x1006   :  { %v1396_v5 = vmul.f32 %v2250_v11, %v1394_v4  ;;  %vm1401_vm1 = vweird.f32 %v2250_v11 }
0x1007   :  { %vm1402_vm3 = vmor %vm1400_vm2, %vm1401_vm1 }
0x1008   :  { %v1397_v8 = vsub.f32 1.0, %v1396_v5 }
0x100a   :  { %v1398_v30 = vmul.f32 %v2250_v11, %v1397_v8 }
0x100c   :  { %v1399_v59 = vadd.f32 %v2250_v11, %v1398_v30 }
0x100e   :  { %v1403_v13 = vsel %vm1402_vm3, %v2250_v11, %v1399_v59 }
0x100f   :  { %v1408_v55 = vsel %vm1405_vm4, %v1407_v46, %v1403_v13 }
0x1010   :  { %v1411_v49 = vmul.f32 %v1408_v55, %v1359_v54  ;;  %v2433_v54 = vmov 7  }
0x106d   :  { %v1414_v62 = vpop.permute.xlu1 %1413 }
0x106e   :  { %v1416_v6 = vmul.f32 %v1414_v62, %v1408_v55 }
0x1070   :  { %1418 = vrot.lane.b32.xlu2 %v1416_v6, %s2425_s30 }
0x1079   :  { %v1558_v35 = vpop.f32.mrf.mxu2 }
0x107a   :  { %v3142_v43 = vadd.f32 %v3098_v9, %v1558_v35 }
0x107c   :  { %v1583_v33 = vsel %vm1564_vm5, %v3142_v43, -inf }
0x1099   :  { %1566 = vmax.xlane.f32.xlu2 %v1565_v56 }
0x10a1   :  { %1575 = vmax.xlane.f32.xlu2 %v1574_v14 }
0x10a9   :  { %1578 = vmax.xlane.f32.xlu2 %v1577_v45 }
0x10ca   :  { %v1419_v0 = vpop.permute.xlu2 %1418 }
0x10cb   :  { %v1421_v37 = vadd.f32 %v1419_v0, %v1411_v49 }
0x10cd   :  { %2251 = vtanh.f32 %v1421_v37 }
0x10d3   :  { %v2252_v29 = vpop.eup %2251 }
0x10d4   :  { %1424 = vrot.lane.b32.xlu0 %v2252_v29, %s2424_s29  ;;  %s1764_s29 = sshll.u32 %s2434_s6, 4  ;;  %s1765_s29 = int_to_ptr.vmem [resolvable:$true] %s1764_s29 }
0x10fe   :  { %1569 = vmax.xlane.f32.xlu0 %v1568_v17 }
0x1106   :  { %1581 = vmax.xlane.f32.xlu0 %v1580_v39 }
0x110c   :  { %v3123_v18 = vpop.xlane.xlu2 %1566 }
0x110d   :  { %v1589_v53 = vsub.f32 %v1541_v21, %v3123_v18 }
0x110f   :  { %v1597_v28 = vmul.f32 1.442695, %v1589_v53 }
0x1111   :  { %2253 = vpow2.f32 %v1597_v28 }
0x1114   :  { %v3162_v8 = vpop.xlane.xlu2 %1575 }
0x1115   :  { %v1592_v30 = vsub.f32 %v3103_v38, %v3162_v8 }
0x1117   :  { %v2254_v58 = vpop.eup %2253  ;;  %v1603_v59 = vmul.f32 1.442695, %v1592_v30 }
0x1118   :  { %v1613_v51 = vsel %vm1564_vm5, %v2254_v58, 0.0 }
0x1119   :  { %1614 = vadd.xlane.f32.xlu0 %v1613_v51 }
0x112d   :  { %1656 = vperm.xlu0 %2178, %v3127_v15  }
0x1135   :  { %2185 = vset.pattern.permute.xlu0 %v2433_v54 }
0x1136   :  { %1698 = vperm.xlu0 %2185, %v3127_v15  }
0x1146   :  { %v1425_v25 = vpop.permute.xlu0 %1424 }
0x1147   :  { %v1427_v27 = vmul.f32 %v1425_v25, %v1408_v55 }
0x1149   :  { %1444 = vrot.lane.b32.xlu1 %v1427_v27, %s2425_s30 }
0x1171   :  { %v3135_v10 = vpop.xlane.xlu0 %1569 }
0x1172   :  { %v1590_v48 = vsub.f32 %v3114_v3, %v3135_v10 }
0x1173   :  { %1572 = vmax.xlane.f32.xlu1 %v1571_v42 }
0x1174   :  { %v1599_v41 = vmul.f32 1.442695, %v1590_v48 }
0x1176   :  { %2255 = vpow2.f32 %v1599_v41 }
0x1177   :  { %2257 = vpow2.f32 %v1603_v59 }
0x1179   :  { %v3147_v24 = vpop.xlane.xlu0 %1581 }
0x117b   :  { %1584 = vmax.xlane.f32.xlu1 %v1583_v33 }
0x117c   :  { %v2256_v52 = vpop.eup %2255 }
0x117d   :  { %v1616_v32 = vsel %vm1564_vm5, %v2256_v52, 0.0 }
0x1183   :  { %1617 = vadd.xlane.f32.xlu1 %v1616_v32 }
0x118c   :  { %v3149_v19 = vpop.xlane.xlu0 %1614 }
0x119c   :  { %1662 = vperm.xlu1 %2179, %v3127_v15  }
0x119f   :  { %v1657_v34 = vpop.permute.xlu0 %1656 }
0x11a0   :  { %vm1658_vm6 = vcmp.eq.s32.totalorder %v1657_v34, %v3152_v2 }
0x11a1   :  { %v1833_v47 = vsel %vm1658_vm6, 1.0, %v2423_v7 }
0x11a2   :  { %v1703_v4 = vmul.f32 %v1833_v47, %v1541_v21 }
0x11a4   :  { %2181 = vset.pattern.permute.xlu1 %v2429_v40  ;;  %v1711_v11 = vsel %vm1564_vm5, %v1703_v4, 0.0  ;;  %v2258_v40 = vpop.eup %2257 }
0x11a5   :  { %1674 = vperm.xlu1 %2181, %v3127_v15   ;;  %1712 = vadd.xlane.f32.xlu0 %v1711_v11  ;;  %v1622_v1 = vsel %vm1564_vm5, %v2258_v40, 0.0 }
0x11a8   :  { %v1699_v51 = vpop.permute.xlu0 %1698 }
0x11ad   :  { %2183 = vset.pattern.permute.xlu1 %v2431_v50 }
0x11ae   :  { %1686 = vperm.xlu1 %2183, %v3127_v15  }
0x11bb   :  { %v1445_v5 = vpop.permute.xlu1 %1444 }
0x11bc   :  { %1824 = vmatmul.msk.f32.gmra.mxu3 %vm877_vm0, %v1445_v5 }
0x11d8   :  { %1623 = vadd.xlane.f32.xlu1 %v1622_v1 }
0x11e6   :  { %v3167_v57 = vpop.xlane.xlu1 %1572 }
0x11e7   :  { %v1591_v50 = vsub.f32 %v3133_v26, %v3167_v57 }
0x11e9   :  { %v1601_v13 = vmul.f32 1.442695, %v1591_v50 }
0x11eb   :  { %2259 = vpow2.f32 %v1601_v13 }
0x11ec   :  { %2261 = vlog2.f32 %v3149_v19 }
0x11ee   :  { %v3172_v55 = vpop.xlane.xlu1 %1584 }
0x11f1   :  { %v2260_v46 = vpop.eup %2259 }
0x11f2   :  { %v1619_v62 = vsel %vm1564_vm5, %v2260_v46, 0.0  ;;  %v2262_v27 = vpop.eup %2261 }
0x11f3   :  { %1620 = vadd.xlane.f32.xlu2 %v1619_v62  ;;  %v1638_v35 = vmul.f32 0.6931472, %v2262_v27 }
0x11f6   :  { %v1618_v6 = vpop.xlane.xlu1 %1617 }
0x11f7   :  { %2263 = vlog2.f32 %v1618_v6 }
0x11fd   :  { %v2264_v54 = vpop.eup %2263 }
0x11fe   :  { %v1640_v41 = vmul.f32 0.6931472, %v2264_v54 }
0x120b   :  { %1668 = vperm.xlu2 %2180, %v3127_v15  }
0x120e   :  { %v1663_v22 = vpop.permute.xlu1 %1662 }
0x120f   :  { %vm1664_vm0 = vcmp.eq.s32.totalorder %v1663_v22, %v3152_v2 }
0x1210   :  { %v1834_v12 = vsel %vm1664_vm0, 1.0, %v2423_v7 }
0x1211   :  { %v1704_v20 = vmul.f32 %v1834_v12, %v3114_v3 }
0x1213   :  { %v1714_v21 = vsel %vm1564_vm5, %v1704_v20, 0.0  ;;  %2182 = vset.pattern.permute.xlu2 %v3248_v16 }
0x1214   :  { %1715 = vadd.xlane.f32.xlu1 %v1714_v21  ;;  %1680 = vperm.xlu2 %2182, %v3127_v15  }
0x1217   :  { %v1675_v56 = vpop.permute.xlu1 %1674 }
0x1218   :  { %vm1676_vm7 = vcmp.eq.s32.totalorder %v1675_v56, %v3152_v2  ;;  %v1713_v25 = vpop.xlane.xlu0 %1712 }
0x1219   :  { %v1836_v14 = vsel %vm1676_vm7, 1.0, %v2423_v7  ;;  %v1735_v48 = vsub.f32 %v1713_v25, %v3123_v18 }
0x121a   :  { %v1706_v36 = vmul.f32 %v1836_v14, %v3103_v38  ;;  %v3192_v38 = vpop.xlane.xlu2 %1578 }
0x121c   :  { %v1720_v45 = vsel %vm1564_vm5, %v1706_v36, 0.0  ;;  %2184 = vset.pattern.permute.xlu2 %v2432_v63 }
0x121d   :  { %1721 = vadd.xlane.f32.xlu0 %v1720_v45 }
0x1220   :  { %v1687_v49 = vpop.permute.xlu1 %1686 }
0x1221   :  { %vm1688_vm8 = vcmp.eq.s32.totalorder %v1687_v49, %v3152_v2 }
0x1222   :  { %v1838_v0 = vsel %vm1688_vm8, 1.0, %v2423_v7 }
0x1223   :  { %v1708_v37 = vmul.f32 %v1838_v0, %v3119_v44 }
0x1225   :  { %v1726_v29 = vsel %vm1564_vm5, %v1708_v37, 0.0 }
0x1226   :  { %1727 = vadd.xlane.f32.xlu0 %v1726_v29 }
0x123f   :  { %v1486_v3 = vpop.f32.mrf.mxu3 }
0x1240   :  { %v1487_v17 = vadd.f32 %v3067_v61, %v1486_v3 }
0x1242   :  { %v1496_v23 = vmax.f32 %v1487_v17, 0.0 }
0x1244   :  { %1832 = vmatmul.msk.f32.gmra.mxu2 %vm1498_vm11, %v1496_v23  ;;  %vm1700_vm11 = vcmp.eq.s32.totalorder %v1699_v51, %v3152_v2 }
0x1245   :  { %v1840_v21 = vsel %vm1700_vm11, 1.0, %v2423_v7 }
0x124b   :  { %v3199_v61 = vpop.xlane.xlu1 %1623 }
0x1266   :  { %v1621_v63 = vpop.xlane.xlu2 %1620 }
0x1267   :  { %2265 = vlog2.f32 %v1621_v63 }
0x126d   :  { %v2266_v47 = vpop.eup %2265 }
0x126e   :  { %v1669_v39 = vpop.permute.xlu2 %1668  ;;  %v1642_v18 = vmul.f32 0.6931472, %v2266_v47 }
0x126f   :  { %vm1670_vm9 = vcmp.eq.s32.totalorder %v1669_v39, %v3152_v2 }
0x1270   :  { %v1835_v53 = vsel %vm1670_vm9, 1.0, %v2423_v7 }
0x1271   :  { %v1705_v28 = vmul.f32 %v1835_v53, %v3133_v26  ;;  %v1743_v26 = vsub.f32 %v1735_v48, %v1638_v35 }
0x1273   :  { %v1717_v58 = vsel %vm1564_vm5, %v1705_v28, 0.0 }
0x1274   :  { %1718 = vadd.xlane.f32.xlu1 %v1717_v58 }
0x1276   :  { %v1681_v62 = vpop.permute.xlu2 %1680 }
0x1277   :  { %vm1682_vm10 = vcmp.eq.s32.totalorder %v1681_v62, %v3152_v2 }
0x1278   :  { %v1837_v22 = vsel %vm1682_vm10, 1.0, %v2423_v7 }
0x1279   :  { %v1707_v12 = vmul.f32 %v1837_v22, %v3108_v31 }
0x127b   :  { %v1723_v20 = vsel %vm1564_vm5, %v1707_v12, 0.0 }
0x1287   :  { %v1716_v42 = vpop.xlane.xlu1 %1715 }
0x1288   :  { %v1736_v33 = vsub.f32 %v1716_v42, %v3135_v10  ;;  %v1593_v10 = vsub.f32 %v3108_v31, %v3192_v38 }
0x128a   :  { %v1744_v52 = vsub.f32 %v1736_v33, %v1640_v41  ;;  %v1605_v59 = vmul.f32 1.442695, %v1593_v10 }
0x128c   :  { %v1751_v32 = vadd.f32 %v1744_v52, %v1743_v26  ;;  %2267 = vpow2.f32 %v1605_v59 }
0x1290   :  { %v1722_v39 = vpop.xlane.xlu0 %1721 }
0x1291   :  { %v1738_v58 = vsub.f32 %v1722_v39, %v3162_v8 }
0x1292   :  { %v2268_v1 = vpop.eup %2267 }
0x1293   :  { %v1625_v50 = vsel %vm1564_vm5, %v2268_v1, 0.0 }
0x1299   :  { %v1728_v42 = vpop.xlane.xlu0 %1727 }
0x129a   :  { %v1740_v26 = vsub.f32 %v1728_v42, %v3147_v24 }
0x12c7   :  { %v1561_v60 = vpop.f32.mrf.mxu2 }
0x12c8   :  { %v1562_v34 = vadd.f32 %v3098_v9, %v1561_v60  ;;  %v1594_v9 = vsub.f32 %v3119_v44, %v3147_v24 }
0x12ca   :  { %v1586_v19 = vsel %vm1564_vm5, %v1562_v34, -inf  ;;  %v1607_v40 = vmul.f32 1.442695, %v1594_v9  ;;  %v1710_v16 = vmul.f32 %v1840_v21, %v1562_v34 }
0x12cb   :  { %1587 = vmax.xlane.f32.xlu2 %v1586_v19 }
0x12cc   :  { %2269 = vpow2.f32 %v1607_v40  ;;  %v1732_v56 = vsel %vm1564_vm5, %v1710_v16, 0.0 }
0x12d2   :  { %v2270_v13 = vpop.eup %2269 }
0x12d3   :  { %v1628_v46 = vsel %vm1564_vm5, %v2270_v13, 0.0 }
0x12e3   :  { %1692 = vperm.xlu2 %2184, %v3127_v15   ;;  %v1595_v15 = vsub.f32 %v3142_v43, %v3172_v55 }
0x12e7   :  { %v1719_v4 = vpop.xlane.xlu1 %1718 }
0x12e8   :  { %v1737_v11 = vsub.f32 %v1719_v4, %v3167_v57  ;;  %v1609_v57 = vmul.f32 1.442695, %v1595_v15 }
0x12ea   :  { %v1745_v5 = vsub.f32 %v1737_v11, %v1642_v18  ;;  %2271 = vpow2.f32 %v1609_v57 }
0x12ec   :  { %v3207_v30 = vadd.f32 %v1751_v32, %v1745_v5 }
0x12f0   :  { %v2272_v6 = vpop.eup %2271 }
0x12f1   :  { %v1631_v44 = vsel %vm1564_vm5, %v2272_v6, 0.0 }
0x130c   :  { %1626 = vadd.xlane.f32.xlu2 %v1625_v50 }
0x1314   :  { %1629 = vadd.xlane.f32.xlu2 %v1628_v46 }
0x131c   :  { %1632 = vadd.xlane.f32.xlu2 %v1631_v44 }
0x1324   :  { %1724 = vadd.xlane.f32.xlu2 %v1723_v20 }
0x132c   :  { %1733 = vadd.xlane.f32.xlu2 %v1732_v56 }
0x133e   :  { %v1588_v14 = vpop.xlane.xlu2 %1587 }
0x133f   :  { %v1596_v36 = vsub.f32 %v1562_v34, %v1588_v14 }
0x1341   :  { %v1611_v45 = vmul.f32 1.442695, %v1596_v36 }
0x1343   :  { %2273 = vpow2.f32 %v1611_v45 }
0x1344   :  { %2275 = vlog2.f32 %v3199_v61 }
0x1346   :  { %v1693_v49 = vpop.permute.xlu2 %1692 }
0x1347   :  { %vm1694_vm12 = vcmp.eq.s32.totalorder %v1693_v49, %v3152_v2 }
0x1348   :  { %v1839_v37 = vsel %vm1694_vm12, 1.0, %v2423_v7 }
0x1349   :  { %v2274_v0 = vpop.eup %2273  ;;  %v1709_v29 = vmul.f32 %v1839_v37, %v3142_v43 }
0x134a   :  { %v1634_v31 = vsel %vm1564_vm5, %v2274_v0, 0.0  ;;  %v2276_v53 = vpop.eup %2275 }
0x134b   :  { %1635 = vadd.xlane.f32.xlu1 %v1634_v31  ;;  %v1729_v3 = vsel %vm1564_vm5, %v1709_v29, 0.0  ;;  %v1644_v51 = vmul.f32 0.6931472, %v2276_v53 }
0x134d   :  { %v1746_v54 = vsub.f32 %v1738_v58, %v1644_v51 }
0x134f   :  { %v1753_v35 = vadd.f32 %v3207_v30, %v1746_v54 }
0x1353   :  { %1730 = vadd.xlane.f32.xlu1 %v1729_v3 }
0x137f   :  { %v1627_v17 = vpop.xlane.xlu2 %1626 }
0x1380   :  { %2277 = vlog2.f32 %v1627_v17 }
0x1386   :  { %v2278_v28 = vpop.eup %2277 }
0x1387   :  { %v1630_v23 = vpop.xlane.xlu2 %1629  ;;  %v1646_v25 = vmul.f32 0.6931472, %v2278_v28 }
0x1388   :  { %2279 = vlog2.f32 %v1630_v23 }
0x138e   :  { %v2280_v27 = vpop.eup %2279 }
0x138f   :  { %v1633_v63 = vpop.xlane.xlu2 %1632  ;;  %v1648_v61 = vmul.f32 0.6931472, %v2280_v27 }
0x1390   :  { %2281 = vlog2.f32 %v1633_v63 }
0x1396   :  { %v2282_v41 = vpop.eup %2281 }
0x1397   :  { %v1725_v2 = vpop.xlane.xlu2 %1724  ;;  %v1650_v60 = vmul.f32 0.6931472, %v2282_v41 }
0x1398   :  { %v1739_v7 = vsub.f32 %v1725_v2, %v3192_v38  ;;  %v1748_v38 = vsub.f32 %v1740_v26, %v1648_v61 }
0x139a   :  { %v1747_v48 = vsub.f32 %v1739_v7, %v1646_v25 }
0x139c   :  { %v1754_v52 = vadd.f32 %v1753_v35, %v1747_v48 }
0x139e   :  { %v1755_v18 = vadd.f32 %v1754_v52, %v1748_v38 }
0x139f   :  { %v1734_v8 = vpop.xlane.xlu2 %1733 }
0x13a0   :  { %v1742_v47 = vsub.f32 %v1734_v8, %v1588_v14 }
0x13be   :  { %v1636_v43 = vpop.xlane.xlu1 %1635 }
0x13bf   :  { %2283 = vlog2.f32 %v1636_v43 }
0x13c5   :  { %v2284_v33 = vpop.eup %2283 }
0x13c6   :  { %v1731_v32 = vpop.xlane.xlu1 %1730  ;;  %v1652_v34 = vmul.f32 0.6931472, %v2284_v33 }
0x13c7   :  { %v1741_v19 = vsub.f32 %v1731_v32, %v3172_v55 }
0x13c8   :  { %v1750_v11 = vsub.f32 %v1742_v47, %v1652_v34 }
0x13c9   :  { %v1749_v4 = vsub.f32 %v1741_v19, %v1650_v60 }
0x13cb   :  { %v1756_v5 = vadd.f32 %v1755_v18, %v1749_v4 }
0x13cd   :  { %v1757_v24 = vadd.f32 %v1756_v5, %v1750_v11 }
0x13cf   :  { %1758 = vst [vmem:[#allocation10] sm:$0xff] %v1757_v24 }
0x13d0   :  { %1769 = dma.vmem_to_hbm [thread:$0]  %s1765_s29, 128, %s1767_s11, [#allocation4]  }
0x13d1   :  { %2414 = dma.done.wait [#allocation4], 128  }
0x13d2   :  { %2415 = vsyncadd [#allocation4], 4294967168 }
0x13d3   :  { %1774 = vsyncpa [#allocation3], 1 }
0x13d4   :  { %1775 = vsyncpa [#allocation6], 1 }
0x13d5   :  { %1776 = vsyncpa [#allocation9], 1 }
0x13d6   :  { %1777 = vsyncpa [#allocation4], 1 }

</bundles_post_ra>
